<compile_context>
chip_gen: v5e
topology: v5e:2x2
jax: 0.10.0
libtpu: 0.0.40
codegen_flags: <defaults>
</compile_context>

<pallas_src>
import jax
import jax.numpy as jnp
from jax import lax
from jax.experimental import pallas as pl
from jax.experimental.pallas import tpu as pltpu

LEAKY_SLOPE = 0.01   # nn.LeakyReLU default negative_slope
BN_EPS = 1e-5        # nn.BatchNorm2d default eps


def _down_block_kernel(x_ref, w1_ref, t1_ref, w2_ref, t2_ref, o_ref):
    """One batch-tile: maxpool(2) -> conv3x3+BN+LeakyReLU -> conv3x3+BN+LeakyReLU.

    x_ref : (NB, H, W, Cin)    NHWC activations (bf16 or f32)
    w1_ref: (9*Cin, Cout)      conv1 weights, im2col layout, BN1 scale folded in
    t1_ref: (1, Cout)          f32 additive shift (conv1 bias + BN1)
    w2_ref: (9*Cout, Cout)     conv2 weights, BN2 scale folded in
    t2_ref: (1, Cout)          f32 additive shift (conv2 bias + BN2)
    o_ref : (NB*Hh*Wh, Cout)   f32 output rows ordered (n, h, w)
    """
    NB, H, W, Cin = x_ref.shape
    Hh, Wh = H // 2, W // 2
    Cout = w1_ref.shape[1]
    M = NB * Hh * Wh
    cdt = x_ref.dtype

    # ---- MaxPool2d(kernel=2, stride=2): row-pair max (major-dim split, free),
    #      then column-pair max (single sublane-split reshape). 3 vector maxes.
    x = x_ref[...]                                           # (NB, H, W, Cin)
    xs = x.reshape(NB, Hh, 2, W, Cin)
    xr = jnp.maximum(xs[:, :, 0], xs[:, :, 1])               # (NB, Hh, W, Cin)
    xc = xr.reshape(NB, Hh, Wh, 2, Cin)
    xp = jnp.max(xc, axis=3)                                 # (NB, Hh, Wh, Cin)

    def conv3x3_bn_lrelu(inp, w_ref, t_ref):
        # Zero-pad H and W by 1, fully in registers (no scratch round trip).
        C = inp.shape[-1]
        zr = jnp.zeros((NB, 1, Wh, C), inp.dtype)
        pad = jnp.concatenate([zr, inp, zr], axis=1)          # (NB, Hh+2, Wh, C)
        zc = jnp.zeros((NB, Hh + 2, 1, C), inp.dtype)
        pad = jnp.concatenate([zc, pad, zc], axis=2)          # (NB, Hh+2, Wh+2, C)
        # im2col: 9 shifted views concatenated on the channel (lane) axis.
        taps = [pad[:, dy:dy + Hh, dx:dx + Wh, :]
                for dy in range(3) for dx in range(3)]
        patches = jnp.concatenate(taps, axis=-1)              # (NB, Hh, Wh, 9C)
        patches = patches.reshape(M, 9 * C)                   # M = NB*Hh*Wh
        # Single MXU matmul, K = 9C, f32 accumulation.
        acc = jnp.dot(patches, w_ref[...],
                      preferred_element_type=jnp.float32)     # (M, Cout) f32
        y = acc + t_ref[...]                                  # folded bias + BN shift
        return jnp.where(y > 0, y, LEAKY_SLOPE * y)           # LeakyReLU (f32)

    y = conv3x3_bn_lrelu(xp, w1_ref, t1_ref)                  # (M, Cout) f32
    # Dropout(p): identity in eval mode.
    y = y.reshape(NB, Hh, Wh, Cout).astype(cdt)
    z = conv3x3_bn_lrelu(y, w2_ref, t2_ref)                   # (M, Cout) f32
    o_ref[...] = z.astype(o_ref.dtype)


def down_block_forward(x_nchw, p, *, compute_dtype=jnp.bfloat16, batch_tile=None):
    """PyTorch-equivalent DownBlock forward (eval mode). Input/Output are NCHW f32."""
    N, Cin, H, W = x_nchw.shape
    Cout = p["w1"].shape[0]
    Hh, Wh = H // 2, W // 2               # MaxPool2d(2) floors odd spatial sizes
    Hc, Wc = 2 * Hh, 2 * Wh
    nb = N if batch_tile is None else batch_tile
    assert N % nb == 0, "batch_tile must divide N"

    # NCHW -> NHWC (channels feed the contraction axis) + cast for the MXU.
    # TODO(synk): accept/return NHWC end-to-end to avoid these HBM relayout passes
    #             when this block is embedded in a fully fused network.
    x = jnp.transpose(x_nchw[:, :, :Hc, :Wc], (0, 2, 3, 1)).astype(compute_dtype)

    # Fold conv bias + eval-mode BN into per-output-channel scale/shift; fold the
    # scale into the conv weights so the in-kernel epilogue is a single add.
    s1 = p["gamma1"] / jnp.sqrt(p["var1"] + BN_EPS)
    t1 = p["beta1"] + (p["b1"] - p["mean1"]) * s1
    s2 = p["gamma2"] / jnp.sqrt(p["var2"] + BN_EPS)
    t2 = p["beta2"] + (p["b2"] - p["mean2"]) * s2

    # OIHW -> (ky, kx, Cin, Cout) -> (9*Cin, Cout): im2col weight layout matching
    # the kernel's tap order (ky outer, kx inner, channel minor).
    w1 = (jnp.transpose(p["w1"], (2, 3, 1, 0)) * s1).reshape(9 * Cin, Cout)
    w2 = (jnp.transpose(p["w2"], (2, 3, 1, 0)) * s2).reshape(9 * Cout, Cout)
    w1 = w1.astype(compute_dtype)
    w2 = w2.astype(compute_dtype)
    t1 = t1.reshape(1, Cout).astype(jnp.float32)
    t2 = t2.reshape(1, Cout).astype(jnp.float32)

    m_tile = nb * Hh * Wh
    grid_spec = pltpu.PrefetchScalarGridSpec(
        num_scalar_prefetch=0,
        # Whole batch folded into one matmul (M = N*Hh*Wh) -> grid=(1,) for small
        # N, eliminating per-step pipeline overhead.
        # TODO(synk): for large images / v7x (2 TCs, 64 MiB VMEM) tile H into row
        #             strips (1-row post-pool halo) so the grid keeps >= 2
        #             parallel steps and blocks stay well under the VMEM limit.
        grid=(N // nb,),
        in_specs=[
            pl.BlockSpec((nb, Hc, Wc, Cin), lambda b: (b, 0, 0, 0)),
            pl.BlockSpec((9 * Cin, Cout), lambda b: (0, 0)),
            pl.BlockSpec((1, Cout), lambda b: (0, 0)),
            pl.BlockSpec((9 * Cout, Cout), lambda b: (0, 0)),
            pl.BlockSpec((1, Cout), lambda b: (0, 0)),
        ],
        out_specs=pl.BlockSpec((m_tile, Cout), lambda b: (b, 0)),
    )
    out = pl.pallas_call(
        _down_block_kernel,
        out_shape=jax.ShapeDtypeStruct((N * Hh * Wh, Cout), jnp.float32),
        grid_spec=grid_spec,
        compiler_params=pltpu.CompilerParams(dimension_semantics=("parallel",)),
    )(x, w1, t1, w2, t2)
    out = out.reshape(N, Hh, Wh, Cout)
    return jnp.transpose(out, (0, 3, 1, 2))                    # back to NCHW


def ref_down_block(x_nchw, p):
    """Pure-JAX f32 reference (unfolded BN), PyTorch semantics."""
    x = jnp.transpose(x_nchw, (0, 2, 3, 1)).astype(jnp.float32)
    x = lax.reduce_window(x, -jnp.inf, lax.max, (1, 2, 2, 1), (1, 2, 2, 1), "VALID")

    def conv_bn_lrelu(x, w_oihw, b, gamma, beta, mean, var):
        w = jnp.transpose(w_oihw, (2, 3, 1, 0))
        y = lax.conv_general_dilated(x, w, (1, 1), "SAME",
                                     dimension_numbers=("NHWC", "HWIO", "NHWC"))
        y = y + b
        y = (y - mean) / jnp.sqrt(var + BN_EPS) * gamma + beta
        return jnp.where(y > 0, y, LEAKY_SLOPE * y)

    x = conv_bn_lrelu(x, p["w1"], p["b1"], p["gamma1"], p["beta1"], p["mean1"], p["var1"])
    x = conv_bn_lrelu(x, p["w2"], p["b2"], p["gamma2"], p["beta2"], p["mean2"], p["var2"])
    return jnp.transpose(x, (0, 3, 1, 2))


if __name__ == "__main__":
    # DownBlock(in_channels=4, out_channels=8, dropout_p=0.1), x: (2, 4, 16, 16) NCHW
    N, Cin, Cout, H, W = 2, 4, 8, 16, 16
    key = jax.random.PRNGKey(0)
    k = jax.random.split(key, 10)

    x = jax.random.normal(k[0], (N, Cin, H, W), jnp.float32)
    params = dict(
        # Conv2d(Cin, Cout, 3, padding=1)
        w1=0.1 * jax.random.normal(k[1], (Cout, Cin, 3, 3), jnp.float32),
        b1=0.1 * jax.random.normal(k[2], (Cout,), jnp.float32),
        # BatchNorm2d(Cout): random affine, fresh-init running stats (mean=0, var=1)
        gamma1=1.0 + 0.1 * jax.random.normal(k[3], (Cout,), jnp.float32),
        beta1=0.1 * jax.random.normal(k[4], (Cout,), jnp.float32),
        mean1=jnp.zeros((Cout,), jnp.float32),
        var1=jnp.ones((Cout,), jnp.float32),
        # Conv2d(Cout, Cout, 3, padding=1)
        w2=0.1 * jax.random.normal(k[5], (Cout, Cout, 3, 3), jnp.float32),
        b2=0.1 * jax.random.normal(k[6], (Cout,), jnp.float32),
        gamma2=1.0 + 0.1 * jax.random.normal(k[7], (Cout,), jnp.float32),
        beta2=0.1 * jax.random.normal(k[8], (Cout,), jnp.float32),
        mean2=jnp.zeros((Cout,), jnp.float32),
        var2=jnp.ones((Cout,), jnp.float32),
    )

    ref = ref_down_block(x, params)

    # Exactness check: f32 MXU path must match the f32 reference tightly.
    out_f32 = jax.block_until_ready(
        down_block_forward(x, params, compute_dtype=jnp.float32))
    assert out_f32.shape == (N, Cout, H // 2, W // 2), out_f32.shape
    assert jnp.allclose(out_f32, ref, atol=1e-4, rtol=1e-4), \
        float(jnp.max(jnp.abs(out_f32 - ref)))

    # Default perf path: bf16 MXU inputs, f32 accumulation/epilogue.
    # Tolerance reflects bf16 input precision (~2^-8 relative on two chained convs).
    out = jax.block_until_ready(down_block_forward(x, params))
    assert out.shape == (N, Cout, H // 2, W // 2), out.shape
    assert jnp.allclose(out, ref, atol=5e-2, rtol=5e-2), \
        float(jnp.max(jnp.abs(out - ref)))

    print("KERNEL_OK")
</pallas_src>

<mosaic_0001>
module attributes {stable_mosaic.version = 11 : i64} {
  func.func @_down_block_kernel(%arg0: i32, %arg1: memref<2x16x16x4xf32, #tpu.memory_space<vmem>>, %arg2: memref<36x8xf32, #tpu.memory_space<vmem>>, %arg3: memref<1x8xf32, #tpu.memory_space<vmem>>, %arg4: memref<72x8xf32, #tpu.memory_space<vmem>>, %arg5: memref<1x8xf32, #tpu.memory_space<vmem>>, %arg6: memref<128x8xf32, #tpu.memory_space<vmem>>) attributes {dimension_semantics = [#tpu.dimension_semantics<parallel>], iteration_bounds = array<i64: 1>, scalar_prefetch = 0 : i64, scratch_operands = 0 : i64, tpu.core_type = #tpu.core_type<tc>, window_params = [{transform_indices = @transform_0, window_bounds = array<i64: 2, 16, 16, 4>}, {pipeline_mode = #tpu.pipeline_mode<synchronous>, transform_indices = @transform_1, window_bounds = array<i64: 36, 8>}, {pipeline_mode = #tpu.pipeline_mode<synchronous>, transform_indices = @transform_2, window_bounds = array<i64: 1, 8>}, {pipeline_mode = #tpu.pipeline_mode<synchronous>, transform_indices = @transform_3, window_bounds = array<i64: 72, 8>}, {pipeline_mode = #tpu.pipeline_mode<synchronous>, transform_indices = @transform_4, window_bounds = array<i64: 1, 8>}, {transform_indices = @transform_5, window_bounds = array<i64: 128, 8>}]} {
    %c0 = arith.constant 0 : index
    %c0_0 = arith.constant 0 : index
    %c0_1 = arith.constant 0 : index
    %c0_2 = arith.constant 0 : index
    %0 = vector.load %arg1[%c0, %c0_0, %c0_1, %c0_2] : memref<2x16x16x4xf32, #tpu.memory_space<vmem>>, vector<2x16x16x4xf32>
    %1 = vector.shape_cast %0 : vector<2x16x16x4xf32> to vector<2x8x2x16x4xf32>
    %2 = vector.extract_strided_slice %1 {offsets = [0, 0, 0, 0, 0], sizes = [2, 8, 1, 16, 4], strides = [1, 1, 1, 1, 1]} : vector<2x8x2x16x4xf32> to vector<2x8x1x16x4xf32>
    %3 = vector.shape_cast %2 : vector<2x8x1x16x4xf32> to vector<2x8x16x4xf32>
    %4 = vector.extract_strided_slice %1 {offsets = [0, 0, 1, 0, 0], sizes = [2, 8, 1, 16, 4], strides = [1, 1, 1, 1, 1]} : vector<2x8x2x16x4xf32> to vector<2x8x1x16x4xf32>
    %5 = vector.shape_cast %4 : vector<2x8x1x16x4xf32> to vector<2x8x16x4xf32>
    %6 = arith.maximumf %3, %5 : vector<2x8x16x4xf32>
    %7 = vector.shape_cast %6 : vector<2x8x16x4xf32> to vector<2x8x8x2x4xf32>
    %cst = arith.constant dense<0xFF800000> : vector<2x8x8x4xf32>
    %8 = vector.multi_reduction <maximumf>, %7, %cst [3] : vector<2x8x8x2x4xf32> to vector<2x8x8x4xf32>
    %cst_3 = arith.constant 0.000000e+00 : f32
    %9 = vector.broadcast %cst_3 : f32 to vector<2x1x8x4xf32>
    %10 = tpu.concatenate %9, %8, %9 in 1 : vector<2x1x8x4xf32>, vector<2x8x8x4xf32>, vector<2x1x8x4xf32> -> vector<2x10x8x4xf32>
    %cst_4 = arith.constant 0.000000e+00 : f32
    %11 = vector.broadcast %cst_4 : f32 to vector<2x10x1x4xf32>
    %12 = tpu.concatenate %11, %10, %11 in 2 : vector<2x10x1x4xf32>, vector<2x10x8x4xf32>, vector<2x10x1x4xf32> -> vector<2x10x10x4xf32>
    %13 = vector.extract_strided_slice %12 {offsets = [0, 0, 0, 0], sizes = [2, 8, 8, 4], strides = [1, 1, 1, 1]} : vector<2x10x10x4xf32> to vector<2x8x8x4xf32>
    %14 = vector.extract_strided_slice %12 {offsets = [0, 0, 1, 0], sizes = [2, 8, 8, 4], strides = [1, 1, 1, 1]} : vector<2x10x10x4xf32> to vector<2x8x8x4xf32>
    %15 = vector.extract_strided_slice %12 {offsets = [0, 0, 2, 0], sizes = [2, 8, 8, 4], strides = [1, 1, 1, 1]} : vector<2x10x10x4xf32> to vector<2x8x8x4xf32>
    %16 = vector.extract_strided_slice %12 {offsets = [0, 1, 0, 0], sizes = [2, 8, 8, 4], strides = [1, 1, 1, 1]} : vector<2x10x10x4xf32> to vector<2x8x8x4xf32>
    %17 = vector.extract_strided_slice %12 {offsets = [0, 1, 1, 0], sizes = [2, 8, 8, 4], strides = [1, 1, 1, 1]} : vector<2x10x10x4xf32> to vector<2x8x8x4xf32>
    %18 = vector.extract_strided_slice %12 {offsets = [0, 1, 2, 0], sizes = [2, 8, 8, 4], strides = [1, 1, 1, 1]} : vector<2x10x10x4xf32> to vector<2x8x8x4xf32>
    %19 = vector.extract_strided_slice %12 {offsets = [0, 2, 0, 0], sizes = [2, 8, 8, 4], strides = [1, 1, 1, 1]} : vector<2x10x10x4xf32> to vector<2x8x8x4xf32>
    %20 = vector.extract_strided_slice %12 {offsets = [0, 2, 1, 0], sizes = [2, 8, 8, 4], strides = [1, 1, 1, 1]} : vector<2x10x10x4xf32> to vector<2x8x8x4xf32>
    %21 = vector.extract_strided_slice %12 {offsets = [0, 2, 2, 0], sizes = [2, 8, 8, 4], strides = [1, 1, 1, 1]} : vector<2x10x10x4xf32> to vector<2x8x8x4xf32>
    %22 = tpu.concatenate %13, %14, %15, %16, %17, %18, %19, %20, %21 in 3 : vector<2x8x8x4xf32>, vector<2x8x8x4xf32>, vector<2x8x8x4xf32>, vector<2x8x8x4xf32>, vector<2x8x8x4xf32>, vector<2x8x8x4xf32>, vector<2x8x8x4xf32>, vector<2x8x8x4xf32>, vector<2x8x8x4xf32> -> vector<2x8x8x36xf32>
    %23 = vector.shape_cast %22 : vector<2x8x8x36xf32> to vector<128x36xf32>
    %c0_5 = arith.constant 0 : index
    %c0_6 = arith.constant 0 : index
    %24 = vector.load %arg2[%c0_5, %c0_6] : memref<36x8xf32, #tpu.memory_space<vmem>>, vector<36x8xf32>
    %cst_7 = arith.constant dense<0.000000e+00> : vector<128x8xf32>
    %25 = tpu.matmul %23, %24, %cst_7 {dimension_numbers = #tpu.dot_dimension_numbers<[1], [0], [0], [1], [0, 0, 1, 1], [], []>} : vector<128x36xf32>, vector<36x8xf32>, vector<128x8xf32> -> vector<128x8xf32>
    %c0_8 = arith.constant 0 : index
    %c0_9 = arith.constant 0 : index
    %26 = vector.load %arg3[%c0_8, %c0_9] : memref<1x8xf32, #tpu.memory_space<vmem>>, vector<1x8xf32>
    %27 = vector.broadcast %26 : vector<1x8xf32> to vector<128x8xf32>
    %28 = arith.addf %25, %27 : vector<128x8xf32>
    %cst_10 = arith.constant 0.000000e+00 : f32
    %29 = vector.broadcast %cst_10 : f32 to vector<128x8xf32>
    %30 = arith.cmpf ogt, %28, %29 : vector<128x8xf32>
    %cst_11 = arith.constant 0.00999999977 : f32
    %31 = vector.broadcast %cst_11 : f32 to vector<128x8xf32>
    %32 = arith.mulf %31, %28 : vector<128x8xf32>
    %33 = arith.select %30, %28, %32 : vector<128x8xi1>, vector<128x8xf32>
    %34 = vector.shape_cast %33 : vector<128x8xf32> to vector<2x8x8x8xf32>
    %cst_12 = arith.constant 0.000000e+00 : f32
    %35 = vector.broadcast %cst_12 : f32 to vector<2x1x8x8xf32>
    %36 = tpu.concatenate %35, %34, %35 in 1 : vector<2x1x8x8xf32>, vector<2x8x8x8xf32>, vector<2x1x8x8xf32> -> vector<2x10x8x8xf32>
    %cst_13 = arith.constant 0.000000e+00 : f32
    %37 = vector.broadcast %cst_13 : f32 to vector<2x10x1x8xf32>
    %38 = tpu.concatenate %37, %36, %37 in 2 : vector<2x10x1x8xf32>, vector<2x10x8x8xf32>, vector<2x10x1x8xf32> -> vector<2x10x10x8xf32>
    %39 = vector.extract_strided_slice %38 {offsets = [0, 0, 0, 0], sizes = [2, 8, 8, 8], strides = [1, 1, 1, 1]} : vector<2x10x10x8xf32> to vector<2x8x8x8xf32>
    %40 = vector.extract_strided_slice %38 {offsets = [0, 0, 1, 0], sizes = [2, 8, 8, 8], strides = [1, 1, 1, 1]} : vector<2x10x10x8xf32> to vector<2x8x8x8xf32>
    %41 = vector.extract_strided_slice %38 {offsets = [0, 0, 2, 0], sizes = [2, 8, 8, 8], strides = [1, 1, 1, 1]} : vector<2x10x10x8xf32> to vector<2x8x8x8xf32>
    %42 = vector.extract_strided_slice %38 {offsets = [0, 1, 0, 0], sizes = [2, 8, 8, 8], strides = [1, 1, 1, 1]} : vector<2x10x10x8xf32> to vector<2x8x8x8xf32>
    %43 = vector.extract_strided_slice %38 {offsets = [0, 1, 1, 0], sizes = [2, 8, 8, 8], strides = [1, 1, 1, 1]} : vector<2x10x10x8xf32> to vector<2x8x8x8xf32>
    %44 = vector.extract_strided_slice %38 {offsets = [0, 1, 2, 0], sizes = [2, 8, 8, 8], strides = [1, 1, 1, 1]} : vector<2x10x10x8xf32> to vector<2x8x8x8xf32>
    %45 = vector.extract_strided_slice %38 {offsets = [0, 2, 0, 0], sizes = [2, 8, 8, 8], strides = [1, 1, 1, 1]} : vector<2x10x10x8xf32> to vector<2x8x8x8xf32>
    %46 = vector.extract_strided_slice %38 {offsets = [0, 2, 1, 0], sizes = [2, 8, 8, 8], strides = [1, 1, 1, 1]} : vector<2x10x10x8xf32> to vector<2x8x8x8xf32>
    %47 = vector.extract_strided_slice %38 {offsets = [0, 2, 2, 0], sizes = [2, 8, 8, 8], strides = [1, 1, 1, 1]} : vector<2x10x10x8xf32> to vector<2x8x8x8xf32>
    %48 = tpu.concatenate %39, %40, %41, %42, %43, %44, %45, %46, %47 in 3 : vector<2x8x8x8xf32>, vector<2x8x8x8xf32>, vector<2x8x8x8xf32>, vector<2x8x8x8xf32>, vector<2x8x8x8xf32>, vector<2x8x8x8xf32>, vector<2x8x8x8xf32>, vector<2x8x8x8xf32>, vector<2x8x8x8xf32> -> vector<2x8x8x72xf32>
    %49 = vector.shape_cast %48 : vector<2x8x8x72xf32> to vector<128x72xf32>
    %c0_14 = arith.constant 0 : index
    %c0_15 = arith.constant 0 : index
    %50 = vector.load %arg4[%c0_14, %c0_15] : memref<72x8xf32, #tpu.memory_space<vmem>>, vector<72x8xf32>
    %cst_16 = arith.constant dense<0.000000e+00> : vector<128x8xf32>
    %51 = tpu.matmul %49, %50, %cst_16 {dimension_numbers = #tpu.dot_dimension_numbers<[1], [0], [0], [1], [0, 0, 1, 1], [], []>} : vector<128x72xf32>, vector<72x8xf32>, vector<128x8xf32> -> vector<128x8xf32>
    %c0_17 = arith.constant 0 : index
    %c0_18 = arith.constant 0 : index
    %52 = vector.load %arg5[%c0_17, %c0_18] : memref<1x8xf32, #tpu.memory_space<vmem>>, vector<1x8xf32>
    %53 = vector.broadcast %52 : vector<1x8xf32> to vector<128x8xf32>
    %54 = arith.addf %51, %53 : vector<128x8xf32>
    %cst_19 = arith.constant 0.000000e+00 : f32
    %55 = vector.broadcast %cst_19 : f32 to vector<128x8xf32>
    %56 = arith.cmpf ogt, %54, %55 : vector<128x8xf32>
    %cst_20 = arith.constant 0.00999999977 : f32
    %57 = vector.broadcast %cst_20 : f32 to vector<128x8xf32>
    %58 = arith.mulf %57, %54 : vector<128x8xf32>
    %59 = arith.select %56, %54, %58 : vector<128x8xi1>, vector<128x8xf32>
    %c0_21 = arith.constant 0 : index
    %c0_22 = arith.constant 0 : index
    %60 = vector.load %arg6[%c0_21, %c0_22] : memref<128x8xf32, #tpu.memory_space<vmem>>, vector<128x8xf32>
    tpu.vector_store %arg6[%c0_21, %c0_22], %59 {strides = array<i32>} : memref<128x8xf32, #tpu.memory_space<vmem>>, vector<128x8xf32>,
    return
  }
  func.func @transform_0(%arg0: i32) -> (i32, i32, i32, i32) {
    %c0_i32 = arith.constant 0 : i32
    %c0_i32_0 = arith.constant 0 : i32
    %c0_i32_1 = arith.constant 0 : i32
    %c0_i32_2 = arith.constant 0 : i32
    return %arg0, %c0_i32, %c0_i32_0, %c0_i32_1 : i32, i32, i32, i32
  }
  func.func @transform_1(%arg0: i32) -> (i32, i32) {
    %c0_i32 = arith.constant 0 : i32
    %c0_i32_0 = arith.constant 0 : i32
    %c0_i32_1 = arith.constant 0 : i32
    return %c0_i32, %c0_i32_0 : i32, i32
  }
  func.func @transform_2(%arg0: i32) -> (i32, i32) {
    %c0_i32 = arith.constant 0 : i32
    %c0_i32_0 = arith.constant 0 : i32
    %c0_i32_1 = arith.constant 0 : i32
    return %c0_i32, %c0_i32_0 : i32, i32
  }
  func.func @transform_3(%arg0: i32) -> (i32, i32) {
    %c0_i32 = arith.constant 0 : i32
    %c0_i32_0 = arith.constant 0 : i32
    %c0_i32_1 = arith.constant 0 : i32
    return %c0_i32, %c0_i32_0 : i32, i32
  }
  func.func @transform_4(%arg0: i32) -> (i32, i32) {
    %c0_i32 = arith.constant 0 : i32
    %c0_i32_0 = arith.constant 0 : i32
    %c0_i32_1 = arith.constant 0 : i32
    return %c0_i32, %c0_i32_0 : i32, i32
  }
  func.func @transform_5(%arg0: i32) -> (i32, i32) {
    %c0_i32 = arith.constant 0 : i32
    %c0_i32_0 = arith.constant 0 : i32
    return %arg0, %c0_i32 : i32, i32
  }
}

</mosaic_0001>

<bundles_post_ra>
// kernel: tpu_custom_call.1
= control target key start
LH: loop header
LB: loop body
LE: loop exit
PB: predicated region body
PF: predicated region fallthrough
CT: control target
= control target key end

     0   :  { %vm1519_vm0 = vcmask 1040384   ;;  %v3339_v0 = vmov 0.0   ;;  %vm1584_vm1 = vcmask 1046528   ;;  %vm340_vm2 = vcmask 25600   ;;  %s3340_s26 = smov 4   ;;  %s3341_s10 = smov 8   ;;  %s5734_s0 = inlined_call_operand.vmem [shape: f32[2,16,16,4], index: 0, kind: input, shape index: {}]   ;;  %s5735_s1 = inlined_call_operand.vmem [shape: f32[36,8], index: 1, kind: input, shape index: {}]   ;;  %s5736_s2 = inlined_call_operand.vmem [shape: f32[1,8], index: 2, kind: input, shape index: {}]   ;;  %s5737_s3 = inlined_call_operand.vmem [shape: f32[72,8], index: 3, kind: input, shape index: {}]   ;;  %s5738_s4 = inlined_call_operand.vmem [shape: f32[1,8], index: 4, kind: input, shape index: {}]   ;;  %s5739_s5 = inlined_call_operand.vmem [shape: f32[128,8], index: 5, kind: output, shape index: {}]  }
   0x1   :  { %v1485_v1 = vrot.slane %v3339_v0, 7  ;;  %v32_v2 = vld [vmem:[%s5734_s0 + $0x60] sm:$0xff]  ;;  %v33_v3 = vld [vmem:[%s5734_s0 + $0x68] sm:$0xff]  ;;  %v34_v4 = vld [vmem:[%s5734_s0 + $0x70] sm:$0xff]  ;;  %vm1365_vm3 = vcmask 1041409   ;;  %vm1367_vm4 = vcmask 1042434  }
   0x2   :  { %v35_v5 = vld [vmem:[%s5734_s0 + $0x78] sm:$0xff]  ;;  %v90_v6 = vmax.f32 %v32_v2, %v34_v4  ;;  %vm1369_vm5 = vcmask 1043459   ;;  %vm1371_vm6 = vcmask 1044484   ;;  %vm1373_vm7 = vcmask 1045509   ;;  %v24_v62 = vld [vmem:[%s5734_s0 + $0x20] sm:$0xff]  ;;  %v25_v63 = vld [vmem:[%s5734_s0 + $0x28] sm:$0xff] }
   0x3   :  { %v3395_v7 = vsel %vm1519_vm0, 0.0, %v1485_v1  ;;  %v3398_v8 = vsel %vm1519_vm0, %v1485_v1, 0.0  ;;  %v91_v9 = vmax.f32 %v33_v3, %v35_v5  ;;  %vm1375_vm8 = vcmask 1046534   ;;  %v26_v4 = vld [vmem:[%s5734_s0 + $0x30] sm:$0xff]  ;;  %v27_v5 = vld [vmem:[%s5734_s0 + $0x38] sm:$0xff]  ;;  %s3342_s27 = smov 12  }
   0x4   :  { %5780 = vst [vmem:[#allocation2_spill] sm:$0xff] %v3395_v7  ;;  %v1585_v10 = vrot.slane %v3395_v7, 1  ;;  %v1586_v11 = vrot.slane %v3398_v8, 1  ;;  %v166_v13 = vrot.slane %v90_v6, 2  ;;  %v167_v14 = vrot.slane %v90_v6, 4  ;;  %s3344_s28 = smov 20  }
   0x5   :  { %v168_v15 = vrot.slane %v90_v6, 6  ;;  %v169_v16 = vrot.slane %v91_v9, 2  ;;  %v170_v17 = vrot.slane %v91_v9, 4  ;;  %v171_v19 = vrot.slane %v91_v9, 6  ;;  %s3345_s29 = smov 24   ;;  %s3346_s30 = smov 28  }
   0x6   :  { %v3404_v18 = vsel %vm1584_vm1, %v1585_v10, %v1586_v11  ;;  %v509_v20 = vsel %vm340_vm2, %v90_v6, -inf  ;;  %v516_v21 = vsel %vm340_vm2, %v166_v13, -inf  ;;  %v523_v24 = vsel %vm340_vm2, %v167_v14, -inf  ;;  %v20_v6 = vld [vmem:[%s5734_s0] sm:$0xff]  ;;  %v21_v14 = vld [vmem:[%s5734_s0 + $0x8] sm:$0xff]  ;;  %s3347_s6 = smov 32  }
   0x7   :  { %5781 = vst [vmem:[#allocation3_spill] sm:$0xff] %v3404_v18  ;;  %1630 = vrot.lane.b32.xlu0 %v3404_v18, %s3340_s26  ;;  %v510_v22 = vrot.slane %v509_v20, 4  ;;  %v517_v23 = vrot.slane %v516_v21, 4  ;;  %v530_v25 = vsel %vm340_vm2, %v168_v15, -inf  ;;  %v524_v26 = vrot.slane %v523_v24, 4  ;;  %v22_v15 = vld [vmem:[%s5734_s0 + $0x10] sm:$0xff] }
   0x8   :  { %v531_v27 = vrot.slane %v530_v25, 4  ;;  %v537_v28 = vsel %vm340_vm2, %v91_v9, -inf  ;;  %v544_v29 = vsel %vm340_vm2, %v169_v16, -inf  ;;  %v551_v36 = vsel %vm340_vm2, %v170_v17, -inf  ;;  %v23_v16 = vld [vmem:[%s5734_s0 + $0x18] sm:$0xff]  ;;  %s3350_s18 = smov 48  }
   0x9   :  { %v511_v30 = vmax.f32 %v509_v20, %v510_v22  ;;  %v518_v31 = vmax.f32 %v516_v21, %v517_v23  ;;  %v538_v32 = vrot.slane %v537_v28, 4  ;;  %v545_v33 = vrot.slane %v544_v29, 4  ;;  %s3351_s19 = smov 56  }
   0xa   :  { %v525_v34 = vmax.f32 %v523_v24, %v524_v26  ;;  %v532_v35 = vmax.f32 %v530_v25, %v531_v27  ;;  %v558_v37 = vsel %vm340_vm2, %v171_v19, -inf  ;;  %v552_v44 = vrot.slane %v551_v36, 4 }
   0xb   :  { %v512_v38 = vrot.slane %v511_v30, 2  ;;  %v519_v39 = vrot.slane %v518_v31, 2  ;;  %v539_v40 = vmax.f32 %v537_v28, %v538_v32  ;;  %v546_v41 = vmax.f32 %v544_v29, %v545_v33 }
   0xc   :  { %v526_v42 = vrot.slane %v525_v34, 2  ;;  %v533_v43 = vrot.slane %v532_v35, 2  ;;  %v559_v45 = vrot.slane %v558_v37, 4  ;;  %v553_v52 = vmax.f32 %v551_v36, %v552_v44 }
   0xd   :  { %v513_v46 = vmax.f32 %v511_v30, %v512_v38  ;;  %v520_v47 = vmax.f32 %v518_v31, %v519_v39  ;;  %v540_v48 = vrot.slane %v539_v40, 2  ;;  %v547_v49 = vrot.slane %v546_v41, 2 }
   0xe   :  { %v527_v50 = vmax.f32 %v525_v34, %v526_v42  ;;  %v534_v51 = vmax.f32 %v532_v35, %v533_v43  ;;  %v560_v53 = vmax.f32 %v558_v37, %v559_v45  ;;  %v554_v60 = vrot.slane %v553_v52, 2 }
   0xf   :  { %v514_v54 = vrot.slane %v513_v46, 1  ;;  %v521_v55 = vrot.slane %v520_v47, 1  ;;  %v541_v56 = vmax.f32 %v539_v40, %v540_v48  ;;  %v548_v57 = vmax.f32 %v546_v41, %v547_v49 }
  0x10   :  { %v528_v58 = vrot.slane %v527_v50, 1  ;;  %v535_v59 = vrot.slane %v534_v51, 1  ;;  %v561_v61 = vrot.slane %v560_v53, 2  ;;  %v555_v11 = vmax.f32 %v553_v52, %v554_v60 }
  0x11   :  { %v515_v0 = vmax.f32 %v513_v46, %v514_v54  ;;  %v522_v1 = vmax.f32 %v520_v47, %v521_v55  ;;  %v542_v2 = vrot.slane %v541_v56, 1  ;;  %v549_v3 = vrot.slane %v548_v57, 1 }
  0x12   :  { %v529_v9 = vmax.f32 %v527_v50, %v528_v58  ;;  %v536_v10 = vmax.f32 %v534_v51, %v535_v59  ;;  %v562_v13 = vmax.f32 %v560_v53, %v561_v61  ;;  %vm1377_vm9 = vcmask 1047559  }
  0x13   :  { %v543_v17 = vmax.f32 %v541_v56, %v542_v2  ;;  %v550_v19 = vmax.f32 %v548_v57, %v549_v3  ;;  %v1393_v20 = vsel %vm1365_vm3, %v522_v1, %v515_v0  ;;  %v556_v21 = vrot.slane %v555_v11, 1 }
  0x14   :  { %v563_v22 = vrot.slane %v562_v13, 1  ;;  %v1394_v23 = vsel %vm1367_vm4, %v529_v9, %v1393_v20  ;;  %v86_v24 = vmax.f32 %v24_v62, %v26_v4  ;;  %v87_v26 = vmax.f32 %v25_v63, %v27_v5 }
  0x15   :  { %v1395_v25 = vsel %vm1369_vm5, %v536_v10, %v1394_v23  ;;  %v3443_v27 = vmax.f32 %v20_v6, %v22_v15  ;;  %v3445_v28 = vmax.f32 %v21_v14, %v23_v16  ;;  %v557_v29 = vmax.f32 %v555_v11, %v556_v21 }
  0x16   :  { %v564_v30 = vmax.f32 %v562_v13, %v563_v22  ;;  %v1396_v31 = vsel %vm1371_vm6, %v543_v17, %v1395_v25  ;;  %v154_v32 = vrot.slane %v86_v24, 2  ;;  %v155_v34 = vrot.slane %v86_v24, 4 }
  0x17   :  { %v1397_v33 = vsel %vm1373_vm7, %v550_v19, %v1396_v31  ;;  %v156_v35 = vrot.slane %v86_v24, 6  ;;  %v157_v36 = vrot.slane %v87_v26, 2  ;;  %v158_v38 = vrot.slane %v87_v26, 4 }
  0x18   :  { %v1398_v37 = vsel %vm1375_vm8, %v557_v29, %v1397_v33  ;;  %v159_v39 = vrot.slane %v87_v26, 6  ;;  %v397_v40 = vsel %vm340_vm2, %v86_v24, -inf  ;;  %v404_v43 = vsel %vm340_vm2, %v154_v32, -inf }
  0x19   :  { %v1399_v41 = vsel %vm1377_vm9, %v564_v30, %v1398_v37  ;;  %v398_v42 = vrot.slane %v397_v40, 4  ;;  %v411_v44 = vsel %vm340_vm2, %v155_v34, -inf  ;;  %v405_v46 = vrot.slane %v404_v43, 4 }
  0x1a   :  { %v1489_v45 = vrot.slane %v1399_v41, 7  ;;  %v412_v47 = vrot.slane %v411_v44, 4  ;;  %v418_v48 = vsel %vm340_vm2, %v156_v35, -inf  ;;  %v425_v51 = vsel %vm340_vm2, %v87_v26, -inf }
  0x1b   :  { %v399_v49 = vmax.f32 %v397_v40, %v398_v42  ;;  %v419_v50 = vrot.slane %v418_v48, 4  ;;  %v432_v52 = vsel %vm340_vm2, %v157_v36, -inf  ;;  %v406_v55 = vmax.f32 %v404_v43, %v405_v46 }
  0x1c   :  { %v3458_v53 = vsel %vm1519_vm0, 0.0, %v1489_v45  ;;  %v3461_v54 = vsel %vm1519_vm0, %v1489_v45, 0.0  ;;  %v413_v56 = vmax.f32 %v411_v44, %v412_v47  ;;  %v426_v63 = vrot.slane %v425_v51, 4 }
  0x1d   :  { %5782 = vst [vmem:[#allocation4_spill] sm:$0xff] %v3458_v53  ;;  %v1597_v57 = vrot.slane %v3458_v53, 1  ;;  %v1598_v58 = vrot.slane %v3461_v54, 1  ;;  %v400_v59 = vrot.slane %v399_v49, 2  ;;  %v420_v60 = vmax.f32 %v418_v48, %v419_v50 }
  0x1e   :  { %v407_v61 = vrot.slane %v406_v55, 2  ;;  %v414_v62 = vrot.slane %v413_v56, 2  ;;  %v433_v0 = vrot.slane %v432_v52, 4  ;;  %v439_v4 = vsel %vm340_vm2, %v158_v38, -inf }
  0x1f   :  { %v3466_v1 = vsel %vm1584_vm1, %v1597_v57, %v1598_v58  ;;  %v401_v2 = vmax.f32 %v399_v49, %v400_v59  ;;  %v421_v3 = vrot.slane %v420_v60, 2  ;;  %v427_v9 = vmax.f32 %v425_v51, %v426_v63 }
  0x20   :  { %5783 = vst [vmem:[#allocation5_spill] sm:$0xff] %v3466_v1  ;;  %1638 = vrot.lane.b32.xlu2 %v3466_v1, %s3340_s26  ;;  %v408_v5 = vmax.f32 %v406_v55, %v407_v61  ;;  %v415_v6 = vmax.f32 %v413_v56, %v414_v62  ;;  %v434_v10 = vmax.f32 %v432_v52, %v433_v0  ;;  %v440_v14 = vrot.slane %v439_v4, 4 }
  0x21   :  { %v402_v11 = vrot.slane %v401_v2, 1  ;;  %v422_v13 = vmax.f32 %v420_v60, %v421_v3  ;;  %v446_v15 = vsel %vm340_vm2, %v159_v39, -inf  ;;  %v428_v19 = vrot.slane %v427_v9, 2 }
  0x22   :  { %v409_v16 = vrot.slane %v408_v5, 1  ;;  %v416_v17 = vrot.slane %v415_v6, 1  ;;  %v435_v20 = vrot.slane %v434_v10, 2  ;;  %v441_v23 = vmax.f32 %v439_v4, %v440_v14 }
  0x23   :  { %v403_v21 = vmax.f32 %v401_v2, %v402_v11  ;;  %v423_v22 = vrot.slane %v422_v13, 1  ;;  %v447_v24 = vrot.slane %v446_v15, 4  ;;  %v429_v29 = vmax.f32 %v427_v9, %v428_v19 }
  0x24   :  { %v410_v25 = vmax.f32 %v408_v5, %v409_v16  ;;  %v417_v26 = vmax.f32 %v415_v6, %v416_v17  ;;  %v436_v30 = vmax.f32 %v434_v10, %v435_v20  ;;  %v442_v32 = vrot.slane %v441_v23, 2 }
  0x25   :  { %v424_v31 = vmax.f32 %v422_v13, %v423_v22  ;;  %v448_v33 = vmax.f32 %v446_v15, %v447_v24  ;;  %v148_v34 = vrot.slane %v3443_v27, 2  ;;  %v430_v35 = vrot.slane %v429_v29, 1 }
  0x26   :  { %v437_v36 = vrot.slane %v436_v30, 1  ;;  %v1379_v37 = vsel %vm1365_vm3, %v410_v25, %v403_v21  ;;  %v149_v38 = vrot.slane %v3443_v27, 4  ;;  %v443_v39 = vmax.f32 %v441_v23, %v442_v32 }
  0x27   :  { %v449_v40 = vrot.slane %v448_v33, 2  ;;  %v1380_v41 = vsel %vm1367_vm4, %v417_v26, %v1379_v37  ;;  %v150_v42 = vrot.slane %v3443_v27, 6  ;;  %v431_v43 = vmax.f32 %v429_v29, %v430_v35 }
  0x28   :  { %v438_v44 = vmax.f32 %v436_v30, %v437_v36  ;;  %v1381_v45 = vsel %vm1369_vm5, %v424_v31, %v1380_v41  ;;  %v151_v46 = vrot.slane %v3445_v28, 2  ;;  %v444_v47 = vrot.slane %v443_v39, 1 }
  0x29   :  { %v450_v48 = vmax.f32 %v448_v33, %v449_v40  ;;  %v152_v49 = vrot.slane %v3445_v28, 4  ;;  %v153_v50 = vrot.slane %v3445_v28, 6  ;;  %v1382_v51 = vsel %vm1371_vm6, %v431_v43, %v1381_v45 }
  0x2a   :  { %v341_v52 = vsel %vm340_vm2, %v3443_v27, -inf  ;;  %v348_v55 = vsel %vm340_vm2, %v148_v34, -inf  ;;  %v355_v56 = vsel %vm340_vm2, %v149_v38, -inf  ;;  %v445_v57 = vmax.f32 %v443_v39, %v444_v47  ;;  %v36_v38 = vld [vmem:[%s5734_s0 + $0x80] sm:$0xff]  ;;  %v38_v39 = vld [vmem:[%s5734_s0 + $0x90] sm:$0xff] }
  0x2b   :  { %v451_v58 = vrot.slane %v450_v48, 1  ;;  %v1383_v59 = vsel %vm1373_vm7, %v438_v44, %v1382_v51  ;;  %v342_v60 = vrot.slane %v341_v52, 4  ;;  %v349_v61 = vrot.slane %v348_v55, 4 }
  0x2c   :  { %v356_v62 = vrot.slane %v355_v56, 4  ;;  %v362_v63 = vsel %vm340_vm2, %v150_v42, -inf  ;;  %v369_v0 = vsel %vm340_vm2, %v3445_v28, -inf  ;;  %v1384_v3 = vsel %vm1375_vm8, %v445_v57, %v1383_v59 }
  0x2d   :  { %v452_v2 = vmax.f32 %v450_v48, %v451_v58  ;;  %v343_v27 = vmax.f32 %v341_v52, %v342_v60  ;;  %v363_v4 = vrot.slane %v362_v63, 4  ;;  %v350_v5 = vmax.f32 %v348_v55, %v349_v61  ;;  %v37_v48 = vld [vmem:[%s5734_s0 + $0x88] sm:$0xff] }
  0x2e   :  { %v357_v6 = vmax.f32 %v355_v56, %v356_v62  ;;  %v370_v9 = vrot.slane %v369_v0, 4  ;;  %v376_v10 = vsel %vm340_vm2, %v151_v46, -inf  ;;  %v383_v23 = vsel %vm340_vm2, %v152_v49, -inf  ;;  %v39_v49 = vld [vmem:[%s5734_s0 + $0x98] sm:$0xff] }
  0x2f   :  { %v1385_v11 = vsel %vm1377_vm9, %v452_v2, %v1384_v3  ;;  %v344_v13 = vrot.slane %v343_v27, 2  ;;  %v364_v14 = vmax.f32 %v362_v63, %v363_v4  ;;  %v377_v15 = vrot.slane %v376_v10, 4 }
  0x30   :  { %v1487_v16 = vrot.slane %v1385_v11, 7  ;;  %v351_v17 = vrot.slane %v350_v5, 2  ;;  %v358_v19 = vrot.slane %v357_v6, 2  ;;  %v371_v20 = vmax.f32 %v369_v0, %v370_v9 }
  0x31   :  { %v345_v28 = vmax.f32 %v343_v27, %v344_v13  ;;  %v365_v21 = vrot.slane %v364_v14, 2  ;;  %v378_v22 = vmax.f32 %v376_v10, %v377_v15  ;;  %v384_v43 = vrot.slane %v383_v23, 4 }
  0x32   :  { %v3495_v24 = vsel %vm1519_vm0, 0.0, %v1487_v16  ;;  %v3498_v25 = vsel %vm1519_vm0, %v1487_v16, 0.0  ;;  %v352_v26 = vmax.f32 %v350_v5, %v351_v17  ;;  %v359_v29 = vmax.f32 %v357_v6, %v358_v19 }
  0x33   :  { %v1591_v30 = vrot.slane %v3495_v24, 1  ;;  %v1592_v31 = vrot.slane %v3498_v25, 1  ;;  %v346_v32 = vrot.slane %v345_v28, 1  ;;  %v366_v33 = vmax.f32 %v364_v14, %v365_v21 }
  0x34   :  { %v353_v34 = vrot.slane %v352_v26, 1  ;;  %v360_v35 = vrot.slane %v359_v29, 1  ;;  %v372_v36 = vrot.slane %v371_v20, 2  ;;  %v379_v37 = vrot.slane %v378_v22, 2 }
  0x35   :  { %v3509_v40 = vsel %vm1584_vm1, %v1591_v30, %v1592_v31  ;;  %v347_v41 = vmax.f32 %v345_v28, %v346_v32  ;;  %v367_v42 = vrot.slane %v366_v33, 1  ;;  %v385_v52 = vmax.f32 %v383_v23, %v384_v43 }
  0x36   :  { %1634 = vrot.lane.b32.xlu1 %v3509_v40, %s3340_s26  ;;  %v354_v44 = vmax.f32 %v352_v26, %v353_v34  ;;  %v361_v45 = vmax.f32 %v359_v29, %v360_v35  ;;  %v373_v46 = vmax.f32 %v371_v20, %v372_v36  ;;  %v380_v47 = vmax.f32 %v378_v22, %v379_v37 }
  0x37   :  { %v368_v51 = vmax.f32 %v366_v33, %v367_v42  ;;  %v390_v55 = vsel %vm340_vm2, %v153_v50, -inf  ;;  %v92_v56 = vmax.f32 %v36_v38, %v38_v39  ;;  %v386_v61 = vrot.slane %v385_v52, 2 }
  0x38   :  { %v374_v57 = vrot.slane %v373_v46, 1  ;;  %v381_v58 = vrot.slane %v380_v47, 1  ;;  %v391_v59 = vrot.slane %v390_v55, 4  ;;  %v1366_v60 = vsel %vm1365_vm3, %v354_v44, %v347_v41 }
  0x39   :  { %v1368_v62 = vsel %vm1367_vm4, %v361_v45, %v1366_v60  ;;  %v3522_v63 = vmax.f32 %v37_v48, %v39_v49  ;;  %v172_v0 = vrot.slane %v92_v56, 2  ;;  %v387_v5 = vmax.f32 %v385_v52, %v386_v61 }
  0x3a   :  { %v375_v2 = vmax.f32 %v373_v46, %v374_v57  ;;  %v382_v3 = vmax.f32 %v380_v47, %v381_v58  ;;  %v392_v27 = vmax.f32 %v390_v55, %v391_v59  ;;  %v1370_v4 = vsel %vm1369_vm5, %v368_v51, %v1368_v62 }
  0x3b   :  { %v173_v6 = vrot.slane %v92_v56, 4  ;;  %v174_v50 = vrot.slane %v92_v56, 6  ;;  %v175_v9 = vrot.slane %v3522_v63, 2  ;;  %v176_v13 = vrot.slane %v3522_v63, 4 }
  0x3c   :  { %v393_v10 = vrot.slane %v392_v27, 2  ;;  %v1372_v11 = vsel %vm1371_vm6, %v375_v2, %v1370_v4  ;;  %v177_v14 = vrot.slane %v3522_v63, 6  ;;  %v388_v15 = vrot.slane %v387_v5, 1 }
  0x3d   :  { %v1374_v16 = vsel %vm1373_vm7, %v382_v3, %v1372_v11  ;;  %v565_v17 = vsel %vm340_vm2, %v92_v56, -inf  ;;  %v572_v19 = vsel %vm340_vm2, %v172_v0, -inf  ;;  %v579_v22 = vsel %vm340_vm2, %v173_v6, -inf }
  0x3e   :  { %v394_v20 = vmax.f32 %v392_v27, %v393_v10  ;;  %v566_v28 = vrot.slane %v565_v17, 4  ;;  %v573_v21 = vrot.slane %v572_v19, 4  ;;  %v389_v23 = vmax.f32 %v387_v5, %v388_v15  ;;  %v29_v15 = vld [vmem:[%s5734_s0 + $0x48] sm:$0xff] }
  0x3f   :  { %v580_v26 = vrot.slane %v579_v22, 4  ;;  %v586_v29 = vsel %vm340_vm2, %v174_v50, -inf  ;;  %v593_v30 = vsel %vm340_vm2, %v3522_v63, -inf  ;;  %v600_v38 = vsel %vm340_vm2, %v175_v9, -inf  ;;  %v28_v50 = vld [vmem:[%s5734_s0 + $0x40] sm:$0xff] }
  0x40   :  { %v395_v31 = vrot.slane %v394_v20, 1  ;;  %v567_v32 = vmax.f32 %v565_v17, %v566_v28  ;;  %v574_v33 = vmax.f32 %v572_v19, %v573_v21  ;;  %v587_v34 = vrot.slane %v586_v29, 4  ;;  %v31_v17 = vld [vmem:[%s5734_s0 + $0x58] sm:$0xff] }
  0x41   :  { %v1376_v35 = vsel %vm1375_vm8, %v389_v23, %v1374_v16  ;;  %v581_v36 = vmax.f32 %v579_v22, %v580_v26  ;;  %v594_v37 = vrot.slane %v593_v30, 4  ;;  %v601_v46 = vrot.slane %v600_v38, 4  ;;  %v30_v16 = vld [vmem:[%s5734_s0 + $0x50] sm:$0xff]  ;;  %v40_v22 = vld [vmem:[%s5734_s0 + $0xa0] sm:$0xff] }
  0x42   :  { %v396_v39 = vmax.f32 %v394_v20, %v395_v31  ;;  %v568_v41 = vrot.slane %v567_v32, 2  ;;  %v575_v42 = vrot.slane %v574_v33, 2  ;;  %v588_v43 = vmax.f32 %v586_v29, %v587_v34  ;;  %v42_v23 = vld [vmem:[%s5734_s0 + $0xb0] sm:$0xff] }
  0x43   :  { %v582_v44 = vrot.slane %v581_v36, 2  ;;  %v595_v45 = vmax.f32 %v593_v30, %v594_v37  ;;  %v607_v47 = vsel %vm340_vm2, %v176_v13, -inf  ;;  %v602_v58 = vmax.f32 %v600_v38, %v601_v46 }
  0x44   :  { %v1378_v48 = vsel %vm1377_vm9, %v396_v39, %v1376_v35  ;;  %v569_v49 = vmax.f32 %v567_v32, %v568_v41  ;;  %v576_v51 = vmax.f32 %v574_v33, %v575_v42  ;;  %v589_v52 = vrot.slane %v588_v43, 2 }
  0x45   :  { %v1486_v55 = vrot.slane %v1378_v48, 7  ;;  %v583_v56 = vmax.f32 %v581_v36, %v582_v44  ;;  %v596_v57 = vrot.slane %v595_v45, 2  ;;  %v608_v62 = vrot.slane %v607_v47, 4 }
  0x46   :  { %v570_v59 = vrot.slane %v569_v49, 1  ;;  %v577_v60 = vrot.slane %v576_v51, 1  ;;  %v590_v61 = vmax.f32 %v588_v43, %v589_v52  ;;  %v603_v13 = vrot.slane %v602_v58, 2 }
  0x47   :  { %v3541_v63 = vsel %vm1519_vm0, 0.0, %v1486_v55  ;;  %v3544_v0 = vsel %vm1519_vm0, %v1486_v55, 0.0  ;;  %v584_v2 = vrot.slane %v583_v56, 1  ;;  %v597_v3 = vmax.f32 %v595_v45, %v596_v57 }
  0x48   :  { %5784 = vst [vmem:[#allocation6_spill] sm:$0xff] %v3541_v63  ;;  %v1588_v27 = vrot.slane %v3541_v63, 1  ;;  %v1589_v4 = vrot.slane %v3544_v0, 1  ;;  %v571_v5 = vmax.f32 %v569_v49, %v570_v59  ;;  %v578_v6 = vmax.f32 %v576_v51, %v577_v60 }
  0x49   :  { %v585_v9 = vmax.f32 %v583_v56, %v584_v2  ;;  %v591_v10 = vrot.slane %v590_v61, 1  ;;  %v598_v11 = vrot.slane %v597_v3, 1  ;;  %v609_v20 = vmax.f32 %v607_v47, %v608_v62 }
  0x4a   :  { %v3561_v19 = vsel %vm1584_vm1, %v1588_v27, %v1589_v4  ;;  %v614_v28 = vsel %vm340_vm2, %v177_v14, -inf  ;;  %v1400_v21 = vsel %vm1365_vm3, %v578_v6, %v571_v5  ;;  %v604_v30 = vmax.f32 %v602_v58, %v603_v13 }
  0x4b   :  { %1632 = vrot.lane.b32.xlu0 %v3561_v19, %s3340_s26  ;;  %v592_v26 = vmax.f32 %v590_v61, %v591_v10  ;;  %v599_v29 = vmax.f32 %v597_v3, %v598_v11  ;;  %v615_v31 = vrot.slane %v614_v28, 4  ;;  %v610_v32 = vrot.slane %v609_v20, 2 }
  0x4c   :  { %v1401_v14 = vsel %vm1367_vm4, %v585_v9, %v1400_v21  ;;  %v88_v33 = vmax.f32 %v28_v50, %v30_v16  ;;  %v3574_v34 = vmax.f32 %v29_v15, %v31_v17  ;;  %v605_v35 = vrot.slane %v604_v30, 1 }
  0x4d   :  { %v616_v36 = vmax.f32 %v614_v28, %v615_v31  ;;  %v1402_v37 = vsel %vm1369_vm5, %v592_v26, %v1401_v14  ;;  %v3577_v38 = vmax.f32 %v40_v22, %v42_v23  ;;  %v611_v39 = vmax.f32 %v609_v20, %v610_v32 }
  0x4e   :  { %v1403_v41 = vsel %vm1371_vm6, %v599_v29, %v1402_v37  ;;  %v160_v42 = vrot.slane %v88_v33, 2  ;;  %v161_v43 = vrot.slane %v88_v33, 4  ;;  %v606_v44 = vmax.f32 %v604_v30, %v605_v35 }
  0x4f   :  { %v617_v45 = vrot.slane %v616_v36, 2  ;;  %v162_v46 = vrot.slane %v88_v33, 6  ;;  %v163_v47 = vrot.slane %v3574_v34, 2  ;;  %v612_v48 = vrot.slane %v611_v39, 1 }
  0x50   :  { %v164_v49 = vrot.slane %v3574_v34, 4  ;;  %v165_v51 = vrot.slane %v3574_v34, 6  ;;  %v453_v52 = vsel %vm340_vm2, %v88_v33, -inf  ;;  %v1404_v56 = vsel %vm1373_vm7, %v606_v44, %v1403_v41 }
  0x51   :  { %v618_v55 = vmax.f32 %v616_v36, %v617_v45  ;;  %v454_v57 = vrot.slane %v453_v52, 4  ;;  %v460_v58 = vsel %vm340_vm2, %v160_v42, -inf  ;;  %v613_v59 = vmax.f32 %v611_v39, %v612_v48 }
  0x52   :  { %v461_v60 = vrot.slane %v460_v58, 4  ;;  %v467_v61 = vsel %vm340_vm2, %v161_v43, -inf  ;;  %v474_v62 = vsel %vm340_vm2, %v162_v46, -inf  ;;  %v481_v50 = vsel %vm340_vm2, %v3574_v34, -inf }
  0x53   :  { %v619_v2 = vrot.slane %v618_v55, 1  ;;  %v455_v3 = vmax.f32 %v453_v52, %v454_v57  ;;  %v468_v27 = vrot.slane %v467_v61, 4  ;;  %v475_v4 = vrot.slane %v474_v62, 4  ;;  %v41_v52 = vld [vmem:[%s5734_s0 + $0xa8] sm:$0xff] }
  0x54   :  { %v1405_v5 = vsel %vm1375_vm8, %v613_v59, %v1404_v56  ;;  %v462_v6 = vmax.f32 %v460_v58, %v461_v60  ;;  %v488_v9 = vsel %vm340_vm2, %v163_v47, -inf  ;;  %v482_v17 = vrot.slane %v481_v50, 4 }
  0x55   :  { %v620_v10 = vmax.f32 %v618_v55, %v619_v2  ;;  %v456_v11 = vrot.slane %v455_v3, 2  ;;  %v469_v13 = vmax.f32 %v467_v61, %v468_v27  ;;  %v476_v15 = vmax.f32 %v474_v62, %v475_v4  ;;  %v43_v55 = vld [vmem:[%s5734_s0 + $0xb8] sm:$0xff] }
  0x56   :  { %v463_v16 = vrot.slane %v462_v6, 2  ;;  %v489_v20 = vrot.slane %v488_v9, 4  ;;  %v495_v28 = vsel %vm340_vm2, %v164_v49, -inf  ;;  %v483_v31 = vmax.f32 %v481_v50, %v482_v17 }
  0x57   :  { %v1406_v21 = vsel %vm1377_vm9, %v620_v10, %v1405_v5  ;;  %v457_v22 = vmax.f32 %v455_v3, %v456_v11  ;;  %v470_v23 = vrot.slane %v469_v13, 2  ;;  %v477_v26 = vrot.slane %v476_v15, 2 }
  0x58   :  { %v1490_v29 = vrot.slane %v1406_v21, 7  ;;  %v464_v30 = vmax.f32 %v462_v6, %v463_v16  ;;  %v490_v32 = vmax.f32 %v488_v9, %v489_v20  ;;  %v496_v35 = vrot.slane %v495_v28, 4 }
  0x59   :  { %v458_v14 = vrot.slane %v457_v22, 1  ;;  %v471_v33 = vmax.f32 %v469_v13, %v470_v23  ;;  %v478_v34 = vmax.f32 %v476_v15, %v477_v26  ;;  %v484_v41 = vrot.slane %v483_v31, 2 }
  0x5a   :  { %v3595_v36 = vsel %vm1519_vm0, 0.0, %v1490_v29  ;;  %v3598_v37 = vsel %vm1519_vm0, %v1490_v29, 0.0  ;;  %v465_v39 = vrot.slane %v464_v30, 1  ;;  %v491_v49 = vrot.slane %v490_v32, 2 }
  0x5b   :  { %5785 = vst [vmem:[#allocation7_spill] sm:$0xff] %v3595_v36  ;;  %v1600_v42 = vrot.slane %v3595_v36, 1  ;;  %v1601_v43 = vrot.slane %v3598_v37, 1  ;;  %v459_v44 = vmax.f32 %v457_v22, %v458_v14  ;;  %v472_v45 = vrot.slane %v471_v33, 1 }
  0x5c   :  { %v466_v46 = vmax.f32 %v464_v30, %v465_v39  ;;  %v479_v47 = vrot.slane %v478_v34, 1  ;;  %v485_v48 = vmax.f32 %v483_v31, %v484_v41  ;;  %v497_v58 = vmax.f32 %v495_v28, %v496_v35 }
  0x5d   :  { %v3609_v56 = vsel %vm1584_vm1, %v1600_v42, %v1601_v43  ;;  %v473_v57 = vmax.f32 %v471_v33, %v472_v45  ;;  %v502_v59 = vsel %vm340_vm2, %v165_v51, -inf  ;;  %v492_v62 = vmax.f32 %v490_v32, %v491_v49 }
  0x5e   :  { %1640 = vrot.lane.b32.xlu2 %v3609_v56, %s3340_s26  ;;  %v480_v60 = vmax.f32 %v478_v34, %v479_v47  ;;  %v486_v61 = vrot.slane %v485_v48, 1  ;;  %v503_v2 = vrot.slane %v502_v59, 4  ;;  %v498_v3 = vrot.slane %v497_v58, 2 }
  0x5f   :  { %v1386_v27 = vsel %vm1365_vm3, %v466_v46, %v459_v44  ;;  %v3615_v4 = vmax.f32 %v41_v52, %v43_v55  ;;  %v178_v5 = vrot.slane %v3577_v38, 2  ;;  %v493_v50 = vrot.slane %v492_v62, 1 }
  0x60   :  { %v487_v6 = vmax.f32 %v485_v48, %v486_v61  ;;  %v504_v9 = vmax.f32 %v502_v59, %v503_v2  ;;  %v1387_v10 = vsel %vm1367_vm4, %v473_v57, %v1386_v27  ;;  %v499_v51 = vmax.f32 %v497_v58, %v498_v3 }
  0x61   :  { %v1388_v11 = vsel %vm1369_vm5, %v480_v60, %v1387_v10  ;;  %v179_v13 = vrot.slane %v3577_v38, 4  ;;  %v180_v15 = vrot.slane %v3577_v38, 6  ;;  %v494_v16 = vmax.f32 %v492_v62, %v493_v50 }
  0x62   :  { %v505_v17 = vrot.slane %v504_v9, 2  ;;  %v1389_v20 = vsel %vm1371_vm6, %v487_v6, %v1388_v11  ;;  %v181_v28 = vrot.slane %v3615_v4, 2  ;;  %v500_v21 = vrot.slane %v499_v51, 1 }
  0x63   :  { %v182_v22 = vrot.slane %v3615_v4, 4  ;;  %v183_v23 = vrot.slane %v3615_v4, 6  ;;  %v621_v26 = vsel %vm340_vm2, %v3577_v38, -inf  ;;  %v1390_v30 = vsel %vm1373_vm7, %v494_v16, %v1389_v20 }
  0x64   :  { %v506_v29 = vmax.f32 %v504_v9, %v505_v17  ;;  %v622_v31 = vrot.slane %v621_v26, 4  ;;  %v628_v32 = vsel %vm340_vm2, %v178_v5, -inf  ;;  %v501_v14 = vmax.f32 %v499_v51, %v500_v21  ;;  %v52_v21 = vld [vmem:[%s5734_s0 + $0x100] sm:$0xff] }
  0x65   :  { %v629_v33 = vrot.slane %v628_v32, 4  ;;  %v635_v34 = vsel %vm340_vm2, %v179_v13, -inf  ;;  %v642_v35 = vsel %vm340_vm2, %v180_v15, -inf  ;;  %v649_v38 = vsel %vm340_vm2, %v3615_v4, -inf }
  0x66   :  { %v507_v39 = vrot.slane %v506_v29, 1  ;;  %v623_v41 = vmax.f32 %v621_v26, %v622_v31  ;;  %v636_v42 = vrot.slane %v635_v34, 4  ;;  %v643_v43 = vrot.slane %v642_v35, 4  ;;  %v53_v31 = vld [vmem:[%s5734_s0 + $0x108] sm:$0xff] }
  0x67   :  { %v1391_v44 = vsel %vm1375_vm8, %v501_v14, %v1390_v30  ;;  %v630_v45 = vmax.f32 %v628_v32, %v629_v33  ;;  %v656_v46 = vsel %vm340_vm2, %v181_v28, -inf  ;;  %v650_v57 = vrot.slane %v649_v38, 4  ;;  %v54_v32 = vld [vmem:[%s5734_s0 + $0x110] sm:$0xff]  ;;  %v55_v14 = vld [vmem:[%s5734_s0 + $0x118] sm:$0xff] }
  0x68   :  { %v508_v47 = vmax.f32 %v506_v29, %v507_v39  ;;  %v624_v48 = vrot.slane %v623_v41, 2  ;;  %v637_v49 = vmax.f32 %v635_v34, %v636_v42  ;;  %v644_v52 = vmax.f32 %v642_v35, %v643_v43 }
  0x69   :  { %v631_v55 = vrot.slane %v630_v45, 2  ;;  %v657_v58 = vrot.slane %v656_v46, 4  ;;  %v663_v59 = vsel %vm340_vm2, %v182_v22, -inf  ;;  %v651_v5 = vmax.f32 %v649_v38, %v650_v57 }
  0x6a   :  { %v1392_v60 = vsel %vm1377_vm9, %v508_v47, %v1391_v44  ;;  %v625_v61 = vmax.f32 %v623_v41, %v624_v48  ;;  %v638_v62 = vrot.slane %v637_v49, 2  ;;  %v645_v2 = vrot.slane %v644_v52, 2 }
  0x6b   :  { %v1488_v3 = vrot.slane %v1392_v60, 7  ;;  %v632_v27 = vmax.f32 %v630_v45, %v631_v55  ;;  %v658_v4 = vmax.f32 %v656_v46, %v657_v58  ;;  %v664_v10 = vrot.slane %v663_v59, 4 }
  0x6c   :  { %v626_v6 = vrot.slane %v625_v61, 1  ;;  %v639_v50 = vmax.f32 %v637_v49, %v638_v62  ;;  %v646_v9 = vmax.f32 %v644_v52, %v645_v2  ;;  %v652_v15 = vrot.slane %v651_v5, 2 }
  0x6d   :  { %v3639_v51 = vsel %vm1519_vm0, 0.0, %v1488_v3  ;;  %v3642_v11 = vsel %vm1519_vm0, %v1488_v3, 0.0  ;;  %v633_v13 = vrot.slane %v632_v27, 1  ;;  %v659_v30 = vrot.slane %v658_v4, 2 }
  0x6e   :  { %5786 = vst [vmem:[#allocation8_spill] sm:$0xff] %v3639_v51  ;;  %v1594_v16 = vrot.slane %v3639_v51, 1  ;;  %v1595_v17 = vrot.slane %v3642_v11, 1  ;;  %v627_v20 = vmax.f32 %v625_v61, %v626_v6  ;;  %v640_v28 = vrot.slane %v639_v50, 1 }
  0x6f   :  { %v634_v22 = vmax.f32 %v632_v27, %v633_v13  ;;  %v647_v26 = vrot.slane %v646_v9, 1  ;;  %v653_v29 = vmax.f32 %v651_v5, %v652_v15  ;;  %v665_v35 = vmax.f32 %v663_v59, %v664_v10 }
  0x70   :  { %v3659_v33 = vsel %vm1584_vm1, %v1594_v16, %v1595_v17  ;;  %v641_v34 = vmax.f32 %v639_v50, %v640_v28  ;;  %v670_v39 = vsel %vm340_vm2, %v183_v23, -inf  ;;  %v660_v43 = vmax.f32 %v658_v4, %v659_v30 }
  0x71   :  { %1636 = vrot.lane.b32.xlu1 %v3659_v33, %s3340_s26  ;;  %v648_v41 = vmax.f32 %v646_v9, %v647_v26  ;;  %v654_v42 = vrot.slane %v653_v29, 1  ;;  %v671_v44 = vrot.slane %v670_v39, 4  ;;  %v666_v45 = vrot.slane %v665_v35, 2 }
  0x72   :  { %v1407_v38 = vsel %vm1365_vm3, %v634_v22, %v627_v20  ;;  %v100_v46 = vmax.f32 %v52_v21, %v54_v32  ;;  %v3665_v47 = vmax.f32 %v53_v31, %v55_v14  ;;  %v661_v49 = vrot.slane %v660_v43, 1 }
  0x73   :  { %v655_v48 = vmax.f32 %v653_v29, %v654_v42  ;;  %v672_v52 = vmax.f32 %v670_v39, %v671_v44  ;;  %v1408_v55 = vsel %vm1367_vm4, %v641_v34, %v1407_v38  ;;  %v667_v57 = vmax.f32 %v665_v35, %v666_v45 }
  0x74   :  { %v1409_v23 = vsel %vm1369_vm5, %v648_v41, %v1408_v55  ;;  %v196_v58 = vrot.slane %v100_v46, 2  ;;  %v197_v59 = vrot.slane %v100_v46, 4  ;;  %v662_v60 = vmax.f32 %v660_v43, %v661_v49 }
  0x75   :  { %v673_v61 = vrot.slane %v672_v52, 2  ;;  %v1410_v62 = vsel %vm1371_vm6, %v655_v48, %v1409_v23  ;;  %v198_v2 = vrot.slane %v100_v46, 6  ;;  %v668_v3 = vrot.slane %v667_v57, 1 }
  0x76   :  { %v199_v27 = vrot.slane %v3665_v47, 2  ;;  %v200_v5 = vrot.slane %v3665_v47, 4  ;;  %v201_v4 = vrot.slane %v3665_v47, 6  ;;  %v1411_v50 = vsel %vm1373_vm7, %v662_v60, %v1410_v62 }
  0x77   :  { %v674_v6 = vmax.f32 %v672_v52, %v673_v61  ;;  %v789_v9 = vsel %vm340_vm2, %v100_v46, -inf  ;;  %v796_v10 = vsel %vm340_vm2, %v196_v58, -inf  ;;  %v669_v13 = vmax.f32 %v667_v57, %v668_v3 }
  0x78   :  { %v790_v15 = vrot.slane %v789_v9, 4  ;;  %v797_v16 = vrot.slane %v796_v10, 4  ;;  %v803_v17 = vsel %vm340_vm2, %v197_v59, -inf  ;;  %v810_v21 = vsel %vm340_vm2, %v198_v2, -inf }
  0x79   :  { %v675_v20 = vrot.slane %v674_v6, 1  ;;  %v804_v28 = vrot.slane %v803_v17, 4  ;;  %v817_v22 = vsel %vm340_vm2, %v3665_v47, -inf  ;;  %v1412_v26 = vsel %vm1375_vm8, %v669_v13, %v1411_v50  ;;  %v44_v13 = vld [vmem:[%s5734_s0 + $0xc0] sm:$0xff] }
  0x7a   :  { %v791_v29 = vmax.f32 %v789_v9, %v790_v15  ;;  %v798_v30 = vmax.f32 %v796_v10, %v797_v16  ;;  %v811_v31 = vrot.slane %v810_v21, 4  ;;  %v818_v34 = vrot.slane %v817_v22, 4 }
  0x7b   :  { %v676_v32 = vmax.f32 %v674_v6, %v675_v20  ;;  %v805_v14 = vmax.f32 %v803_v17, %v804_v28  ;;  %v824_v35 = vsel %vm340_vm2, %v199_v27, -inf  ;;  %v831_v46 = vsel %vm340_vm2, %v200_v5, -inf  ;;  %v45_v28 = vld [vmem:[%s5734_s0 + $0xc8] sm:$0xff] }
  0x7c   :  { %v792_v39 = vrot.slane %v791_v29, 2  ;;  %v799_v41 = vrot.slane %v798_v30, 2  ;;  %v812_v42 = vmax.f32 %v810_v21, %v811_v31  ;;  %v825_v43 = vrot.slane %v824_v35, 4  ;;  %v46_v21 = vld [vmem:[%s5734_s0 + $0xd0] sm:$0xff] }
  0x7d   :  { %v1413_v44 = vsel %vm1377_vm9, %v676_v32, %v1412_v26  ;;  %v806_v45 = vrot.slane %v805_v14, 2  ;;  %v819_v38 = vmax.f32 %v817_v22, %v818_v34  ;;  %v832_v58 = vrot.slane %v831_v46, 4  ;;  %v47_v22 = vld [vmem:[%s5734_s0 + $0xd8] sm:$0xff]  ;;  %v56_v32 = vld [vmem:[%s5734_s0 + $0x120] sm:$0xff] }
  0x7e   :  { %v1491_v47 = vrot.slane %v1413_v44, 7  ;;  %v793_v48 = vmax.f32 %v791_v29, %v792_v39  ;;  %v800_v49 = vmax.f32 %v798_v30, %v799_v41  ;;  %v813_v52 = vrot.slane %v812_v42, 2 }
  0x7f   :  { %v807_v55 = vmax.f32 %v805_v14, %v806_v45  ;;  %v820_v57 = vrot.slane %v819_v38, 2  ;;  %v826_v23 = vmax.f32 %v824_v35, %v825_v43  ;;  %v833_v20 = vmax.f32 %v831_v46, %v832_v58  ;;  %v58_v14 = vld [vmem:[%s5734_s0 + $0x130] sm:$0xff] }
  0x80   :  { %v3685_v59 = vsel %vm1519_vm0, 0.0, %v1491_v47  ;;  %v3688_v60 = vsel %vm1519_vm0, %v1491_v47, 0.0  ;;  %v794_v61 = vrot.slane %v793_v48, 1  ;;  %v801_v62 = vrot.slane %v800_v49, 1 }
  0x81   :  { %v1603_v2 = vrot.slane %v3685_v59, 1  ;;  %v1604_v3 = vrot.slane %v3688_v60, 1  ;;  %v808_v27 = vrot.slane %v807_v55, 1  ;;  %v814_v5 = vmax.f32 %v812_v42, %v813_v52 }
  0x82   :  { %v795_v6 = vmax.f32 %v793_v48, %v794_v61  ;;  %v802_v50 = vmax.f32 %v800_v49, %v801_v62  ;;  %v821_v9 = vmax.f32 %v819_v38, %v820_v57  ;;  %v827_v10 = vrot.slane %v826_v23, 2 }
  0x83   :  { %v3696_v15 = vsel %vm1584_vm1, %v1603_v2, %v1604_v3  ;;  %v809_v16 = vmax.f32 %v807_v55, %v808_v27  ;;  %v815_v17 = vrot.slane %v814_v5, 1  ;;  %v838_v30 = vsel %vm340_vm2, %v201_v4, -inf }
  0x84   :  { %1642 = vrot.lane.b32.xlu0 %v3696_v15, %s3340_s26  ;;  %v822_v26 = vrot.slane %v821_v9, 1  ;;  %v828_v29 = vmax.f32 %v826_v23, %v827_v10  ;;  %v1428_v31 = vsel %vm1365_vm3, %v802_v50, %v795_v6  ;;  %v834_v35 = vrot.slane %v833_v20, 2 }
  0x85   :  { %v816_v34 = vmax.f32 %v814_v5, %v815_v17  ;;  %v839_v39 = vrot.slane %v838_v30, 4  ;;  %v1429_v41 = vsel %vm1367_vm4, %v809_v16, %v1428_v31  ;;  %v96_v44 = vmax.f32 %v44_v13, %v46_v21 }
  0x86   :  { %v823_v42 = vmax.f32 %v821_v9, %v822_v26  ;;  %v829_v43 = vrot.slane %v828_v29, 1  ;;  %v3718_v45 = vmax.f32 %v45_v28, %v47_v22  ;;  %v835_v4 = vmax.f32 %v833_v20, %v834_v35 }
  0x87   :  { %v840_v38 = vmax.f32 %v838_v30, %v839_v39  ;;  %v1430_v46 = vsel %vm1369_vm5, %v816_v34, %v1429_v41  ;;  %v3721_v47 = vmax.f32 %v56_v32, %v58_v14  ;;  %v184_v52 = vrot.slane %v96_v44, 2 }
  0x88   :  { %v830_v48 = vmax.f32 %v828_v29, %v829_v43  ;;  %v1431_v49 = vsel %vm1371_vm6, %v823_v42, %v1430_v46  ;;  %v185_v55 = vrot.slane %v96_v44, 4  ;;  %v836_v57 = vrot.slane %v835_v4, 1 }
  0x89   :  { %v841_v23 = vrot.slane %v840_v38, 2  ;;  %v186_v58 = vrot.slane %v96_v44, 6  ;;  %v187_v61 = vrot.slane %v3718_v45, 2  ;;  %v188_v2 = vrot.slane %v3718_v45, 4 }
  0x8a   :  { %v1432_v62 = vsel %vm1373_vm7, %v830_v48, %v1431_v49  ;;  %v189_v3 = vrot.slane %v3718_v45, 6  ;;  %v677_v27 = vsel %vm340_vm2, %v96_v44, -inf  ;;  %v837_v5 = vmax.f32 %v835_v4, %v836_v57 }
  0x8b   :  { %v842_v6 = vmax.f32 %v840_v38, %v841_v23  ;;  %v678_v50 = vrot.slane %v677_v27, 4  ;;  %v684_v9 = vsel %vm340_vm2, %v184_v52, -inf  ;;  %v691_v13 = vsel %vm340_vm2, %v185_v55, -inf }
  0x8c   :  { %v685_v10 = vrot.slane %v684_v9, 4  ;;  %v698_v16 = vsel %vm340_vm2, %v186_v58, -inf  ;;  %v705_v17 = vsel %vm340_vm2, %v3718_v45, -inf  ;;  %v1433_v28 = vsel %vm1375_vm8, %v837_v5, %v1432_v62 }
  0x8d   :  { %v843_v20 = vrot.slane %v842_v6, 1  ;;  %v679_v21 = vmax.f32 %v677_v27, %v678_v50  ;;  %v692_v22 = vrot.slane %v691_v13, 4  ;;  %v699_v29 = vrot.slane %v698_v16, 4 }
  0x8e   :  { %v686_v26 = vmax.f32 %v684_v9, %v685_v10  ;;  %v706_v30 = vrot.slane %v705_v17, 4  ;;  %v712_v31 = vsel %vm340_vm2, %v187_v61, -inf  ;;  %v719_v43 = vsel %vm340_vm2, %v188_v2, -inf }
  0x8f   :  { %v844_v32 = vmax.f32 %v842_v6, %v843_v20  ;;  %v680_v14 = vrot.slane %v679_v21, 2  ;;  %v693_v34 = vmax.f32 %v691_v13, %v692_v22  ;;  %v713_v35 = vrot.slane %v712_v31, 4  ;;  %v57_v20 = vld [vmem:[%s5734_s0 + $0x128] sm:$0xff] }
  0x90   :  { %v687_v39 = vrot.slane %v686_v26, 2  ;;  %v700_v41 = vmax.f32 %v698_v16, %v699_v29  ;;  %v707_v42 = vmax.f32 %v705_v17, %v706_v30  ;;  %v720_v58 = vrot.slane %v719_v43, 4 }
  0x91   :  { %v1434_v44 = vsel %vm1377_vm9, %v844_v32, %v1433_v28  ;;  %v681_v45 = vmax.f32 %v679_v21, %v680_v14  ;;  %v694_v4 = vrot.slane %v693_v34, 2  ;;  %v714_v38 = vmax.f32 %v712_v31, %v713_v35  ;;  %v59_v28 = vld [vmem:[%s5734_s0 + $0x138] sm:$0xff] }
  0x92   :  { %v1494_v46 = vrot.slane %v1434_v44, 7  ;;  %v688_v48 = vmax.f32 %v686_v26, %v687_v39  ;;  %v701_v49 = vrot.slane %v700_v41, 2  ;;  %v708_v52 = vrot.slane %v707_v42, 2 }
  0x93   :  { %v682_v55 = vrot.slane %v681_v45, 1  ;;  %v695_v57 = vmax.f32 %v693_v34, %v694_v4  ;;  %v715_v23 = vrot.slane %v714_v38, 2  ;;  %v721_v26 = vmax.f32 %v719_v43, %v720_v58 }
  0x94   :  { %v3739_v61 = vsel %vm1519_vm0, 0.0, %v1494_v46  ;;  %v3742_v62 = vsel %vm1519_vm0, %v1494_v46, 0.0  ;;  %v689_v2 = vrot.slane %v688_v48, 1  ;;  %v702_v27 = vmax.f32 %v700_v41, %v701_v49 }
  0x95   :  { %v1609_v5 = vrot.slane %v3739_v61, 1  ;;  %v1610_v6 = vrot.slane %v3742_v62, 1  ;;  %v683_v50 = vmax.f32 %v681_v45, %v682_v55  ;;  %v696_v9 = vrot.slane %v695_v57, 1 }
  0x96   :  { %v690_v10 = vmax.f32 %v688_v48, %v689_v2  ;;  %v703_v13 = vrot.slane %v702_v27, 1  ;;  %v709_v16 = vmax.f32 %v707_v42, %v708_v52  ;;  %v716_v17 = vmax.f32 %v714_v38, %v715_v23 }
  0x97   :  { %v3753_v21 = vsel %vm1584_vm1, %v1609_v5, %v1610_v6  ;;  %v697_v22 = vmax.f32 %v695_v57, %v696_v9  ;;  %v726_v29 = vsel %vm340_vm2, %v189_v3, -inf  ;;  %v722_v34 = vrot.slane %v721_v26, 2 }
  0x98   :  { %1646 = vrot.lane.b32.xlu2 %v3753_v21, %s3340_s26  ;;  %v704_v30 = vmax.f32 %v702_v27, %v703_v13  ;;  %v710_v31 = vrot.slane %v709_v16, 1  ;;  %v717_v32 = vrot.slane %v716_v17, 1  ;;  %v727_v14 = vrot.slane %v726_v29, 4 }
  0x99   :  { %v1414_v35 = vsel %vm1365_vm3, %v690_v10, %v683_v50  ;;  %v3759_v39 = vmax.f32 %v57_v20, %v59_v28  ;;  %v202_v41 = vrot.slane %v3721_v47, 2  ;;  %v723_v3 = vmax.f32 %v721_v26, %v722_v34 }
  0x9a   :  { %v711_v42 = vmax.f32 %v709_v16, %v710_v31  ;;  %v718_v44 = vmax.f32 %v716_v17, %v717_v32  ;;  %v728_v45 = vmax.f32 %v726_v29, %v727_v14  ;;  %v1415_v43 = vsel %vm1367_vm4, %v697_v22, %v1414_v35 }
  0x9b   :  { %v1416_v4 = vsel %vm1369_vm5, %v704_v30, %v1415_v43  ;;  %v203_v38 = vrot.slane %v3721_v47, 4  ;;  %v204_v46 = vrot.slane %v3721_v47, 6  ;;  %v205_v52 = vrot.slane %v3759_v39, 2 }
  0x9c   :  { %v729_v48 = vrot.slane %v728_v45, 2  ;;  %v1417_v49 = vsel %vm1371_vm6, %v711_v42, %v1416_v4  ;;  %v206_v55 = vrot.slane %v3759_v39, 4  ;;  %v724_v57 = vrot.slane %v723_v3, 1 }
  0x9d   :  { %v1418_v23 = vsel %vm1373_vm7, %v718_v44, %v1417_v49  ;;  %v207_v58 = vrot.slane %v3759_v39, 6  ;;  %v845_v2 = vsel %vm340_vm2, %v3721_v47, -inf  ;;  %v852_v6 = vsel %vm340_vm2, %v202_v41, -inf }
  0x9e   :  { %v730_v27 = vmax.f32 %v728_v45, %v729_v48  ;;  %v846_v5 = vrot.slane %v845_v2, 4  ;;  %v859_v50 = vsel %vm340_vm2, %v203_v38, -inf  ;;  %v725_v9 = vmax.f32 %v723_v3, %v724_v57 }
  0x9f   :  { %v853_v10 = vrot.slane %v852_v6, 4  ;;  %v860_v13 = vrot.slane %v859_v50, 4  ;;  %v866_v16 = vsel %vm340_vm2, %v204_v46, -inf  ;;  %v873_v22 = vsel %vm340_vm2, %v3759_v39, -inf }
  0xa0   :  { %v731_v17 = vrot.slane %v730_v27, 1  ;;  %v847_v20 = vmax.f32 %v845_v2, %v846_v5  ;;  %v867_v28 = vrot.slane %v866_v16, 4  ;;  %v1419_v26 = vsel %vm1375_vm8, %v725_v9, %v1418_v23 }
  0xa1   :  { %v854_v47 = vmax.f32 %v852_v6, %v853_v10  ;;  %v861_v29 = vmax.f32 %v859_v50, %v860_v13  ;;  %v874_v30 = vrot.slane %v873_v22, 4  ;;  %v880_v34 = vsel %vm340_vm2, %v205_v52, -inf  ;;  %v64_v13 = vld [vmem:[%s5734_s0 + $0x160] sm:$0xff] }
  0xa2   :  { %v732_v31 = vmax.f32 %v730_v27, %v731_v17  ;;  %v848_v32 = vrot.slane %v847_v20, 2  ;;  %v868_v14 = vmax.f32 %v866_v16, %v867_v28  ;;  %v881_v44 = vrot.slane %v880_v34, 4 }
  0xa3   :  { %v855_v35 = vrot.slane %v854_v47, 2  ;;  %v862_v41 = vrot.slane %v861_v29, 2  ;;  %v875_v42 = vmax.f32 %v873_v22, %v874_v30  ;;  %v887_v39 = vsel %vm340_vm2, %v206_v55, -inf  ;;  %v65_v22 = vld [vmem:[%s5734_s0 + $0x168] sm:$0xff] }
  0xa4   :  { %v1420_v45 = vsel %vm1377_vm9, %v732_v31, %v1419_v26  ;;  %v849_v43 = vmax.f32 %v847_v20, %v848_v32  ;;  %v869_v3 = vrot.slane %v868_v14, 2  ;;  %v882_v23 = vmax.f32 %v880_v34, %v881_v44  ;;  %v66_v26 = vld [vmem:[%s5734_s0 + $0x170] sm:$0xff] }
  0xa5   :  { %v1492_v4 = vrot.slane %v1420_v45, 7  ;;  %v856_v38 = vmax.f32 %v854_v47, %v855_v35  ;;  %v863_v46 = vmax.f32 %v861_v29, %v862_v41  ;;  %v876_v48 = vrot.slane %v875_v42, 2  ;;  %v67_v47 = vld [vmem:[%s5734_s0 + $0x178] sm:$0xff] }
  0xa6   :  { %v850_v49 = vrot.slane %v849_v43, 1  ;;  %v870_v57 = vmax.f32 %v868_v14, %v869_v3  ;;  %v888_v2 = vrot.slane %v887_v39, 4  ;;  %v883_v28 = vrot.slane %v882_v23, 2 }
  0xa7   :  { %v3783_v52 = vsel %vm1519_vm0, 0.0, %v1492_v4  ;;  %v3786_v27 = vsel %vm1519_vm0, %v1492_v4, 0.0  ;;  %v857_v5 = vrot.slane %v856_v38, 1  ;;  %v864_v6 = vrot.slane %v863_v46, 1 }
  0xa8   :  { %5787 = vst [vmem:[#allocation9_spill] sm:$0xff] %v3783_v52  ;;  %v1606_v50 = vrot.slane %v3783_v52, 1  ;;  %v1607_v55 = vrot.slane %v3786_v27, 1  ;;  %v851_v9 = vmax.f32 %v849_v43, %v850_v49  ;;  %v871_v10 = vrot.slane %v870_v57, 1 }
  0xa9   :  { %v858_v16 = vmax.f32 %v856_v38, %v857_v5  ;;  %v865_v17 = vmax.f32 %v863_v46, %v864_v6  ;;  %v877_v20 = vmax.f32 %v875_v42, %v876_v48  ;;  %v889_v31 = vmax.f32 %v887_v39, %v888_v2 }
  0xaa   :  { %v3803_v29 = vsel %vm1584_vm1, %v1606_v50, %v1607_v55  ;;  %v872_v30 = vmax.f32 %v870_v57, %v871_v10  ;;  %v894_v32 = vsel %vm340_vm2, %v207_v58, -inf  ;;  %v884_v34 = vmax.f32 %v882_v23, %v883_v28 }
  0xab   :  { %5788 = vst [vmem:[#allocation10_spill] sm:$0xff] %v3803_v29  ;;  %1644 = vrot.lane.b32.xlu1 %v3803_v29, %s3340_s26  ;;  %v878_v14 = vrot.slane %v877_v20, 1  ;;  %v895_v35 = vrot.slane %v894_v32, 4  ;;  %v1435_v41 = vsel %vm1365_vm3, %v858_v16, %v851_v9  ;;  %v890_v42 = vrot.slane %v889_v31, 2 }
  0xac   :  { %v1436_v44 = vsel %vm1367_vm4, %v865_v17, %v1435_v41  ;;  %v106_v45 = vmax.f32 %v64_v13, %v66_v26  ;;  %v3810_v43 = vmax.f32 %v65_v22, %v67_v47  ;;  %v885_v4 = vrot.slane %v884_v34, 1 }
  0xad   :  { %v879_v3 = vmax.f32 %v877_v20, %v878_v14  ;;  %v896_v38 = vmax.f32 %v894_v32, %v895_v35  ;;  %v1437_v39 = vsel %vm1369_vm5, %v872_v30, %v1436_v44  ;;  %v891_v58 = vmax.f32 %v889_v31, %v890_v42 }
  0xae   :  { %v214_v46 = vrot.slane %v106_v45, 2  ;;  %v215_v48 = vrot.slane %v106_v45, 4  ;;  %v216_v49 = vrot.slane %v106_v45, 6  ;;  %v886_v57 = vmax.f32 %v884_v34, %v885_v4 }
  0xaf   :  { %v897_v23 = vrot.slane %v896_v38, 2  ;;  %v1438_v2 = vsel %vm1371_vm6, %v879_v3, %v1437_v39  ;;  %v217_v5 = vrot.slane %v3810_v43, 2  ;;  %v892_v6 = vrot.slane %v891_v58, 1 }
  0xb0   :  { %v218_v50 = vrot.slane %v3810_v43, 4  ;;  %v219_v55 = vrot.slane %v3810_v43, 6  ;;  %v957_v9 = vsel %vm340_vm2, %v106_v45, -inf  ;;  %v1439_v13 = vsel %vm1373_vm7, %v886_v57, %v1438_v2 }
  0xb1   :  { %v898_v10 = vmax.f32 %v896_v38, %v897_v23  ;;  %v958_v16 = vrot.slane %v957_v9, 4  ;;  %v964_v17 = vsel %vm340_vm2, %v214_v46, -inf  ;;  %v893_v20 = vmax.f32 %v891_v58, %v892_v6 }
  0xb2   :  { %v965_v28 = vrot.slane %v964_v17, 4  ;;  %v971_v22 = vsel %vm340_vm2, %v215_v48, -inf  ;;  %v978_v26 = vsel %vm340_vm2, %v216_v49, -inf  ;;  %v985_v35 = vsel %vm340_vm2, %v3810_v43, -inf }
  0xb3   :  { %v899_v47 = vrot.slane %v898_v10, 1  ;;  %v959_v30 = vmax.f32 %v957_v9, %v958_v16  ;;  %v972_v31 = vrot.slane %v971_v22, 4  ;;  %v979_v32 = vrot.slane %v978_v26, 4 }
  0xb4   :  { %v1440_v14 = vsel %vm1375_vm8, %v893_v20, %v1439_v13  ;;  %v966_v34 = vmax.f32 %v964_v17, %v965_v28  ;;  %v992_v41 = vsel %vm340_vm2, %v217_v5, -inf  ;;  %v986_v38 = vrot.slane %v985_v35, 4 }
  0xb5   :  { %v900_v42 = vmax.f32 %v898_v10, %v899_v47  ;;  %v960_v44 = vrot.slane %v959_v30, 2  ;;  %v973_v45 = vmax.f32 %v971_v22, %v972_v31  ;;  %v980_v3 = vmax.f32 %v978_v26, %v979_v32 }
  0xb6   :  { %v967_v4 = vrot.slane %v966_v34, 2  ;;  %v993_v39 = vrot.slane %v992_v41, 4  ;;  %v999_v58 = vsel %vm340_vm2, %v218_v50, -inf  ;;  %v987_v6 = vmax.f32 %v985_v35, %v986_v38  ;;  %v61_v35 = vld [vmem:[%s5734_s0 + $0x148] sm:$0xff] }
  0xb7   :  { %v1441_v46 = vsel %vm1377_vm9, %v900_v42, %v1440_v14  ;;  %v961_v48 = vmax.f32 %v959_v30, %v960_v44  ;;  %v974_v49 = vrot.slane %v973_v45, 2  ;;  %v981_v57 = vrot.slane %v980_v3, 2  ;;  %v60_v30 = vld [vmem:[%s5734_s0 + $0x140] sm:$0xff]  ;;  %v63_v42 = vld [vmem:[%s5734_s0 + $0x158] sm:$0xff] }
  0xb8   :  { %v1495_v23 = vrot.slane %v1441_v46, 7  ;;  %v968_v2 = vmax.f32 %v966_v34, %v967_v4  ;;  %v994_v43 = vmax.f32 %v992_v41, %v993_v39  ;;  %v1000_v13 = vrot.slane %v999_v58, 4  ;;  %v62_v41 = vld [vmem:[%s5734_s0 + $0x150] sm:$0xff] }
  0xb9   :  { %v962_v9 = vrot.slane %v961_v48, 1  ;;  %v975_v5 = vmax.f32 %v973_v45, %v974_v49  ;;  %v982_v10 = vmax.f32 %v980_v3, %v981_v57  ;;  %v988_v20 = vrot.slane %v987_v6, 2 }
  0xba   :  { %v3829_v16 = vsel %vm1519_vm0, 0.0, %v1495_v23  ;;  %v3832_v17 = vsel %vm1519_vm0, %v1495_v23, 0.0  ;;  %v969_v50 = vrot.slane %v968_v2, 1  ;;  %v995_v34 = vrot.slane %v994_v43, 2 }
  0xbb   :  { %5789 = vst [vmem:[#allocation11_spill] sm:$0xff] %v3829_v16  ;;  %v1612_v28 = vrot.slane %v3829_v16, 1  ;;  %v1613_v22 = vrot.slane %v3832_v17, 1  ;;  %v963_v26 = vmax.f32 %v961_v48, %v962_v9  ;;  %v976_v47 = vrot.slane %v975_v5, 1 }
  0xbc   :  { %v970_v31 = vmax.f32 %v968_v2, %v969_v50  ;;  %v983_v32 = vrot.slane %v982_v10, 1  ;;  %v989_v14 = vmax.f32 %v987_v6, %v988_v20  ;;  %v1001_v3 = vmax.f32 %v999_v58, %v1000_v13 }
  0xbd   :  { %v3849_v44 = vsel %vm1584_vm1, %v1612_v28, %v1613_v22  ;;  %v977_v45 = vmax.f32 %v975_v5, %v976_v47  ;;  %v1006_v4 = vsel %vm340_vm2, %v219_v55, -inf  ;;  %v996_v46 = vmax.f32 %v994_v43, %v995_v34 }
  0xbe   :  { %5790 = vst [vmem:[#allocation12_spill] sm:$0xff] %v3849_v44  ;;  %1648 = vrot.lane.b32.xlu0 %v3849_v44, %s3340_s26  ;;  %v984_v38 = vmax.f32 %v982_v10, %v983_v32  ;;  %v990_v39 = vrot.slane %v989_v14, 1  ;;  %v1007_v48 = vrot.slane %v1006_v4, 4  ;;  %v1002_v49 = vrot.slane %v1001_v3, 2 }
  0xbf   :  { %v1449_v57 = vsel %vm1365_vm3, %v970_v31, %v963_v26  ;;  %v104_v23 = vmax.f32 %v60_v30, %v62_v41  ;;  %v3855_v2 = vmax.f32 %v61_v35, %v63_v42  ;;  %v997_v9 = vrot.slane %v996_v46, 1 }
  0xc0   :  { %v991_v6 = vmax.f32 %v989_v14, %v990_v39  ;;  %v1008_v50 = vmax.f32 %v1006_v4, %v1007_v48  ;;  %v1450_v58 = vsel %vm1367_vm4, %v977_v45, %v1449_v57  ;;  %v1003_v5 = vmax.f32 %v1001_v3, %v1002_v49 }
  0xc1   :  { %v1451_v55 = vsel %vm1369_vm5, %v984_v38, %v1450_v58  ;;  %v208_v13 = vrot.slane %v104_v23, 2  ;;  %v209_v20 = vrot.slane %v104_v23, 4  ;;  %v998_v10 = vmax.f32 %v996_v46, %v997_v9 }
  0xc2   :  { %v1009_v28 = vrot.slane %v1008_v50, 2  ;;  %v1452_v43 = vsel %vm1371_vm6, %v991_v6, %v1451_v55  ;;  %v210_v22 = vrot.slane %v104_v23, 6  ;;  %v1004_v47 = vrot.slane %v1003_v5, 1 }
  0xc3   :  { %v211_v26 = vrot.slane %v3855_v2, 2  ;;  %v212_v30 = vrot.slane %v3855_v2, 4  ;;  %v213_v31 = vrot.slane %v3855_v2, 6  ;;  %v1453_v14 = vsel %vm1373_vm7, %v998_v10, %v1452_v43 }
  0xc4   :  { %v1010_v32 = vmax.f32 %v1008_v50, %v1009_v28  ;;  %v901_v34 = vsel %vm340_vm2, %v104_v23, -inf  ;;  %v908_v35 = vsel %vm340_vm2, %v208_v13, -inf  ;;  %v1005_v41 = vmax.f32 %v1003_v5, %v1004_v47 }
  0xc5   :  { %v902_v42 = vrot.slane %v901_v34, 4  ;;  %v909_v45 = vrot.slane %v908_v35, 4  ;;  %v915_v3 = vsel %vm340_vm2, %v209_v20, -inf  ;;  %v922_v39 = vsel %vm340_vm2, %v210_v22, -inf }
  0xc6   :  { %v1011_v4 = vrot.slane %v1010_v32, 1  ;;  %v916_v38 = vrot.slane %v915_v3, 4  ;;  %v929_v46 = vsel %vm340_vm2, %v3855_v2, -inf  ;;  %v1454_v48 = vsel %vm1375_vm8, %v1005_v41, %v1453_v14 }
  0xc7   :  { %v903_v49 = vmax.f32 %v901_v34, %v902_v42  ;;  %v910_v57 = vmax.f32 %v908_v35, %v909_v45  ;;  %v923_v6 = vrot.slane %v922_v39, 4  ;;  %v930_v50 = vrot.slane %v929_v46, 4 }
  0xc8   :  { %v1012_v23 = vmax.f32 %v1010_v32, %v1011_v4  ;;  %v917_v9 = vmax.f32 %v915_v3, %v916_v38  ;;  %v936_v58 = vsel %vm340_vm2, %v211_v26, -inf  ;;  %v943_v2 = vsel %vm340_vm2, %v212_v30, -inf }
  0xc9   :  { %v904_v5 = vrot.slane %v903_v49, 2  ;;  %v911_v55 = vrot.slane %v910_v57, 2  ;;  %v924_v13 = vmax.f32 %v922_v39, %v923_v6  ;;  %v937_v20 = vrot.slane %v936_v58, 4 }
  0xca   :  { %v1455_v10 = vsel %vm1377_vm9, %v1012_v23, %v1454_v48  ;;  %v918_v28 = vrot.slane %v917_v9, 2  ;;  %v931_v43 = vmax.f32 %v929_v46, %v930_v50  ;;  %v944_v42 = vrot.slane %v943_v2, 4  ;;  %v68_v23 = vld [vmem:[%s5734_s0 + $0x180] sm:$0xff] }
  0xcb   :  { %v1497_v22 = vrot.slane %v1455_v10, 7  ;;  %v905_v47 = vmax.f32 %v903_v49, %v904_v5  ;;  %v912_v14 = vmax.f32 %v910_v57, %v911_v55  ;;  %v925_v34 = vrot.slane %v924_v13, 2  ;;  %v69_v55 = vld [vmem:[%s5734_s0 + $0x188] sm:$0xff] }
  0xcc   :  { %v919_v35 = vmax.f32 %v917_v9, %v918_v28  ;;  %v932_v32 = vrot.slane %v931_v43, 2  ;;  %v938_v41 = vmax.f32 %v936_v58, %v937_v20  ;;  %v945_v5 = vmax.f32 %v943_v2, %v944_v42  ;;  %v71_v20 = vld [vmem:[%s5734_s0 + $0x198] sm:$0xff] }
  0xcd   :  { %v3875_v26 = vsel %vm1519_vm0, 0.0, %v1497_v22  ;;  %v3878_v45 = vsel %vm1519_vm0, %v1497_v22, 0.0  ;;  %v906_v3 = vrot.slane %v905_v47, 1  ;;  %v913_v4 = vrot.slane %v912_v14, 1  ;;  %v76_v22 = vld [vmem:[%s5734_s0 + $0x1c0] sm:$0xff] }
  0xce   :  { %5791 = vst [vmem:[#allocation13_spill] sm:$0xff] %v3875_v26  ;;  %v1618_v38 = vrot.slane %v3875_v26, 1  ;;  %v1619_v30 = vrot.slane %v3878_v45, 1  ;;  %v920_v39 = vrot.slane %v919_v35, 1  ;;  %v926_v46 = vmax.f32 %v924_v13, %v925_v34  ;;  %v70_v13 = vld [vmem:[%s5734_s0 + $0x190] sm:$0xff] }
  0xcf   :  { %v907_v48 = vmax.f32 %v905_v47, %v906_v3  ;;  %v914_v49 = vmax.f32 %v912_v14, %v913_v4  ;;  %v933_v57 = vmax.f32 %v931_v43, %v932_v32  ;;  %v939_v6 = vrot.slane %v938_v41, 2  ;;  %v78_v47 = vld [vmem:[%s5734_s0 + $0x1d0] sm:$0xff] }
  0xd0   :  { %v3886_v9 = vsel %vm1584_vm1, %v1618_v38, %v1619_v30  ;;  %v921_v50 = vmax.f32 %v919_v35, %v920_v39  ;;  %v927_v58 = vrot.slane %v926_v46, 1  ;;  %v950_v43 = vsel %vm340_vm2, %v213_v31, -inf }
  0xd1   :  { %5792 = vst [vmem:[#allocation14_spill] sm:$0xff] %v3886_v9  ;;  %1652 = vrot.lane.b32.xlu2 %v3886_v9, %s3340_s26  ;;  %v934_v10 = vrot.slane %v933_v57, 1  ;;  %v940_v28 = vmax.f32 %v938_v41, %v939_v6  ;;  %v1442_v2 = vsel %vm1365_vm3, %v914_v49, %v907_v48  ;;  %v946_v34 = vrot.slane %v945_v5, 2 }
  0xd2   :  { %v928_v14 = vmax.f32 %v926_v46, %v927_v58  ;;  %v951_v35 = vrot.slane %v950_v43, 4  ;;  %v1443_v32 = vsel %vm1367_vm4, %v921_v50, %v1442_v2  ;;  %v108_v41 = vmax.f32 %v68_v23, %v70_v13 }
  0xd3   :  { %v935_v42 = vmax.f32 %v933_v57, %v934_v10  ;;  %v941_v3 = vrot.slane %v940_v28, 1  ;;  %v3908_v4 = vmax.f32 %v69_v55, %v71_v20  ;;  %v947_v31 = vmax.f32 %v945_v5, %v946_v34 }
  0xd4   :  { %v952_v38 = vmax.f32 %v950_v43, %v951_v35  ;;  %v1444_v30 = vsel %vm1369_vm5, %v928_v14, %v1443_v32  ;;  %v3911_v39 = vmax.f32 %v76_v22, %v78_v47  ;;  %v220_v6 = vrot.slane %v108_v41, 2 }
  0xd5   :  { %v942_v48 = vmax.f32 %v940_v28, %v941_v3  ;;  %v1445_v49 = vsel %vm1371_vm6, %v935_v42, %v1444_v30  ;;  %v221_v46 = vrot.slane %v108_v41, 4  ;;  %v948_v58 = vrot.slane %v947_v31, 1 }
  0xd6   :  { %v953_v12 = vrot.slane %v952_v38, 2  ;;  %v222_v44 = vrot.slane %v108_v41, 6  ;;  %v223_v57 = vrot.slane %v3908_v4, 2  ;;  %v224_v50 = vrot.slane %v3908_v4, 4 }
  0xd7   :  { %v1446_v23 = vsel %vm1373_vm7, %v942_v48, %v1445_v49  ;;  %v225_v5 = vrot.slane %v3908_v4, 6  ;;  %v1013_v55 = vsel %vm340_vm2, %v108_v41, -inf  ;;  %v949_v13 = vmax.f32 %v947_v31, %v948_v58 }
  0xd8   :  { %v954_v20 = vmax.f32 %v952_v38, %v953_v12  ;;  %v1014_v10 = vrot.slane %v1013_v55, 4  ;;  %v1020_v28 = vsel %vm340_vm2, %v220_v6, -inf  ;;  %v1027_v2 = vsel %vm340_vm2, %v221_v46, -inf }
  0xd9   :  { %v1021_v43 = vrot.slane %v1020_v28, 4  ;;  %v1034_v22 = vsel %vm340_vm2, %v222_v44, -inf  ;;  %v1041_v47 = vsel %vm340_vm2, %v3908_v4, -inf  ;;  %v1447_v34 = vsel %vm1375_vm8, %v949_v13, %v1446_v23 }
  0xda   :  { %v955_v14 = vrot.slane %v954_v20, 1  ;;  %v1015_v35 = vmax.f32 %v1013_v55, %v1014_v10  ;;  %v1028_v32 = vrot.slane %v1027_v2, 4  ;;  %v1035_v3 = vrot.slane %v1034_v22, 4 }
  0xdb   :  { %v1022_v42 = vmax.f32 %v1020_v28, %v1021_v43  ;;  %v1042_v41 = vrot.slane %v1041_v47, 4  ;;  %v1048_v12 = vsel %vm340_vm2, %v223_v57, -inf  ;;  %v1055_v46 = vsel %vm340_vm2, %v224_v50, -inf }
  0xdc   :  { %v956_v31 = vmax.f32 %v954_v20, %v955_v14  ;;  %v1016_v38 = vrot.slane %v1015_v35, 2  ;;  %v1029_v30 = vmax.f32 %v1027_v2, %v1028_v32  ;;  %v1049_v48 = vrot.slane %v1048_v12, 4 }
  0xdd   :  { %v1023_v49 = vrot.slane %v1022_v42, 2  ;;  %v1036_v6 = vmax.f32 %v1034_v22, %v1035_v3  ;;  %v1043_v44 = vmax.f32 %v1041_v47, %v1042_v41  ;;  %v1056_v14 = vrot.slane %v1055_v46, 4 }
  0xde   :  { %v1448_v4 = vsel %vm1377_vm9, %v956_v31, %v1447_v34  ;;  %v1017_v58 = vmax.f32 %v1015_v35, %v1016_v38  ;;  %v1030_v23 = vrot.slane %v1029_v30, 2  ;;  %v1050_v55 = vmax.f32 %v1048_v12, %v1049_v48  ;;  %v77_v38 = vld [vmem:[%s5734_s0 + $0x1c8] sm:$0xff] }
  0xdf   :  { %v1496_v13 = vrot.slane %v1448_v4, 7  ;;  %v1024_v10 = vmax.f32 %v1022_v42, %v1023_v49  ;;  %v1037_v28 = vrot.slane %v1036_v6, 2  ;;  %v1044_v43 = vrot.slane %v1043_v44, 2 }
  0xe0   :  { %v1018_v29 = vrot.slane %v1017_v58, 1  ;;  %v1031_v57 = vmax.f32 %v1029_v30, %v1030_v23  ;;  %v1051_v20 = vrot.slane %v1050_v55, 2  ;;  %v79_v30 = vld [vmem:[%s5734_s0 + $0x1d8] sm:$0xff]  ;;  %vm1675_vm10 = vcmask 1045504  }
  0xe1   :  { %v3929_v2 = vsel %vm1519_vm0, 0.0, %v1496_v13  ;;  %v3932_v22 = vsel %vm1519_vm0, %v1496_v13, 0.0  ;;  %v1025_v50 = vrot.slane %v1024_v10, 1  ;;  %v1038_v47 = vmax.f32 %v1036_v6, %v1037_v28 }
  0xe2   :  { %5793 = vst [vmem:[#allocation15_spill] sm:$0xff] %v3929_v2  ;;  %v1615_v34 = vrot.slane %v3929_v2, 1  ;;  %v1616_v35 = vrot.slane %v3932_v22, 1  ;;  %v1019_v32 = vmax.f32 %v1017_v58, %v1018_v29  ;;  %v1032_v42 = vrot.slane %v1031_v57, 1 }
  0xe3   :  { %v1026_v3 = vmax.f32 %v1024_v10, %v1025_v50  ;;  %v1039_v41 = vrot.slane %v1038_v47, 1  ;;  %v1045_v12 = vmax.f32 %v1043_v44, %v1044_v43  ;;  %v1052_v31 = vmax.f32 %v1050_v55, %v1051_v20 }
  0xe4   :  { %v3943_v48 = vsel %vm1584_vm1, %v1615_v34, %v1616_v35  ;;  %v1033_v49 = vmax.f32 %v1031_v57, %v1032_v42  ;;  %v1057_v6 = vmax.f32 %v1055_v46, %v1056_v14  ;;  %v1062_v29 = vsel %vm340_vm2, %v225_v5, -inf }
  0xe5   :  { %5794 = vst [vmem:[#allocation16_spill] sm:$0xff] %v3943_v48  ;;  %1650 = vrot.lane.b32.xlu1 %v3943_v48, %s3340_s26  ;;  %v1040_v44 = vmax.f32 %v1038_v47, %v1039_v41  ;;  %v1046_v4 = vrot.slane %v1045_v12, 1  ;;  %v1053_v58 = vrot.slane %v1052_v31, 1  ;;  %v1063_v23 = vrot.slane %v1062_v29, 4 }
  0xe6   :  { %v1058_v55 = vrot.slane %v1057_v6, 2  ;;  %v1456_v13 = vsel %vm1365_vm3, %v1026_v3, %v1019_v32  ;;  %v3949_v10 = vmax.f32 %v77_v38, %v79_v30  ;;  %v232_v28 = vrot.slane %v3911_v39, 2 }
  0xe7   :  { %v1047_v43 = vmax.f32 %v1045_v12, %v1046_v4  ;;  %v1054_v20 = vmax.f32 %v1052_v31, %v1053_v58  ;;  %v1064_v57 = vmax.f32 %v1062_v29, %v1063_v23  ;;  %v1457_v46 = vsel %vm1367_vm4, %v1033_v49, %v1456_v13 }
  0xe8   :  { %v1059_v5 = vmax.f32 %v1057_v6, %v1058_v55  ;;  %v1458_v14 = vsel %vm1369_vm5, %v1040_v44, %v1457_v46  ;;  %v233_v50 = vrot.slane %v3911_v39, 4  ;;  %v234_v47 = vrot.slane %v3911_v39, 6 }
  0xe9   :  { %v1065_v34 = vrot.slane %v1064_v57, 2  ;;  %v1459_v35 = vsel %vm1371_vm6, %v1047_v43, %v1458_v14  ;;  %v235_v32 = vrot.slane %v3949_v10, 2  ;;  %v236_v42 = vrot.slane %v3949_v10, 4 }
  0xea   :  { %v1060_v3 = vrot.slane %v1059_v5, 1  ;;  %v1460_v41 = vsel %vm1373_vm7, %v1054_v20, %v1459_v35  ;;  %v237_v12 = vrot.slane %v3949_v10, 6  ;;  %v1125_v31 = vsel %vm340_vm2, %v3911_v39, -inf }
  0xeb   :  { %v1066_v38 = vmax.f32 %v1064_v57, %v1065_v34  ;;  %v1126_v30 = vrot.slane %v1125_v31, 4  ;;  %v1132_v49 = vsel %vm340_vm2, %v232_v28, -inf  ;;  %v1139_v6 = vsel %vm340_vm2, %v233_v50, -inf }
  0xec   :  { %v1061_v29 = vmax.f32 %v1059_v5, %v1060_v3  ;;  %v1133_v44 = vrot.slane %v1132_v49, 4  ;;  %v1140_v4 = vrot.slane %v1139_v6, 4  ;;  %v1146_v58 = vsel %vm340_vm2, %v234_v47, -inf }
  0xed   :  { %v1067_v23 = vrot.slane %v1066_v38, 1  ;;  %v1127_v55 = vmax.f32 %v1125_v31, %v1126_v30  ;;  %v1147_v13 = vrot.slane %v1146_v58, 4  ;;  %v1153_v43 = vsel %vm340_vm2, %v3949_v10, -inf }
  0xee   :  { %v1461_v20 = vsel %vm1375_vm8, %v1061_v29, %v1460_v41  ;;  %v1134_v39 = vmax.f32 %v1132_v49, %v1133_v44  ;;  %v1141_v57 = vmax.f32 %v1139_v6, %v1140_v4  ;;  %v1154_v46 = vrot.slane %v1153_v43, 4 }
  0xef   :  { %v1068_v14 = vmax.f32 %v1066_v38, %v1067_v23  ;;  %v1128_v28 = vrot.slane %v1127_v55, 2  ;;  %v1148_v34 = vmax.f32 %v1146_v58, %v1147_v13  ;;  %v1160_v5 = vsel %vm340_vm2, %v235_v32, -inf }
  0xf0   :  { %v1135_v50 = vrot.slane %v1134_v39, 2  ;;  %v1142_v35 = vrot.slane %v1141_v57, 2  ;;  %v1155_v3 = vmax.f32 %v1153_v43, %v1154_v46  ;;  %v1161_v47 = vrot.slane %v1160_v5, 4 }
  0xf1   :  { %v1462_v31 = vsel %vm1377_vm9, %v1068_v14, %v1461_v20  ;;  %v1129_v30 = vmax.f32 %v1127_v55, %v1128_v28  ;;  %v1149_v9 = vrot.slane %v1148_v34, 2  ;;  %v1167_v10 = vsel %vm340_vm2, %v236_v42, -inf  ;;  %v74_v28 = vld [vmem:[%s5734_s0 + $0x1b0] sm:$0xff] }
  0xf2   :  { %v1498_v1 = vrot.slane %v1462_v31, 7  ;;  %v1136_v41 = vmax.f32 %v1134_v39, %v1135_v50  ;;  %v1143_v49 = vmax.f32 %v1141_v57, %v1142_v35  ;;  %v1156_v6 = vrot.slane %v1155_v3, 2 }
  0xf3   :  { %v1130_v29 = vrot.slane %v1129_v30, 1  ;;  %v1150_v38 = vmax.f32 %v1148_v34, %v1149_v9  ;;  %v1162_v44 = vmax.f32 %v1160_v5, %v1161_v47  ;;  %v1168_v4 = vrot.slane %v1167_v10, 4  ;;  %v72_v9 = vld [vmem:[%s5734_s0 + $0x1a0] sm:$0xff]  ;;  %v75_v34 = vld [vmem:[%s5734_s0 + $0x1b8] sm:$0xff] }
  0xf4   :  { %v3973_v32 = vsel %vm1519_vm0, 0.0, %v1498_v1  ;;  %v3976_v58 = vsel %vm1519_vm0, %v1498_v1, 0.0  ;;  %v1137_v23 = vrot.slane %v1136_v41, 1  ;;  %v1144_v13 = vrot.slane %v1143_v49, 1  ;;  %v73_v1 = vld [vmem:[%s5734_s0 + $0x1a8] sm:$0xff] }
  0xf5   :  { %5795 = vst [vmem:[#allocation17_spill] sm:$0xff] %v3973_v32  ;;  %v1621_v55 = vrot.slane %v3973_v32, 1  ;;  %v1622_v42 = vrot.slane %v3976_v58, 1  ;;  %v1131_v43 = vmax.f32 %v1129_v30, %v1130_v29  ;;  %v1151_v20 = vrot.slane %v1150_v38, 1 }
  0xf6   :  { %v1138_v39 = vmax.f32 %v1136_v41, %v1137_v23  ;;  %v1145_v57 = vmax.f32 %v1143_v49, %v1144_v13  ;;  %v1157_v46 = vmax.f32 %v1155_v3, %v1156_v6  ;;  %v1163_v14 = vrot.slane %v1162_v44, 2 }
  0xf7   :  { %v3993_v5 = vsel %vm1584_vm1, %v1621_v55, %v1622_v42  ;;  %v1152_v50 = vmax.f32 %v1150_v38, %v1151_v20  ;;  %v1169_v35 = vmax.f32 %v1167_v10, %v1168_v4  ;;  %v1174_v3 = vsel %vm340_vm2, %v237_v12, -inf }
  0xf8   :  { %5796 = vst [vmem:[#allocation18_spill] sm:$0xff] %v3993_v5  ;;  %1654 = vrot.lane.b32.xlu0 %v3993_v5, %s3340_s26  ;;  %v1158_v47 = vrot.slane %v1157_v46, 1  ;;  %v1164_v31 = vmax.f32 %v1162_v44, %v1163_v14  ;;  %v1175_v30 = vrot.slane %v1174_v3, 4  ;;  %v1470_v41 = vsel %vm1365_vm3, %v1138_v39, %v1131_v43 }
  0xf9   :  { %v1170_v49 = vrot.slane %v1169_v35, 2  ;;  %v1471_v6 = vsel %vm1367_vm4, %v1145_v57, %v1470_v41  ;;  %v110_v29 = vmax.f32 %v72_v9, %v74_v28  ;;  %v4000_v23 = vmax.f32 %v73_v1, %v75_v34 }
  0xfa   :  { %v1159_v13 = vmax.f32 %v1157_v46, %v1158_v47  ;;  %v1165_v55 = vrot.slane %v1164_v31, 1  ;;  %v1176_v38 = vmax.f32 %v1174_v3, %v1175_v30  ;;  %v1472_v10 = vsel %vm1369_vm5, %v1152_v50, %v1471_v6 }
  0xfb   :  { %v1171_v12 = vmax.f32 %v1169_v35, %v1170_v49  ;;  %v226_v4 = vrot.slane %v110_v29, 2  ;;  %v227_v42 = vrot.slane %v110_v29, 4  ;;  %v228_v20 = vrot.slane %v110_v29, 6 }
  0xfc   :  { %v1166_v5 = vmax.f32 %v1164_v31, %v1165_v55  ;;  %v1177_v44 = vrot.slane %v1176_v38, 2  ;;  %v1473_v14 = vsel %vm1371_vm6, %v1159_v13, %v1472_v10  ;;  %v229_v43 = vrot.slane %v4000_v23, 2 }
  0xfd   :  { %v1172_v39 = vrot.slane %v1171_v12, 1  ;;  %v230_v9 = vrot.slane %v4000_v23, 4  ;;  %v231_v57 = vrot.slane %v4000_v23, 6  ;;  %v1069_v46 = vsel %vm340_vm2, %v110_v29, -inf }
  0xfe   :  { %v1178_v1 = vmax.f32 %v1176_v38, %v1177_v44  ;;  %v1474_v28 = vsel %vm1373_vm7, %v1166_v5, %v1473_v14  ;;  %v1070_v34 = vrot.slane %v1069_v46, 4  ;;  %v1076_v50 = vsel %vm340_vm2, %v226_v4, -inf }
  0xff   :  { %v1173_v35 = vmax.f32 %v1171_v12, %v1172_v39  ;;  %v1077_v3 = vrot.slane %v1076_v50, 4  ;;  %v1083_v47 = vsel %vm340_vm2, %v227_v42, -inf  ;;  %v1090_v31 = vsel %vm340_vm2, %v228_v20, -inf }
 0x100   :  { %v1179_v30 = vrot.slane %v1178_v1, 1  ;;  %v1071_v41 = vmax.f32 %v1069_v46, %v1070_v34  ;;  %v1084_v49 = vrot.slane %v1083_v47, 4  ;;  %v1091_v6 = vrot.slane %v1090_v31, 4 }
 0x101   :  { %v1475_v13 = vsel %vm1375_vm8, %v1173_v35, %v1474_v28  ;;  %v1078_v55 = vmax.f32 %v1076_v50, %v1077_v3  ;;  %v1097_v29 = vsel %vm340_vm2, %v4000_v23, -inf  ;;  %v1104_v5 = vsel %vm340_vm2, %v229_v43, -inf }
 0x102   :  { %v1180_v38 = vmax.f32 %v1178_v1, %v1179_v30  ;;  %v1072_v10 = vrot.slane %v1071_v41, 2  ;;  %v1085_v12 = vmax.f32 %v1083_v47, %v1084_v49  ;;  %v1092_v4 = vmax.f32 %v1090_v31, %v1091_v6 }
 0x103   :  { %v1079_v44 = vrot.slane %v1078_v55, 2  ;;  %v1098_v42 = vrot.slane %v1097_v29, 4  ;;  %v1105_v14 = vrot.slane %v1104_v5, 4  ;;  %v1111_v20 = vsel %vm340_vm2, %v230_v9, -inf }
 0x104   :  { %v1476_v39 = vsel %vm1377_vm9, %v1180_v38, %v1475_v13  ;;  %v1073_v46 = vmax.f32 %v1071_v41, %v1072_v10  ;;  %v1086_v34 = vrot.slane %v1085_v12, 2  ;;  %v1093_v28 = vrot.slane %v1092_v4, 2 }
 0x105   :  { %v1500_v50 = vrot.slane %v1476_v39, 7  ;;  %v1080_v35 = vmax.f32 %v1078_v55, %v1079_v44  ;;  %v1099_v3 = vmax.f32 %v1097_v29, %v1098_v42  ;;  %v1106_v23 = vmax.f32 %v1104_v5, %v1105_v14 }
 0x106   :  { %v1074_v48 = vrot.slane %v1073_v46, 1  ;;  %v1087_v43 = vmax.f32 %v1085_v12, %v1086_v34  ;;  %v1094_v1 = vmax.f32 %v1092_v4, %v1093_v28  ;;  %v1112_v30 = vrot.slane %v1111_v20, 4 }
 0x107   :  { %v4019_v47 = vsel %vm1519_vm0, 0.0, %v1500_v50  ;;  %v4022_v31 = vsel %vm1519_vm0, %v1500_v50, 0.0  ;;  %v1081_v9 = vrot.slane %v1080_v35, 1  ;;  %v1100_v49 = vrot.slane %v1099_v3, 2 }
 0x108   :  { %5797 = vst [vmem:[#allocation19_spill] sm:$0xff] %v4019_v47  ;;  %v1627_v41 = vrot.slane %v4019_v47, 1  ;;  %v1628_v6 = vrot.slane %v4022_v31, 1  ;;  %v1075_v13 = vmax.f32 %v1073_v46, %v1074_v48  ;;  %v1088_v55 = vrot.slane %v1087_v43, 1 }
 0x109   :  { %v1082_v29 = vmax.f32 %v1080_v35, %v1081_v9  ;;  %v1095_v5 = vrot.slane %v1094_v1, 1  ;;  %v1101_v38 = vmax.f32 %v1099_v3, %v1100_v49  ;;  %v1107_v10 = vrot.slane %v1106_v23, 2 }
 0x10a   :  { %v4027_v12 = vsel %vm1584_vm1, %v1627_v41, %v1628_v6  ;;  %v1089_v4 = vmax.f32 %v1087_v43, %v1088_v55  ;;  %v1113_v44 = vmax.f32 %v1111_v20, %v1112_v30  ;;  %v1118_v42 = vsel %vm340_vm2, %v231_v57, -inf }
 0x10b   :  { %1658 = vrot.lane.b32.xlu2 %v4027_v12, %s3340_s26  ;;  %v1096_v14 = vmax.f32 %v1094_v1, %v1095_v5  ;;  %v1102_v39 = vrot.slane %v1101_v38, 1  ;;  %v1108_v34 = vmax.f32 %v1106_v23, %v1107_v10  ;;  %v1119_v28 = vrot.slane %v1118_v42, 4 }
 0x10c   :  { %v1114_v48 = vrot.slane %v1113_v44, 2  ;;  %v1463_v46 = vsel %vm1365_vm3, %v1082_v29, %v1075_v13  ;;  %v1676_v50 = vrot.slane %v3395_v7, 2  ;;  %v5798_v30 = vrot.slane %v3398_v8, 2 }
 0x10d   :  { %v1103_v35 = vmax.f32 %v1101_v38, %v1102_v39  ;;  %v1109_v3 = vrot.slane %v1108_v34, 1  ;;  %v1120_v9 = vmax.f32 %v1118_v42, %v1119_v28  ;;  %v1464_v20 = vsel %vm1367_vm4, %v1089_v4, %v1463_v46 }
 0x10e   :  { %v1115_v43 = vmax.f32 %v1113_v44, %v1114_v48  ;;  %v1465_v57 = vsel %vm1369_vm5, %v1096_v14, %v1464_v20  ;;  %v4039_v1 = vsel %vm1675_vm10, %v1676_v50, %v5798_v30  ;;  %v1682_v23 = vrot.slane %v3495_v24, 2 }
 0x10f   :  { %5799 = vst [vmem:[#allocation20_spill] sm:$0xff] %v4039_v1  ;;  %v1110_v49 = vmax.f32 %v1108_v34, %v1109_v3  ;;  %v1121_v41 = vrot.slane %v1120_v9, 2  ;;  %v1466_v6 = vsel %vm1371_vm6, %v1103_v35, %v1465_v57  ;;  %v3332_v13 = vpack.i.bf16 %v3404_v18, %v4039_v1 }
 0x110   :  { %v1116_v55 = vrot.slane %v1115_v43, 1  ;;  %v1683_v29 = vrot.slane %v3498_v25, 2  ;;  %v1685_v4 = vrot.slane %v3639_v51, 2  ;;  %v1686_v44 = vrot.slane %v3642_v11, 2 }
 0x111   :  { %v1122_v5 = vmax.f32 %v1120_v9, %v1121_v41  ;;  %v1467_v38 = vsel %vm1373_vm7, %v1110_v49, %v1466_v6  ;;  %3333 = vrot.lane.b32.xlu0 %v3332_v13, %s3341_s10  ;;  %v1691_v14 = vrot.slane %v3595_v36, 2  ;;  %v1692_v39 = vrot.slane %v3598_v37, 2 }
 0x112   :  { %v1117_v8 = vmax.f32 %v1115_v43, %v1116_v55  ;;  %v4049_v10 = vsel %vm1675_vm10, %v1682_v23, %v1683_v29  ;;  %v4059_v28 = vsel %vm1675_vm10, %v1685_v4, %v1686_v44  ;;  %v1694_v37 = vrot.slane %v3685_v59, 2 }
 0x113   :  { %v1123_v42 = vrot.slane %v1122_v5, 1  ;;  %1725 = vrot.lane.b32.xlu2 %v4049_v10, %s3341_s10  ;;  %v4063_v50 = vsel %vm1675_vm10, %v1691_v14, %v1692_v39  ;;  %v1695_v3 = vrot.slane %v3688_v60, 2  ;;  %v1700_v43 = vrot.slane %v3739_v61, 2  ;;  %v49_v14 = vld [vmem:[%s5734_s0 + $0xe8] sm:$0xff]  ;;  %v51_v39 = vld [vmem:[%s5734_s0 + $0xf8] sm:$0xff] }
 0x114   :  { %v1468_v25 = vsel %vm1375_vm8, %v1117_v8, %v1467_v38  ;;  %v1701_v57 = vrot.slane %v3742_v62, 2  ;;  %v1679_v60 = vrot.slane %v3541_v63, 2  ;;  %v1680_v49 = vrot.slane %v3544_v0, 2  ;;  %v48_v0 = vld [vmem:[%s5734_s0 + $0xe0] sm:$0xff]  ;;  %v50_v38 = vld [vmem:[%s5734_s0 + $0xf0] sm:$0xff] }
 0x115   :  { %v1124_v34 = vmax.f32 %v1122_v5, %v1123_v42  ;;  %v4087_v23 = vsel %vm1675_vm10, %v1694_v37, %v1695_v3  ;;  %v1688_v6 = vrot.slane %v3458_v53, 2  ;;  %v1689_v62 = vrot.slane %v3461_v54, 2 }
 0x116   :  { %5801 = vst [vmem:[#allocation22_spill] sm:$0xff] %v4087_v23  ;;  %v4092_v41 = vsel %vm1675_vm10, %v1700_v43, %v1701_v57  ;;  %v1703_v13 = vrot.slane %v3829_v16, 2  ;;  %v1704_v55 = vrot.slane %v3832_v17, 2  ;;  %v1709_v29 = vrot.slane %v3875_v26, 2 }
 0x117   :  { %v1469_v48 = vsel %vm1377_vm9, %v1124_v34, %v1468_v25  ;;  %5802 = vst [vmem:[#allocation23_spill] sm:$0xff] %v4092_v41  ;;  %v1710_v5 = vrot.slane %v3878_v45, 2  ;;  %v4109_v54 = vsel %vm1675_vm10, %v1679_v60, %v1680_v49  ;;  %v98_v8 = vmax.f32 %v48_v0, %v50_v38 }
 0x118   :  { %v1499_v46 = vrot.slane %v1469_v48, 7  ;;  %v4114_v17 = vsel %vm1675_vm10, %v1688_v6, %v1689_v62  ;;  %v4117_v45 = vsel %vm1675_vm10, %v1703_v13, %v1704_v55  ;;  %v1712_v42 = vrot.slane %v3973_v32, 2 }
 0x119   :  { %1727 = vrot.lane.b32.xlu0 %v4059_v28, %s3341_s10  ;;  %v190_v4 = vrot.slane %v98_v8, 2  ;;  %v4122_v44 = vsel %vm1675_vm10, %v1709_v29, %v1710_v5  ;;  %v1713_v25 = vrot.slane %v3976_v58, 2  ;;  %v191_v34 = vrot.slane %v98_v8, 4 }
 0x11a   :  { %v4068_v11 = vsel %vm1519_vm0, 0.0, %v1499_v46  ;;  %v4071_v35 = vsel %vm1519_vm0, %v1499_v46, 0.0  ;;  %5803 = vst [vmem:[#allocation24_spill] sm:$0xff] %v4122_v44  ;;  %v99_v48 = vmax.f32 %v49_v14, %v51_v39  ;;  %v192_v46 = vrot.slane %v98_v8, 6 }
 0x11b   :  { %5800 = vst [vmem:[#allocation21_spill] sm:$0xff] %v4068_v11  ;;  %v1624_v9 = vrot.slane %v4068_v11, 1  ;;  %v1625_v20 = vrot.slane %v4071_v35, 1  ;;  %1731 = vrot.lane.b32.xlu2 %v4063_v50, %s3341_s10  ;;  %v733_v37 = vsel %vm340_vm2, %v98_v8, -inf  ;;  %v740_v3 = vsel %vm340_vm2, %v190_v4, -inf }
 0x11c   :  { %v741_v43 = vrot.slane %v740_v3, 4  ;;  %v747_v58 = vsel %vm340_vm2, %v191_v34, -inf  ;;  %v1719_v57 = vrot.slane %v4022_v31, 2  ;;  %v193_v60 = vrot.slane %v99_v48, 2 }
 0x11d   :  { %v4082_v30 = vsel %vm1584_vm1, %v1624_v9, %v1625_v20  ;;  %v1718_v9 = vrot.slane %v4019_v47, 2  ;;  %v734_v20 = vrot.slane %v733_v37, 4  ;;  %v748_v49 = vrot.slane %v747_v58, 4 }
 0x11e   :  { %1656 = vrot.lane.b32.xlu1 %v4082_v30, %s3340_s26  ;;  %v754_v6 = vsel %vm340_vm2, %v192_v46, -inf  ;;  %v194_v62 = vrot.slane %v99_v48, 4  ;;  %v742_v55 = vmax.f32 %v740_v3, %v741_v43  ;;  %v195_v5 = vrot.slane %v99_v48, 6 }
 0x11f   :  { %v735_v13 = vmax.f32 %v733_v37, %v734_v20  ;;  %v755_v29 = vrot.slane %v754_v6, 4  ;;  %v749_v0 = vmax.f32 %v747_v58, %v748_v49  ;;  %v761_v38 = vsel %vm340_vm2, %v99_v48, -inf }
 0x120   :  { %v768_v8 = vsel %vm340_vm2, %v193_v60, -inf  ;;  %v743_v14 = vrot.slane %v742_v55, 2  ;;  %v762_v39 = vrot.slane %v761_v38, 4  ;;  %v1697_v34 = vrot.slane %v3783_v52, 2 }
 0x121   :  { %1733 = vrot.lane.b32.xlu0 %v4087_v23, %s3341_s10  ;;  %v736_v4 = vrot.slane %v735_v13, 2  ;;  %v756_v31 = vmax.f32 %v754_v6, %v755_v29  ;;  %v1698_v46 = vrot.slane %v3786_v27, 2  ;;  %v750_v37 = vrot.slane %v749_v0, 2 }
 0x122   :  { %v769_v3 = vrot.slane %v768_v8, 4  ;;  %v4149_v20 = vsel %vm1675_vm10, %v1712_v42, %v1713_v25  ;;  %v775_v48 = vsel %vm340_vm2, %v194_v62, -inf  ;;  %v782_v58 = vsel %vm340_vm2, %v195_v5, -inf }
 0x123   :  { %1737 = vrot.lane.b32.xlu2 %v4092_v41, %s3341_s10  ;;  %v757_v43 = vrot.slane %v756_v31, 2  ;;  %v737_v60 = vmax.f32 %v735_v13, %v736_v4  ;;  %v744_v49 = vmax.f32 %v742_v55, %v743_v14  ;;  %v763_v6 = vmax.f32 %v761_v38, %v762_v39 }
 0x124   :  { %v4154_v29 = vsel %vm1675_vm10, %v1718_v9, %v1719_v57  ;;  %v751_v27 = vmax.f32 %v749_v0, %v750_v37  ;;  %v4157_v1 = vsel %vm1675_vm10, %v1697_v34, %v1698_v46  ;;  %v770_v42 = vmax.f32 %v768_v8, %v769_v3  ;;  %v80_v9 = vld [vmem:[%s5734_s0 + $0x1e0] sm:$0xff]  ;;  %v82_v57 = vld [vmem:[%s5734_s0 + $0x1f0] sm:$0xff]  ;;  %v83_v3 = vld [vmem:[%s5734_s0 + $0x1f8] sm:$0xff] }
 0x125   :  { %5804 = vst [vmem:[#allocation25_spill] sm:$0xff] %v4154_v29  ;;  %v776_v25 = vrot.slane %v775_v48, 4  ;;  %v783_v18 = vrot.slane %v782_v58, 4  ;;  %v1706_v62 = vrot.slane %v3929_v2, 2  ;;  %v1707_v5 = vrot.slane %v3932_v22, 2 }
 0x126   :  { %1723 = vrot.lane.b32.xlu1 %v4109_v54, %s3341_s10  ;;  %v1715_v13 = vrot.slane %v4068_v11, 2  ;;  %v758_v55 = vmax.f32 %v756_v31, %v757_v43  ;;  %v1716_v0 = vrot.slane %v4071_v35, 2  ;;  %v738_v38 = vrot.slane %v737_v60, 1  ;;  %v81_v35 = vld [vmem:[%s5734_s0 + $0x1e8] sm:$0xff]  ;;  %s3343_s0 = smov 16  }
 0x127   :  { %v745_v8 = vrot.slane %v744_v49, 1  ;;  %v764_v4 = vrot.slane %v763_v6, 2  ;;  %v752_v22 = vrot.slane %v751_v27, 1  ;;  %v114_v14 = vmax.f32 %v80_v9, %v82_v57 }
 0x128   :  { %v771_v39 = vrot.slane %v770_v42, 2  ;;  %v777_v31 = vmax.f32 %v775_v48, %v776_v25  ;;  %v4173_v34 = vmax.f32 %v782_v58, %v783_v18  ;;  %v4178_v46 = vsel %vm1675_vm10, %v1706_v62, %v1707_v5 }
 0x129   :  { %1739 = vrot.lane.b32.xlu0 %v4117_v45, %s3341_s10  ;;  %v759_v37 = vrot.slane %v758_v55, 1  ;;  %v238_v43 = vrot.slane %v114_v14, 2  ;;  %v4187_v48 = vsel %vm1675_vm10, %v1715_v13, %v1716_v0  ;;  %v739_v18 = vmax.f32 %v737_v60, %v738_v38 }
 0x12a   :  { %v746_v58 = vmax.f32 %v744_v49, %v745_v8  ;;  %v4189_v25 = vmax.f32 %v763_v6, %v764_v4  ;;  %v753_v9 = vmax.f32 %v751_v27, %v752_v22  ;;  %v115_v62 = vmax.f32 %v81_v35, %v83_v3 }
 0x12b   :  { %1743 = vrot.lane.b32.xlu2 %v4122_v44, %s3341_s10  ;;  %v239_v5 = vrot.slane %v114_v14, 4  ;;  %v240_v57 = vrot.slane %v114_v14, 6  ;;  %v4193_v7 = vmax.f32 %v770_v42, %v771_v39  ;;  %v1181_v13 = vsel %vm340_vm2, %v114_v14, -inf  ;;  %v4206_v14 = vpop.permute.xlu2 %1638 }
 0x12c   :  { %v4197_v0 = vmax.f32 %v758_v55, %v759_v37  ;;  %v241_v60 = vrot.slane %v115_v62, 2  ;;  %v1182_v49 = vrot.slane %v1181_v13, 4  ;;  %v1188_v6 = vsel %vm340_vm2, %v238_v43, -inf  ;;  %5805 = vst [vmem:[#allocation26_spill] sm:$0xff] %v4206_v14 }
 0x12d   :  { %v766_v27 = vrot.slane %v4189_v25, 1  ;;  %v1421_v38 = vsel %vm1365_vm3, %v746_v58, %v739_v18  ;;  %v1189_v42 = vrot.slane %v1188_v6, 4  ;;  %v1195_v8 = vsel %vm340_vm2, %v239_v5, -inf }
 0x12e   :  { %1729 = vrot.lane.b32.xlu1 %v4114_v17, %s3341_s10  ;;  %v242_v4 = vrot.slane %v115_v62, 4  ;;  %v1183_v22 = vmax.f32 %v1181_v13, %v1182_v49  ;;  %v1196_v39 = vrot.slane %v1195_v8, 4  ;;  %v1202_v55 = vsel %vm340_vm2, %v240_v57, -inf }
 0x12f   :  { %v243_v37 = vrot.slane %v115_v62, 6  ;;  %v1190_v35 = vmax.f32 %v1188_v6, %v1189_v42  ;;  %v1203_v3 = vrot.slane %v1202_v55, 4  ;;  %v1209_v43 = vsel %vm340_vm2, %v115_v62, -inf }
 0x130   :  { %v1184_v44 = vrot.slane %v1183_v22, 2  ;;  %v1197_v18 = vmax.f32 %v1195_v8, %v1196_v39  ;;  %v1210_v58 = vrot.slane %v1209_v43, 4  ;;  %v1216_v5 = vsel %vm340_vm2, %v241_v60, -inf }
 0x131   :  { %1745 = vrot.lane.b32.xlu0 %v4149_v20, %s3341_s10  ;;  %v1422_v13 = vsel %vm1367_vm4, %v753_v9, %v1421_v38  ;;  %v1191_v49 = vrot.slane %v1190_v35, 2  ;;  %v1204_v57 = vmax.f32 %v1202_v55, %v1203_v3  ;;  %v1217_v6 = vrot.slane %v1216_v5, 4 }
 0x132   :  { %v1198_v14 = vrot.slane %v1197_v18, 2  ;;  %v1211_v41 = vmax.f32 %v1209_v43, %v1210_v58  ;;  %v1223_v23 = vsel %vm340_vm2, %v242_v4, -inf  ;;  %v1230_v8 = vsel %vm340_vm2, %v243_v37, -inf }
 0x133   :  { %1749 = vrot.lane.b32.xlu2 %v4154_v29, %s3341_s10  ;;  %v778_v29 = vrot.slane %v777_v31, 2  ;;  %v1192_v62 = vmax.f32 %v1190_v35, %v1191_v49  ;;  %v1205_v42 = vrot.slane %v1204_v57, 2  ;;  %v1224_v38 = vrot.slane %v1223_v23, 4 }
 0x134   :  { %v1199_v60 = vmax.f32 %v1197_v18, %v1198_v14  ;;  %v773_v14 = vrot.slane %v4193_v7, 1  ;;  %vm2253_vm11 = vcmask 1043456   ;;  %vm2061_vm12 = vcmask 31744  }
 0x135   :  { %v1206_v9 = vmax.f32 %v1204_v57, %v1205_v42  ;;  %v1225_v4 = vmax.f32 %v1223_v23, %v1224_v38  ;;  %v767_v57 = vmax.f32 %v4189_v25, %v766_v27  ;;  %v1423_v23 = vsel %vm1369_vm5, %v4197_v0, %v1422_v13 }
 0x136   :  { %1735 = vrot.lane.b32.xlu1 %v4157_v1, %s3341_s10  ;;  %v1200_v3 = vrot.slane %v1199_v60, 1  ;;  %vm2077_vm13 = vcmask 64512   ;;  %vm2093_vm14 = vcmask 97280   ;;  %vm2127_vm15 = vcmask 162816  }
 0x137   :  { %v1207_v49 = vrot.slane %v1206_v9, 1  ;;  %v1226_v42 = vrot.slane %v1225_v4, 2  ;;  %vm2110_vm2 = vcmask 130048  }
 0x138   :  { %v1201_v37 = vmax.f32 %v1199_v60, %v1200_v3 }
 0x139   :  { %1768 = vrot.lane.b32.xlu0 %v3541_v63, %s3342_s27  ;;  %v779_v63 = vmax.f32 %v777_v31, %v778_v29  ;;  %v1212_v29 = vrot.slane %v1211_v41, 2  ;;  %v1218_v31 = vmax.f32 %v1216_v5, %v1217_v6  ;;  %v4223_v6 = vpop.permute.xlu2 %1640  ;;  %v1227_v25 = vmax.f32 %v1225_v4, %v1226_v42 }
 0x13a   :  { %5806 = vst [vmem:[#allocation27_spill] sm:$0xff] %v4223_v6 }
 0x13b   :  { %1772 = vrot.lane.b32.xlu2 %v3639_v51, %s3342_s27  ;;  %v1185_v51 = vmax.f32 %v1183_v22, %v1184_v44  ;;  %v1193_v44 = vrot.slane %v1192_v62, 1  ;;  %v1231_v22 = vrot.slane %v1230_v8, 4  ;;  %v1213_v43 = vmax.f32 %v1211_v41, %v1212_v29 }
 0x13c   :  { %v1219_v35 = vrot.slane %v1218_v31, 2  ;;  %v5807_v41 = vrot.slane %v4173_v34, 2  ;;  %v780_v60 = vrot.slane %v779_v63, 1  ;;  %v1228_v38 = vrot.slane %v1227_v25, 1 }
 0x13d   :  { %v1186_v39 = vrot.slane %v1185_v51, 1  ;;  %v1194_v58 = vmax.f32 %v1192_v62, %v1193_v44  ;;  %v1214_v18 = vrot.slane %v1213_v43, 1 }
 0x13e   :  { %1741 = vrot.lane.b32.xlu1 %v4178_v46, %s3341_s10  ;;  %v1220_v5 = vmax.f32 %v1218_v31, %v1219_v35  ;;  %v786_v62 = vmax.f32 %v4173_v34, %v5807_v41  ;;  %v774_v31 = vmax.f32 %v4193_v7, %v773_v14  ;;  %v1424_v34 = vsel %vm1371_vm6, %v767_v57, %v1423_v23 }
 0x13f   :  { %v1187_v55 = vmax.f32 %v1185_v51, %v1186_v39  ;;  %v1208_v51 = vmax.f32 %v1206_v9, %v1207_v49  ;;  %v1215_v44 = vmax.f32 %v1213_v43, %v1214_v18 }
 0x140   :  { %v1221_v29 = vrot.slane %v1220_v5, 1  ;;  %v787_v9 = vrot.slane %v786_v62, 1  ;;  %v1425_v3 = vsel %vm1373_vm7, %v774_v31, %v1424_v34 }
 0x141   :  { %1774 = vrot.lane.b32.xlu0 %v3458_v53, %s3342_s27  ;;  %v1232_v53 = vmax.f32 %v1230_v8, %v1231_v22  ;;  %v1477_v39 = vsel %vm1365_vm3, %v1194_v58, %v1187_v55  ;;  %v781_v22 = vmax.f32 %v779_v63, %v780_v60  ;;  %v1229_v58 = vmax.f32 %v1227_v25, %v1228_v38  ;;  %v4248_v4 = vpop.permute.xlu2 %1646  ;;  %v4284_v60 = vpop.permute.xlu1 %1634  ;;  %v5814_v38 = vld [vmem:[#allocation16_spill] sm:$0xff] }
 0x142   :  { %v1478_v27 = vsel %vm1367_vm4, %v1201_v37, %v1477_v39  ;;  %v1222_v55 = vmax.f32 %v1220_v5, %v1221_v29  ;;  %v788_v35 = vmax.f32 %v786_v62, %v787_v9  ;;  %vm2144_vm3 = vcmask 195584  }
 0x143   :  { %1778 = vrot.lane.b32.xlu2 %v3685_v59, %s3342_s27  ;;  %v1233_v8 = vrot.slane %v1232_v53, 2  ;;  %v1479_v13 = vsel %vm1369_vm5, %v1208_v51, %v1478_v27  ;;  %v1426_v49 = vsel %vm1375_vm8, %v781_v22, %v1425_v3  ;;  %v5816_v3 = vld [vmem:[#allocation5_spill] sm:$0xff]  ;;  %vm2178_vm4 = vcmask 261120  }
 0x144   :  { %v1480_v7 = vsel %vm1371_vm6, %v1215_v44, %v1479_v13  ;;  %v1427_v37 = vsel %vm1377_vm9, %v788_v35, %v1426_v49  ;;  %vm2161_vm5 = vcmask 228352   ;;  %vm2204_vm6 = vcmask 293888  }
 0x145   :  { %v1234_v0 = vmax.f32 %v1232_v53, %v1233_v8  ;;  %v4246_v53 = vpop.permute.xlu0 %1630  ;;  %v1481_v63 = vsel %vm1373_vm7, %v1222_v55, %v1480_v7  ;;  %v1493_v5 = vrot.slane %v1427_v37, 7  ;;  %v5817_v7 = vld [vmem:[#allocation14_spill] sm:$0xff] }
 0x146   :  { %1747 = vrot.lane.b32.xlu1 %v4187_v48, %s3341_s10  ;;  %v1482_v18 = vsel %vm1375_vm8, %v1229_v58, %v1481_v63  ;;  %v5823_v63 = vld [vmem:[#allocation12_spill] sm:$0xff] }
 0x147   :  { %v1235_v43 = vrot.slane %v1234_v0, 1  ;;  %v4261_v42 = vsel %vm1519_vm0, 0.0, %v1493_v5  ;;  %v1545_v29 = vsel %vm1519_vm0, %v1493_v5, 0.0 }
 0x148   :  { %v1818_v25 = vrot.slane %v4261_v42, 1  ;;  %v1819_v27 = vrot.slane %v1545_v29, 1 }
 0x149   :  { %1780 = vrot.lane.b32.xlu0 %v3783_v52, %s3342_s27  ;;  %v1236_v14 = vmax.f32 %v1234_v0, %v1235_v43  ;;  %v4265_v41 = vpop.permute.xlu2 %1652  ;;  %v4303_v0 = vpop.permute.xlu1 %1636 }
 0x14a   :  { %5808 = vst [vmem:[#allocation28_spill] sm:$0xff] %v4265_v41  ;;  %v4299_v34 = vsel %vm1584_vm1, %v1818_v25, %v1819_v27 }
 0x14b   :  { %1784 = vrot.lane.b32.xlu2 %v3739_v61, %s3342_s27  ;;  %v1483_v57 = vsel %vm1377_vm9, %v1236_v14, %v1482_v18 }
 0x14c   :  { %v1501_v51 = vrot.slane %v1483_v57, 7 }
 0x14d   :  { %v4267_v62 = vpop.permute.xlu0 %1632 }
 0x14e   :  { %1770 = vrot.lane.b32.xlu1 %v3495_v24, %s3342_s27  ;;  %v4272_v23 = vsel %vm1519_vm0, 0.0, %v1501_v51  ;;  %v1553_v18 = vsel %vm1519_vm0, %v1501_v51, 0.0 }
 0x14f   :  { %v1821_v57 = vrot.slane %v4272_v23, 1  ;;  %v1822_v25 = vrot.slane %v1553_v18, 1 }
 0x151   :  { %1786 = vrot.lane.b32.xlu0 %v3829_v16, %s3342_s27  ;;  %v4317_v22 = vpop.permute.xlu1 %1644 }
 0x152   :  { %5815 = vst [vmem:[#allocation16_spill] sm:$0xff] %v4317_v22 }
 0x153   :  { %1790 = vrot.lane.b32.xlu2 %v3875_v26, %s3342_s27 }
 0x155   :  { %v4280_v39 = vpop.permute.xlu0 %1642 }
 0x156   :  { %1776 = vrot.lane.b32.xlu1 %v3595_v36, %s3342_s27  ;;  %5810 = vst [vmem:[#allocation30_spill] sm:$0xff] %v4280_v39 }
 0x159   :  { %1792 = vrot.lane.b32.xlu0 %v3973_v32, %s3342_s27  ;;  %v4333_v35 = vpop.permute.xlu1 %1650 }
 0x15b   :  { %1796 = vrot.lane.b32.xlu2 %v4019_v47, %s3342_s27 }
 0x15d   :  { %v4296_v44 = vpop.permute.xlu0 %1648 }
 0x15e   :  { %1782 = vrot.lane.b32.xlu1 %v4261_v42, %s3342_s27  ;;  %5811 = vst [vmem:[#allocation31_spill] sm:$0xff] %v4296_v44 }
 0x161   :  { %1798 = vrot.lane.b32.xlu0 %v4272_v23, %s3342_s27 }
 0x163   :  { %1826 = vrot.lane.b32.xlu2 %v3509_v40, %s3343_s0 }
 0x165   :  { %v4278_v8 = vpop.permute.xlu2 %1658 }
 0x166   :  { %5809 = vst [vmem:[#allocation29_spill] sm:$0xff] %v4278_v8  ;;  %1788 = vrot.lane.b32.xlu1 %v3929_v2, %s3342_s27  ;;  %v1873_v8 = vrot.slane %v1545_v29, 2 }
 0x169   :  { %1828 = vrot.lane.b32.xlu0 %v3659_v33, %s3343_s0 }
 0x16a   :  { %v4313_v9 = vpop.permute.xlu0 %1654 }
 0x16b   :  { %1832 = vrot.lane.b32.xlu2 %v3609_v56, %s3343_s0  ;;  %5813 = vst [vmem:[#allocation33_spill] sm:$0xff] %v4313_v9 }
 0x16d   :  { %v4292_v31 = vpop.permute.xlu2 %1725 }
 0x16e   :  { %1794 = vrot.lane.b32.xlu1 %v4068_v11, %s3342_s27 }
 0x171   :  { %1834 = vrot.lane.b32.xlu0 %v3696_v15, %s3343_s0 }
 0x173   :  { %1838 = vrot.lane.b32.xlu2 %v4299_v34, %s3343_s0 }
 0x175   :  { %v4307_v13 = vpop.permute.xlu2 %1731 }
 0x176   :  { %5812 = vst [vmem:[#allocation32_spill] sm:$0xff] %v4307_v13  ;;  %1824 = vrot.lane.b32.xlu1 %v3561_v19, %s3343_s0 }
 0x179   :  { %1840 = vrot.lane.b32.xlu0 %v3753_v21, %s3343_s0  ;;  %v5820_v21 = vld [vmem:[#allocation10_spill] sm:$0xff] }
 0x17a   :  { %5821 = vst [vmem:[#allocation10_spill] sm:$0xff] %v4333_v35 }
 0x17b   :  { %1844 = vrot.lane.b32.xlu2 %v5814_v38, %s3343_s0 }
 0x17d   :  { %v4319_v55 = vpop.permute.xlu2 %1737 }
 0x17e   :  { %1830 = vrot.lane.b32.xlu1 %v5816_v3, %s3343_s0 }
 0x181   :  { %1846 = vrot.lane.b32.xlu0 %v5817_v7, %s3343_s0 }
 0x183   :  { %v4325_v43 = vpop.permute.xlu0 %3333  ;;  %1850 = vrot.lane.b32.xlu2 %v4082_v30, %s3343_s0 }
 0x184   :  { %5818 = vst [vmem:[#allocation5_spill] sm:$0xff] %v4325_v43 }
 0x185   :  { %v4329_v19 = vpop.permute.xlu2 %1743 }
 0x186   :  { %5819 = vst [vmem:[#allocation14_spill] sm:$0xff] %v4329_v19  ;;  %1836 = vrot.lane.b32.xlu1 %v5820_v21, %s3343_s0 }
 0x189   :  { %1852 = vrot.lane.b32.xlu0 %v4027_v12, %s3343_s0 }
 0x18b   :  { %v4337_v58 = vpop.permute.xlu0 %1727  ;;  %1878 = vrot.lane.b32.xlu2 %v4109_v54, %s3344_s28  ;;  %v5826_v54 = vld [vmem:[#allocation18_spill] sm:$0xff] }
 0x18d   :  { %v4341_v49 = vpop.permute.xlu2 %1749 }
 0x18e   :  { %5822 = vst [vmem:[#allocation34_spill] sm:$0xff] %v4341_v49  ;;  %1842 = vrot.lane.b32.xlu1 %v5823_v63, %s3343_s0  ;;  %v1872_v49 = vrot.slane %v4261_v42, 2 }
 0x190   :  { %v4345_v14 = vpop.permute.xlu1 %1656  ;;  %v4376_v19 = vsel %vm1675_vm10, %v1872_v49, %v1873_v8  ;;  %v1875_v49 = vrot.slane %v4272_v23, 2 }
 0x191   :  { %5824 = vst [vmem:[#allocation12_spill] sm:$0xff] %v4345_v14  ;;  %1880 = vrot.lane.b32.xlu0 %v4049_v10, %s3344_s28  ;;  %v4365_v14 = vsel %vm1584_vm1, %v1821_v57, %v1822_v25 }
 0x193   :  { %v4349_v37 = vpop.permute.xlu0 %1733  ;;  %1884 = vrot.lane.b32.xlu2 %v4114_v17, %s3344_s28 }
 0x194   :  { %5825 = vst [vmem:[#allocation35_spill] sm:$0xff] %v4349_v37  ;;  %v5840_v37 = vld [vmem:[#allocation24_spill] sm:$0xff] }
 0x195   :  { %v4354_v5 = vpop.permute.xlu2 %1772 }
 0x196   :  { %1848 = vrot.lane.b32.xlu1 %v5826_v54, %s3343_s0 }
 0x198   :  { %v4359_v27 = vpop.permute.xlu1 %1723 }
 0x199   :  { %1886 = vrot.lane.b32.xlu0 %v4063_v50, %s3344_s28 }
 0x19b   :  { %v4367_v51 = vpop.permute.xlu0 %1739  ;;  %1890 = vrot.lane.b32.xlu2 %v4157_v1, %s3344_s28 }
 0x19c   :  { %5827 = vst [vmem:[#allocation18_spill] sm:$0xff] %v4367_v51  ;;  %v5833_v51 = vld [vmem:[#allocation22_spill] sm:$0xff] }
 0x19d   :  { %v4371_v9 = vpop.permute.xlu2 %1778 }
 0x19e   :  { %5828 = vst [vmem:[#allocation36_spill] sm:$0xff] %v4371_v9  ;;  %1854 = vrot.lane.b32.xlu1 %v4365_v14, %s3343_s0 }
 0x1a0   :  { %v4378_v41 = vpop.permute.xlu1 %1729 }
 0x1a1   :  { %1892 = vrot.lane.b32.xlu0 %v4376_v19, %s3344_s28 }
 0x1a3   :  { %v4382_v29 = vpop.permute.xlu0 %1745  ;;  %1896 = vrot.lane.b32.xlu2 %v4117_v45, %s3344_s28 }
 0x1a4   :  { %5829 = vst [vmem:[#allocation37_spill] sm:$0xff] %v4382_v29  ;;  %v1876_v29 = vrot.slane %v1553_v18, 2  ;;  %v5836_v18 = vld [vmem:[#allocation23_spill] sm:$0xff] }
 0x1a5   :  { %v4386_v57 = vpop.permute.xlu2 %1784 }
 0x1a6   :  { %5830 = vst [vmem:[#allocation38_spill] sm:$0xff] %v4386_v57  ;;  %1882 = vrot.lane.b32.xlu1 %v4059_v28, %s3344_s28  ;;  %v4406_v44 = vsel %vm1675_vm10, %v1875_v49, %v1876_v29  ;;  %v5839_v49 = vld [vmem:[#allocation4_spill] sm:$0xff] }
 0x1a8   :  { %v4390_v25 = vpop.permute.xlu1 %1735 }
 0x1a9   :  { %5831 = vst [vmem:[#allocation39_spill] sm:$0xff] %v4390_v25  ;;  %1898 = vrot.lane.b32.xlu0 %v4178_v46, %s3344_s28 }
 0x1ab   :  { %v4394_v8 = vpop.permute.xlu0 %1768  ;;  %1902 = vrot.lane.b32.xlu2 %v4149_v20, %s3344_s28 }
 0x1ad   :  { %v4399_v35 = vpop.permute.xlu2 %1790 }
 0x1ae   :  { %5832 = vst [vmem:[#allocation40_spill] sm:$0xff] %v4399_v35  ;;  %1888 = vrot.lane.b32.xlu1 %v5833_v51, %s3344_s28 }
 0x1b0   :  { %v4403_v57 = vpop.permute.xlu1 %1741 }
 0x1b1   :  { %5834 = vst [vmem:[#allocation22_spill] sm:$0xff] %v4403_v57  ;;  %1904 = vrot.lane.b32.xlu0 %v4187_v48, %s3344_s28 }
 0x1b3   :  { %v4410_v25 = vpop.permute.xlu0 %1774  ;;  %1908 = vrot.lane.b32.xlu2 %v4406_v44, %s3344_s28 }
 0x1b5   :  { %v4414_v22 = vpop.permute.xlu2 %1796 }
 0x1b6   :  { %5835 = vst [vmem:[#allocation41_spill] sm:$0xff] %v4414_v22  ;;  %1894 = vrot.lane.b32.xlu1 %v5836_v18, %s3344_s28 }
 0x1b8   :  { %v4418_v35 = vpop.permute.xlu1 %1747 }
 0x1b9   :  { %5837 = vst [vmem:[#allocation23_spill] sm:$0xff] %v4418_v35  ;;  %1926 = vrot.lane.b32.xlu0 %v3495_v24, %s3345_s29 }
 0x1bb   :  { %v4422_v29 = vpop.permute.xlu0 %1780  ;;  %1930 = vrot.lane.b32.xlu2 %v5839_v49, %s3345_s29 }
 0x1bc   :  { %5838 = vst [vmem:[#allocation42_spill] sm:$0xff] %v4422_v29  ;;  %v5841_v29 = vld [vmem:[#allocation25_spill] sm:$0xff] }
 0x1bd   :  { %v4426_v57 = vpop.permute.xlu2 %1826 }
 0x1be   :  { %1900 = vrot.lane.b32.xlu1 %v5840_v37, %s3344_s28 }
 0x1c0   :  { %v4430_v22 = vpop.permute.xlu1 %1770 }
 0x1c1   :  { %1932 = vrot.lane.b32.xlu0 %v3595_v36, %s3345_s29  ;;  %v5843_v36 = vld [vmem:[#allocation8_spill] sm:$0xff] }
 0x1c3   :  { %v4434_v18 = vpop.permute.xlu0 %1786  ;;  %1936 = vrot.lane.b32.xlu2 %v3783_v52, %s3345_s29 }
 0x1c5   :  { %v4438_v35 = vpop.permute.xlu2 %1832 }
 0x1c6   :  { %1906 = vrot.lane.b32.xlu1 %v5841_v29, %s3344_s28 }
 0x1c8   :  { %v4442_v39 = vpop.permute.xlu1 %1776 }
 0x1c9   :  { %1938 = vrot.lane.b32.xlu0 %v4261_v42, %s3345_s29 }
 0x1cb   :  { %v4446_v9 = vpop.permute.xlu0 %1792  ;;  %1942 = vrot.lane.b32.xlu2 %v3829_v16, %s3345_s29 }
 0x1cc   :  { %5842 = vst [vmem:[#allocation4_spill] sm:$0xff] %v4446_v9 }
 0x1cd   :  { %v4450_v13 = vpop.permute.xlu2 %1838 }
 0x1ce   :  { %1928 = vrot.lane.b32.xlu1 %v5843_v36, %s3345_s29 }
 0x1d0   :  { %v4454_v52 = vpop.permute.xlu1 %1782 }
 0x1d1   :  { %1971 = vrot.lane.b32.xlu0 %v3509_v40, %s3346_s30 }
 0x1d3   :  { %v4458_v6 = vpop.permute.xlu0 %1798  ;;  %1973 = vrot.lane.b32.xlu2 %v3659_v33, %s3346_s30  ;;  %v5847_v33 = vld [vmem:[#allocation2_spill] sm:$0xff] }
 0x1d4   :  { %5844 = vst [vmem:[#allocation24_spill] sm:$0xff] %v4458_v6 }
 0x1d5   :  { %v4462_v42 = vpop.permute.xlu2 %1844 }
 0x1d6   :  { %5845 = vst [vmem:[#allocation25_spill] sm:$0xff] %v4462_v42  ;;  %1934 = vrot.lane.b32.xlu1 %v3685_v59, %s3345_s29 }
 0x1d8   :  { %v4466_v9 = vpop.permute.xlu1 %1788 }
 0x1d9   :  { %2018 = vrot.lane.b32.xlu0 %v4059_v28, %s3347_s6 }
 0x1db   :  { %v4470_v16 = vpop.permute.xlu0 %1828  ;;  %1975 = vrot.lane.b32.xlu2 %v5816_v3, %s3346_s30 }
 0x1dd   :  { %v4474_v40 = vpop.permute.xlu2 %1850 }
 0x1de   :  { %5846 = vst [vmem:[#allocation8_spill] sm:$0xff] %v4474_v40  ;;  %1940 = vrot.lane.b32.xlu1 %v5847_v33, %s3345_s29 }
 0x1e0   :  { %v4478_v6 = vpop.permute.xlu1 %1794 }
 0x1e1   :  { %5848 = vst [vmem:[#allocation43_spill] sm:$0xff] %v4478_v6  ;;  %2020 = vrot.lane.b32.xlu0 %v4114_v17, %s3347_s6 }
 0x1e3   :  { %v4482_v42 = vpop.permute.xlu0 %1834  ;;  %1977 = vrot.lane.b32.xlu2 %v3609_v56, %s3346_s30 }
 0x1e5   :  { %v4486_v28 = vpop.permute.xlu2 %1878 }
 0x1e6   :  { %2016 = vrot.lane.b32.xlu1 %v4049_v10, %s3347_s6 }
 0x1e8   :  { %v4490_v3 = vpop.permute.xlu1 %1824 }
 0x1e9   :  { %2022 = vrot.lane.b32.xlu0 %v4063_v50, %s3347_s6 }
 0x1eb   :  { %v4494_v40 = vpop.permute.xlu0 %1840  ;;  %2024 = vrot.lane.b32.xlu2 %v5833_v51, %s3347_s6 }
 0x1ed   :  { %v4498_v17 = vpop.permute.xlu2 %1884 }
 0x1ee   :  { %1944 = vrot.lane.b32.xlu1 %v3929_v2, %s3345_s29 }
 0x1f0   :  { %v4502_v56 = vpop.permute.xlu1 %1830 }
 0x1f1   :  { %1948 = vrot.lane.b32.xlu0 %v3973_v32, %s3345_s29 }
 0x1f3   :  { %v4506_v10 = vpop.permute.xlu0 %1846  ;;  %2026 = vrot.lane.b32.xlu2 %v4157_v1, %s3347_s6 }
 0x1f4   :  { %5849 = vst [vmem:[#allocation44_spill] sm:$0xff] %v4506_v10 }
 0x1f5   :  { %v4512_v50 = vpop.permute.xlu2 %1890 }
 0x1f6   :  { %1946 = vrot.lane.b32.xlu1 %v3875_v26, %s3345_s29  ;;  %v5851_v26 = vld [vmem:[#allocation3_spill] sm:$0xff] }
 0x1f8   :  { %v4514_v51 = vpop.permute.xlu1 %1836 }
 0x1f9   :  { %1950 = vrot.lane.b32.xlu0 %v4068_v11, %s3345_s29 }
 0x1fb   :  { %v4518_v6 = vpop.permute.xlu0 %1852  ;;  %2028 = vrot.lane.b32.xlu2 %v4376_v19, %s3347_s6 }
 0x1fc   :  { %5850 = vst [vmem:[#allocation45_spill] sm:$0xff] %v4518_v6 }
 0x1fd   :  { %v4526_v1 = vpop.permute.xlu2 %1896 }
 0x1fe   :  { %1979 = vrot.lane.b32.xlu1 %v3696_v15, %s3346_s30 }
 0x200   :  { %v4524_v32 = vpop.permute.xlu1 %1842 }
 0x201   :  { %1985 = vrot.lane.b32.xlu0 %v5851_v26, %s3346_s30 }
 0x203   :  { %v4530_v10 = vpop.permute.xlu0 %1880  ;;  %1989 = vrot.lane.b32.xlu2 %v5814_v38, %s3346_s30 }
 0x205   :  { %v4540_v15 = vpop.permute.xlu2 %1902 }
 0x206   :  { %1981 = vrot.lane.b32.xlu1 %v5820_v21, %s3346_s30  ;;  %5853 = vst [vmem:[#allocation47_spill] sm:$0xff] %v4540_v15  ;;  %v5856_v21 = vld [vmem:[#allocation20_spill] sm:$0xff] }
 0x208   :  { %v4536_v6 = vpop.permute.xlu1 %1848 }
 0x209   :  { %5852 = vst [vmem:[#allocation46_spill] sm:$0xff] %v4536_v6  ;;  %2034 = vrot.lane.b32.xlu0 %v4178_v46, %s3347_s6 }
 0x20b   :  { %v4542_v19 = vpop.permute.xlu0 %1886  ;;  %2032 = vrot.lane.b32.xlu2 %v4117_v45, %s3347_s6 }
 0x20d   :  { %v4556_v46 = vpop.permute.xlu2 %1908 }
 0x20e   :  { %1983 = vrot.lane.b32.xlu1 %v4299_v34, %s3346_s30  ;;  %5855 = vst [vmem:[#allocation49_spill] sm:$0xff] %v4556_v46  ;;  %v2196_v46 = vld [vmem:[%s5735_s1 + $0x8] sm:$0xff] }
 0x210   :  { %v4548_v26 = vpop.permute.xlu1 %1854 }
 0x211   :  { %5854 = vst [vmem:[#allocation48_spill] sm:$0xff] %v4548_v26  ;;  %1991 = vrot.lane.b32.xlu0 %v5817_v7, %s3346_s30  ;;  %v2195_v26 = vld [vmem:[%s5735_s1] sm:$0xff] }
 0x213   :  { %v4552_v38 = vpop.permute.xlu0 %1892  ;;  %1993 = vrot.lane.b32.xlu2 %v5826_v54, %s3346_s30 }
 0x215   :  { %v4570_v34 = vpop.permute.xlu2 %1930 }
 0x216   :  { %2030 = vrot.lane.b32.xlu1 %v5856_v21, %s3347_s6 }
 0x218   :  { %v4560_v11 = vpop.permute.xlu1 %1882 }
 0x219   :  { %2038 = vrot.lane.b32.xlu0 %v4149_v20, %s3347_s6 }
 0x21b   :  { %v4564_v45 = vpop.permute.xlu0 %1898  ;;  %2040 = vrot.lane.b32.xlu2 %v4187_v48, %s3347_s6 }
 0x21c   :  { %5857 = vst [vmem:[#allocation50_spill] sm:$0xff] %v4564_v45 }
 0x21d   :  { %v4584_v48 = vpop.permute.xlu2 %1936 }
 0x21e   :  { %1987 = vrot.lane.b32.xlu1 %v5823_v63, %s3346_s30 }
 0x220   :  { %v4572_v7 = vpop.permute.xlu1 %1888 }
 0x221   :  { %1952 = vrot.lane.b32.xlu0 %v4019_v47, %s3345_s29 }
 0x223   :  { %v4576_v54 = vpop.permute.xlu0 %1904  ;;  %2042 = vrot.lane.b32.xlu2 %v5841_v29, %s3347_s6  ;;  %v2198_v29 = vld [vmem:[%s5735_s1 + $0x18] sm:$0xff] }
 0x224   :  { %5858 = vst [vmem:[#allocation51_spill] sm:$0xff] %v4576_v54 }
 0x226   :  { %2036 = vrot.lane.b32.xlu1 %v5840_v37, %s3347_s6  ;;  %v2199_v37 = vld [vmem:[%s5735_s1 + $0x20] sm:$0xf] }
 0x227   :  { %3272 = vmatpush.msk.msra.mxu0 %vm2253_vm11, %v2199_v37  ;;  %3305 = vmatpush.msk.msra.mxu3 %vm2253_vm11, %v2199_v37 }
 0x228   :  { %v4582_v20 = vpop.permute.xlu1 %1894 }
 0x229   :  { %5859 = vst [vmem:[#allocation52_spill] sm:$0xff] %v4582_v20  ;;  %1954 = vrot.lane.b32.xlu0 %v4272_v23, %s3345_s29  ;;  %v4600_v23 = vpop.permute.xlu2 %1942  ;;  %2269 = vmatpush.msra.mxu0 %v2198_v29 }
 0x22a   :  { %5861 = vst [vmem:[#allocation54_spill] sm:$0xff] %v4600_v23  ;;  %3306 = vmatpush.msra.mxu3 %v2198_v29 }
 0x22b   :  { %v1927_v63 = vpop.permute.xlu0 %1926  ;;  %2044 = vrot.lane.b32.xlu2 %v4406_v44, %s3347_s6  ;;  %v2197_v44 = vld [vmem:[%s5735_s1 + $0x10] sm:$0xff] }
 0x22c   :  { %2270 = vmatpush.msra.mxu0 %v2197_v44  ;;  %3307 = vmatpush.msra.mxu3 %v2197_v44 }
 0x22e   :  { %1995 = vrot.lane.b32.xlu1 %v4082_v30, %s3346_s30  ;;  %2271 = vmatpush.msra.mxu0 %v2196_v46 }
 0x22f   :  { %3308 = vmatpush.msra.mxu3 %v2196_v46 }
 0x230   :  { %v4592_v21 = vpop.permute.xlu1 %1900  ;;  %2272 = vmatpush.msra.mxu0 %v2195_v26 }
 0x231   :  { %5860 = vst [vmem:[#allocation53_spill] sm:$0xff] %v4592_v21  ;;  %3309 = vmatpush.msra.mxu3 %v2195_v26  ;;  %v1974_v47 = vpop.permute.xlu2 %1973  ;;  %v2062_v26 = vsel %vm2061_vm12, %v5847_v33, %v4246_v53 }
 0x233   :  { %v4605_v30 = vpop.permute.xlu0 %1932 }
 0x236   :  { %1997 = vrot.lane.b32.xlu1 %v4027_v12, %s3346_s30 }
 0x238   :  { %v4612_v37 = vpop.permute.xlu1 %1906 }
 0x239   :  { %5862 = vst [vmem:[#allocation55_spill] sm:$0xff] %v4612_v37  ;;  %v1976_v15 = vpop.permute.xlu2 %1975  ;;  %v3335_v37 = vunpack.i.l.bf16 %v4325_v43 }
 0x23b   :  { %v4617_v29 = vpop.permute.xlu0 %1938 }
 0x23e   :  { %1999 = vrot.lane.b32.xlu1 %v4365_v14, %s3346_s30  ;;  %v4630_v14 = vsel %vm2077_vm13, %v2062_v26, %v3335_v37  ;;  %v5863_v37 = vld [vmem:[#allocation6_spill] sm:$0xff] }
 0x23f   :  { %v2094_v45 = vsel %vm2093_vm14, %v4630_v14, %v4394_v8  ;;  %v2063_v26 = vsel %vm2061_vm12, %v5863_v37, %v4267_v62 }
 0x240   :  { %v1929_v44 = vpop.permute.xlu1 %1928  ;;  %v2111_v43 = vsel %vm2110_vm2, %v2094_v45, %v4490_v3  ;;  %v2079_v20 = vsel %vm2077_vm13, %v2063_v26, %v4359_v27 }
 0x241   :  { %v1978_v6 = vpop.permute.xlu2 %1977  ;;  %v2128_v23 = vsel %vm2127_vm15, %v2111_v43, %v4486_v28  ;;  %v2095_v43 = vsel %vm2093_vm14, %v2079_v20, %v4430_v22  ;;  %v2064_v22 = vsel %vm2061_vm12, %v3495_v24, %v4284_v60 }
 0x242   :  { %v2145_v53 = vsel %vm2144_vm3, %v2128_v23, %v1927_v63  ;;  %v2112_v45 = vsel %vm2110_vm2, %v2095_v43, %v4426_v57  ;;  %v2080_v57 = vsel %vm2077_vm13, %v2064_v22, %v4292_v31 }
 0x243   :  { %v1972_v54 = vpop.permute.xlu0 %1971  ;;  %v2129_v62 = vsel %vm2127_vm15, %v2112_v45, %v4530_v10  ;;  %v2096_v10 = vsel %vm2093_vm14, %v2080_v57, %v4354_v5  ;;  %v2065_v5 = vsel %vm2061_vm12, %v5843_v36, %v4303_v0  ;;  %v5864_v0 = vld [vmem:[#allocation26_spill] sm:$0xff]  ;;  %v5865_v45 = vld [vmem:[#allocation27_spill] sm:$0xff] }
 0x244   :  { %v2162_v33 = vsel %vm2161_vm5, %v2145_v53, %v1972_v54  ;;  %v2146_v54 = vsel %vm2144_vm3, %v2129_v62, %v1929_v44  ;;  %v2066_v26 = vsel %vm2061_vm12, %v5839_v49, %v5864_v0  ;;  %v5873_v0 = vld [vmem:[#allocation9_spill] sm:$0xff] }
 0x245   :  { %v2163_v27 = vsel %vm2161_vm5, %v2146_v54, %v1974_v47  ;;  %v2113_v47 = vsel %vm2110_vm2, %v2096_v10, %v4470_v16  ;;  %v2081_v16 = vsel %vm2077_vm13, %v2065_v5, %v4337_v58 }
 0x248   :  { %v4621_v12 = vpop.permute.xlu1 %1934 }
 0x249   :  { %v2025_v28 = vpop.permute.xlu2 %2024 }
 0x24b   :  { %v2019_v46 = vpop.permute.xlu0 %2018 }
 0x250   :  { %v4624_v21 = vpop.permute.xlu1 %1940 }
 0x251   :  { %v2027_v44 = vpop.permute.xlu2 %2026 }
 0x253   :  { %v2021_v2 = vpop.permute.xlu0 %2020 }
 0x258   :  { %v2017_v8 = vpop.permute.xlu1 %2016 }
 0x259   :  { %v2179_v3 = vsel %vm2178_vm4, %v2162_v33, %v2017_v8  ;;  %v2180_v33 = vsel %vm2178_vm4, %v2163_v27, %v2019_v46  ;;  %v2130_v46 = vsel %vm2127_vm15, %v2113_v47, %v4560_v11  ;;  %v2097_v11 = vsel %vm2093_vm14, %v2081_v16, %v4410_v25 }
 0x25a   :  { %3273 = vmatmul.msk.f32.vlgmr.msra.gmra.mxu0 %vm2204_vm6, %v2179_v3  ;;  %v2147_v24 = vsel %vm2144_vm3, %v2130_v46, %v4570_v34  ;;  %v2029_v34 = vpop.permute.xlu2 %2028  ;;  %v2082_v25 = vsel %vm2077_vm13, %v2066_v26, %v4378_v41  ;;  %v5869_v46 = vld [vmem:[#allocation30_spill] sm:$0xff] }
 0x25b   :  { %v2023_v63 = vpop.permute.xlu0 %2022  ;;  %v2164_v60 = vsel %vm2161_vm5, %v2147_v24, %v1976_v15  ;;  %v2114_v15 = vsel %vm2110_vm2, %v2097_v11, %v4502_v56  ;;  %v2098_v56 = vsel %vm2093_vm14, %v2082_v25, %v4442_v39  ;;  %v2068_v24 = vsel %vm2061_vm12, %v3685_v59, %v5869_v46 }
 0x25c   :  { %v2181_v31 = vsel %vm2178_vm4, %v2164_v60, %v2021_v2  ;;  %v2131_v2 = vsel %vm2127_vm15, %v2114_v15, %v4498_v17  ;;  %v2115_v17 = vsel %vm2110_vm2, %v2098_v56, %v4438_v35  ;;  %v5870_v60 = vld [vmem:[#allocation35_spill] sm:$0xff] }
 0x25d   :  { %v2148_v36 = vsel %vm2144_vm3, %v2131_v2, %v4605_v30  ;;  %v2132_v49 = vsel %vm2127_vm15, %v2115_v17, %v4542_v19 }
 0x25e   :  { %v2165_v58 = vsel %vm2161_vm5, %v2148_v36, %v1978_v6  ;;  %v2070_v6 = vsel %vm2061_vm12, %v3739_v61, %v4248_v4  ;;  %v2149_v41 = vsel %vm2144_vm3, %v2132_v49, %v4621_v12  ;;  %v5867_v4 = vld [vmem:[#allocation32_spill] sm:$0xff]  ;;  %v5875_v49 = vld [vmem:[#allocation31_spill] sm:$0xff] }
 0x25f   :  { %v2182_v3 = vsel %vm2178_vm4, %v2165_v58, %v2023_v63  ;;  %v2086_v39 = vsel %vm2077_vm13, %v2070_v6, %v4319_v55  ;;  %v5866_v63 = vld [vmem:[#allocation7_spill] sm:$0xff]  ;;  %v5872_v36 = vld [vmem:[#allocation16_spill] sm:$0xff] }
 0x260   :  { %v1945_v23 = vpop.permute.xlu1 %1944  ;;  %v2103_v35 = vsel %vm2093_vm14, %v2086_v39, %v4434_v18  ;;  %v2067_v62 = vsel %vm2061_vm12, %v5866_v63, %v5865_v45  ;;  %v2069_v26 = vsel %vm2061_vm12, %v5873_v0, %v5872_v36  ;;  %v5874_v58 = vld [vmem:[#allocation39_spill] sm:$0xff]  ;;  %v5879_v45 = vld [vmem:[#allocation52_spill] sm:$0xff] }
 0x261   :  { %v2120_v19 = vsel %vm2110_vm2, %v2103_v35, %v4524_v32  ;;  %v2083_v12 = vsel %vm2077_vm13, %v2067_v62, %v5867_v4  ;;  %v5876_v6 = vld [vmem:[#allocation11_spill] sm:$0xff]  ;;  %v5882_v4 = vld [vmem:[#allocation50_spill] sm:$0xff]  ;;  %v5892_v36 = vld [vmem:[#allocation4_spill] sm:$0xff] }
 0x262   :  { %3274 = vmatmul.msk.f32.gmra.mxu0 %vm2204_vm6, %v2180_v33  ;;  %v1990_v54 = vpop.permute.xlu2 %1989  ;;  %v2137_v55 = vsel %vm2127_vm15, %v2120_v19, %v4526_v1  ;;  %v5868_v33 = vld [vmem:[#allocation36_spill] sm:$0xff]  ;;  %v5880_v19 = vld [vmem:[#allocation25_spill] sm:$0xff] }
 0x263   :  { %v4663_v20 = vpop.permute.xlu0 %1948  ;;  %v2099_v18 = vsel %vm2093_vm14, %v2083_v12, %v5868_v33  ;;  %v2154_v22 = vsel %vm2144_vm3, %v2137_v55, %v1945_v23 }
 0x264   :  { %v2116_v32 = vsel %vm2110_vm2, %v2099_v18, %v4482_v42  ;;  %v2171_v57 = vsel %vm2161_vm5, %v2154_v22, %v1990_v54  ;;  %v5883_v22 = vld [vmem:[#allocation10_spill] sm:$0xff] }
 0x265   :  { %v2133_v47 = vsel %vm2127_vm15, %v2116_v32, %v4572_v7  ;;  %v5871_v7 = vld [vmem:[#allocation42_spill] sm:$0xff]  ;;  %v5884_v32 = vld [vmem:[#allocation15_spill] sm:$0xff] }
 0x268   :  { %v4674_v53 = vpop.permute.xlu1 %1946 }
 0x26a   :  { %3275 = vmatmul.msk.f32.gmra.mxu0 %vm2204_vm6, %v2181_v31  ;;  %v2084_v31 = vsel %vm2077_vm13, %v2068_v24, %v5870_v60  ;;  %v2033_v25 = vpop.permute.xlu2 %2032  ;;  %v5888_v24 = vld [vmem:[#allocation53_spill] sm:$0xff] }
 0x26b   :  { %v4683_v37 = vpop.permute.xlu0 %1950  ;;  %v2100_v16 = vsel %vm2093_vm14, %v2084_v31, %v5871_v7  ;;  %v5890_v7 = vld [vmem:[#allocation13_spill] sm:$0xff] }
 0x270   :  { %v1980_v8 = vpop.permute.xlu1 %1979 }
 0x271   :  { %v2166_v43 = vsel %vm2161_vm5, %v2149_v41, %v1980_v8  ;;  %v5877_v41 = vld [vmem:[#allocation38_spill] sm:$0xff] }
 0x272   :  { %3276 = vmatmul.msk.f32.gmra.mxu0 %vm2204_vm6, %v2182_v3  ;;  %v2183_v27 = vsel %vm2178_vm4, %v2166_v43, %v2025_v28  ;;  %v2150_v28 = vsel %vm2144_vm3, %v2133_v47, %v4584_v48  ;;  %v2117_v48 = vsel %vm2110_vm2, %v2100_v16, %v4514_v51  ;;  %v2085_v51 = vsel %vm2077_vm13, %v2069_v26, %v5874_v58  ;;  %v5885_v47 = vld [vmem:[#allocation22_spill] sm:$0xff] }
 0x273   :  { %v4705_v30 = vpop.permute.xlu0 %1985  ;;  %v2134_v11 = vsel %vm2127_vm15, %v2117_v48, %v4512_v50  ;;  %v2101_v50 = vsel %vm2093_vm14, %v2085_v51, %v4454_v52  ;;  %v2071_v52 = vsel %vm2061_vm12, %v5876_v6, %v5875_v49  ;;  %v5893_v58 = vld [vmem:[#allocation46_spill] sm:$0xff]  ;;  %v5894_v51 = vld [vmem:[#allocation47_spill] sm:$0xff] }
 0x274   :  { %v2151_v59 = vsel %vm2144_vm3, %v2134_v11, %v4617_v29  ;;  %v2118_v29 = vsel %vm2110_vm2, %v2101_v50, %v4450_v13  ;;  %v2102_v13 = vsel %vm2093_vm14, %v4630_v14, %v5877_v41  ;;  %v5898_v41 = vld [vmem:[#allocation43_spill] sm:$0xff] }
 0x275   :  { %v2135_v8 = vsel %vm2127_vm15, %v2118_v29, %v4552_v38  ;;  %v5878_v38 = vld [vmem:[#allocation18_spill] sm:$0xff]  ;;  %v2119_v43 = vsel %vm2110_vm2, %v2102_v13, %v4494_v40 }
 0x276   :  { %v2087_v39 = vsel %vm2077_vm13, %v2071_v52, %v5878_v38  ;;  %v2136_v63 = vsel %vm2127_vm15, %v2119_v43, %v5879_v45  ;;  %v5899_v38 = vld [vmem:[#allocation8_spill] sm:$0xff] }
 0x277   :  { %v2104_v35 = vsel %vm2093_vm14, %v2087_v39, %v4466_v9  ;;  %v5900_v39 = vld [vmem:[#allocation51_spill] sm:$0xff] }
 0x278   :  { %v1982_v61 = vpop.permute.xlu1 %1981  ;;  %v2121_v54 = vsel %vm2110_vm2, %v2104_v35, %v5880_v19  ;;  %v5902_v19 = vld [vmem:[#allocation21_spill] sm:$0xff] }
 0x279   :  { %v2167_v23 = vsel %vm2161_vm5, %v2150_v28, %v1982_v61  ;;  %v5881_v61 = vld [vmem:[#allocation54_spill] sm:$0xff]  ;;  %v2138_v12 = vsel %vm2127_vm15, %v2121_v54, %v5882_v4 }
 0x27a   :  { %3277 = vmatmul.msk.f32.gmra.mxu0 %vm2204_vm6, %v2183_v27  ;;  %v2184_v5 = vsel %vm2178_vm4, %v2167_v23, %v2027_v44  ;;  %v2153_v14 = vsel %vm2144_vm3, %v2136_v63, %v5881_v61  ;;  %v2155_v40 = vsel %vm2144_vm3, %v2138_v12, %v4674_v53  ;;  %v5886_v53 = vld [vmem:[#allocation40_spill] sm:$0xff]  ;;  %v5903_v61 = vld [vmem:[#allocation23_spill] sm:$0xff]  ;;  %v5904_v12 = vld [vmem:[#allocation41_spill] sm:$0xff] }
 0x27b   :  { %v2035_v10 = vpop.permute.xlu0 %2034  ;;  %v5887_v23 = vld [vmem:[#allocation44_spill] sm:$0xff] }
 0x27c   :  { %v2188_v1 = vsel %vm2178_vm4, %v2171_v57, %v2035_v10  ;;  %v2072_v57 = vsel %vm2061_vm12, %v5884_v32, %v5883_v22  ;;  %v1994_v10 = vpop.permute.xlu2 %1993 }
 0x27d   :  { %3282 = vmatmul.msk.f32.vlgmr.msra.gmra.mxu3 %vm2204_vm6, %v2188_v1  ;;  %v2088_v1 = vsel %vm2077_vm13, %v2072_v57, %v5885_v47 }
 0x27e   :  { %v2105_v28 = vsel %vm2093_vm14, %v2088_v1, %v5886_v53  ;;  %v5907_v1 = vld [vmem:[#allocation29_spill] sm:$0xff]  ;;  %v5908_v53 = vld [vmem:[#allocation19_spill] sm:$0xff] }
 0x27f   :  { %v2122_v46 = vsel %vm2110_vm2, %v2105_v28, %v5887_v23  ;;  %v2076_v28 = vsel %vm2061_vm12, %v5908_v53, %v5907_v1  ;;  %v5909_v23 = vld [vmem:[#allocation34_spill] sm:$0xff] }
 0x280   :  { %v1984_v42 = vpop.permute.xlu1 %1983 }
 0x281   :  { %v2168_v15 = vsel %vm2161_vm5, %v2151_v59, %v1984_v42  ;;  %v2139_v42 = vsel %vm2127_vm15, %v2122_v46, %v5888_v24  ;;  %v5891_v59 = vld [vmem:[#allocation14_spill] sm:$0xff]  ;;  %v2092_v46 = vsel %vm2077_vm13, %v2076_v28, %v5909_v23  ;;  %v5910_v24 = vld [vmem:[#allocation24_spill] sm:$0xff] }
 0x282   :  { %3278 = vmatmul.msk.f32.gmra.mxu0 %vm2204_vm6, %v2184_v5  ;;  %v2185_v44 = vsel %vm2178_vm4, %v2168_v15, %v2029_v34  ;;  %v2152_v34 = vsel %vm2144_vm3, %v2135_v8, %v4624_v21  ;;  %v2156_v31 = vsel %vm2144_vm3, %v2139_v42, %v4663_v20  ;;  %v5889_v5 = vld [vmem:[#allocation28_spill] sm:$0xff]  ;;  %v2109_v42 = vsel %vm2093_vm14, %v2092_v46, %v5910_v24 }
 0x283   :  { %v2169_v3 = vsel %vm2161_vm5, %v2152_v34, %v4705_v30  ;;  %v1992_v62 = vpop.permute.xlu0 %1991  ;;  %v2073_v16 = vsel %vm2061_vm12, %v5890_v7, %v5889_v5  ;;  %v2173_v48 = vsel %vm2161_vm5, %v2156_v31, %v1994_v10  ;;  %v5895_v34 = vld [vmem:[#allocation33_spill] sm:$0xff] }
 0x284   :  { %v2172_v9 = vsel %vm2161_vm5, %v2155_v40, %v1992_v62  ;;  %v2089_v15 = vsel %vm2077_vm13, %v2073_v16, %v5891_v59  ;;  %v2041_v26 = vpop.permute.xlu2 %2040  ;;  %v5901_v62 = vld [vmem:[#allocation12_spill] sm:$0xff]  ;;  %v5912_v5 = vld [vmem:[#allocation49_spill] sm:$0xff]  ;;  %v4892_v59 = vld [vmem:[%s5736_s2] ss:$0 sm:$0xff]  ;;  %s3348_s2 = smov 40  }
 0x285   :  { %v2106_v0 = vsel %vm2093_vm14, %v2089_v15, %v5892_v36  ;;  %v2075_v54 = vsel %vm2061_vm12, %v5902_v19, %v5901_v62 }
 0x286   :  { %v2123_v20 = vsel %vm2110_vm2, %v2106_v0, %v5893_v58 }
 0x287   :  { %v2140_v50 = vsel %vm2127_vm15, %v2123_v20, %v5894_v51 }
 0x288   :  { %v4759_v2 = vpop.permute.xlu1 %2030  ;;  %v2157_v29 = vsel %vm2144_vm3, %v2140_v50, %v4683_v37 }
 0x289   :  { %v2186_v17 = vsel %vm2178_vm4, %v2169_v3, %v4759_v2 }
 0x28a   :  { %3279 = vmatmul.msk.f32.gmra.mxu0 %vm2204_vm6, %v2185_v44 }
 0x28b   :  { %v2039_v60 = vpop.permute.xlu0 %2038 }
 0x28c   :  { %v2190_v44 = vsel %vm2178_vm4, %v2173_v48, %v2039_v60  ;;  %v2043_v35 = vpop.permute.xlu2 %2042  ;;  %v5911_v60 = vld [vmem:[#allocation48_spill] sm:$0xff] }
 0x28d   :  { %v2126_v31 = vsel %vm2110_vm2, %v2109_v42, %v5911_v60 }
 0x28e   :  { %v2143_v7 = vsel %vm2127_vm15, %v2126_v31, %v5912_v5 }
 0x28f   :  { %v2160_v16 = vsel %vm2144_vm3, %v2143_v7, %v4624_v21 }
 0x290   :  { %v1988_v56 = vpop.permute.xlu1 %1987  ;;  %v2177_v48 = vsel %vm2161_vm5, %v2160_v16, %v4705_v30 }
 0x291   :  { %v2170_v55 = vsel %vm2161_vm5, %v2153_v14, %v1988_v56  ;;  %v2091_v14 = vsel %vm2077_vm13, %v2075_v54, %v5903_v61 }
 0x292   :  { %3280 = vmatmul.msk.f32.gmra.mxu0 %vm2204_vm6, %v2186_v17  ;;  %v2187_v33 = vsel %vm2178_vm4, %v2170_v55, %v2033_v25  ;;  %v5896_v25 = vld [vmem:[#allocation17_spill] sm:$0xff]  ;;  %v2108_v55 = vsel %vm2093_vm14, %v2091_v14, %v5904_v12 }
 0x293   :  { %v2074_v3 = vsel %vm2061_vm12, %v5896_v25, %v5895_v34  ;;  %v1953_v56 = vpop.permute.xlu0 %1952  ;;  %v5897_v17 = vld [vmem:[#allocation37_spill] sm:$0xff] }
 0x294   :  { %v2090_v49 = vsel %vm2077_vm13, %v2074_v3, %v5897_v17  ;;  %v2045_v10 = vpop.permute.xlu2 %2044 }
 0x295   :  { %v2107_v13 = vsel %vm2093_vm14, %v2090_v49, %v5898_v41 }
 0x296   :  { %v2124_v37 = vsel %vm2110_vm2, %v2107_v13, %v5899_v38 }
 0x297   :  { %v2141_v43 = vsel %vm2127_vm15, %v2124_v37, %v5900_v39 }
 0x298   :  { %v2037_v27 = vpop.permute.xlu1 %2036  ;;  %v2158_v45 = vsel %vm2144_vm3, %v2141_v43, %v1953_v56 }
 0x299   :  { %v2189_v18 = vsel %vm2178_vm4, %v2172_v9, %v2037_v27  ;;  %v5905_v9 = vld [vmem:[#allocation45_spill] sm:$0xff] }
 0x29a   :  { %3281 = vmatmul.msk.f32.gmra.mxu0 %vm2204_vm6, %v2187_v33  ;;  %3283 = vmatmul.msk.f32.gmra.mxu3 %vm2204_vm6, %v2189_v18  ;;  %v2125_v27 = vsel %vm2110_vm2, %v2108_v55, %v5905_v9  ;;  %v5906_v18 = vld [vmem:[#allocation55_spill] sm:$0xff] }
 0x29b   :  { %v1955_v40 = vpop.permute.xlu0 %1954  ;;  %v2142_v22 = vsel %vm2127_vm15, %v2125_v27, %v5906_v18 }
 0x29c   :  { %v2159_v32 = vsel %vm2144_vm3, %v2142_v22, %v1955_v40 }
 0x2a0   :  { %v1996_v11 = vpop.permute.xlu1 %1995 }
 0x2a1   :  { %v2174_v8 = vsel %vm2161_vm5, %v2157_v29, %v1996_v11  ;;  %v2194_v11 = vsel %vm2178_vm4, %v2177_v48, %v4759_v2 }
 0x2a2   :  { %3284 = vmatmul.msk.f32.gmra.mxu3 %vm2204_vm6, %v2190_v44  ;;  %v2191_v52 = vsel %vm2178_vm4, %v2174_v8, %v2041_v26 }
 0x2a8   :  { %v1998_v6 = vpop.permute.xlu1 %1997 }
 0x2a9   :  { %v2175_v63 = vsel %vm2161_vm5, %v2158_v45, %v1998_v6 }
 0x2aa   :  { %3285 = vmatmul.msk.f32.gmra.mxu3 %vm2204_vm6, %v2191_v52  ;;  %v2192_v4 = vsel %vm2178_vm4, %v2175_v63, %v2043_v35 }
 0x2b0   :  { %v2000_v33 = vpop.permute.xlu1 %1999 }
 0x2b1   :  { %v2176_v57 = vsel %vm2161_vm5, %v2159_v32, %v2000_v33 }
 0x2b2   :  { %3286 = vmatmul.msk.f32.gmra.mxu3 %vm2204_vm6, %v2192_v4  ;;  %v2193_v47 = vsel %vm2178_vm4, %v2176_v57, %v2045_v10 }
 0x2ba   :  { %3287 = vmatmul.msk.f32.gmra.mxu3 %vm2204_vm6, %v2193_v47 }
 0x2c2   :  { %3288 = vmatmul.msk.f32.gmra.mxu3 %vm2204_vm6, %v2194_v11 }
 0x2d7   :  { %v2274_v15 = vpop.f32.mrf.mxu0 }
 0x2d8   :  { %v2275_v44 = vadd.f32 %v4892_v59, %v2274_v15 }
 0x2da   :  { %vm2322_vm7 = vcmp.gt.f32.partialorder %v2275_v44, 0.0  ;;  %v2338_v36 = vmul.f32 0.01, %v2275_v44 }
 0x2dc   :  { %v2354_v0 = vsel %vm2322_vm7, %v2275_v44, %v2338_v36 }
 0x2dd   :  { %v2386_v21 = vrot.slane %v2354_v0, 7 }
 0x2df   :  { %v4896_v26 = vsel %vm1519_vm0, 0.0, %v2386_v21  ;;  %v2277_v30 = vpop.f32.mrf.mxu0  ;;  %v4899_v2 = vsel %vm1519_vm0, %v2386_v21, 0.0 }
 0x2e0   :  { %v2278_v58 = vadd.f32 %v4892_v59, %v2277_v30  ;;  %v2478_v20 = vrot.slane %v4896_v26, 1  ;;  %v2479_v51 = vrot.slane %v4899_v2, 1 }
 0x2e2   :  { %vm2323_vm8 = vcmp.gt.f32.partialorder %v2278_v58, 0.0  ;;  %v2339_v50 = vmul.f32 0.01, %v2278_v58  ;;  %v4905_v29 = vsel %vm1584_vm1, %v2478_v20, %v2479_v51 }
 0x2e3   :  { %2522 = vrot.lane.b32.xlu0 %v4905_v29, %s3341_s10 }
 0x2e4   :  { %v2355_v8 = vsel %vm2323_vm8, %v2278_v58, %v2339_v50 }
 0x2e5   :  { %v2387_v34 = vrot.slane %v2355_v8, 7 }
 0x2e7   :  { %v4910_v25 = vsel %vm1519_vm0, 0.0, %v2387_v34  ;;  %v2280_v3 = vpop.f32.mrf.mxu0  ;;  %v4913_v56 = vsel %vm1519_vm0, %v2387_v34, 0.0 }
 0x2e8   :  { %v2281_v17 = vadd.f32 %v4892_v59, %v2280_v3  ;;  %v2481_v49 = vrot.slane %v4910_v25, 1  ;;  %v2482_v6 = vrot.slane %v4913_v56, 1 }
 0x2ea   :  { %vm2324_vm9 = vcmp.gt.f32.partialorder %v2281_v17, 0.0  ;;  %v2340_v52 = vmul.f32 0.01, %v2281_v17  ;;  %v4919_v41 = vsel %vm1584_vm1, %v2481_v49, %v2482_v6 }
 0x2eb   :  { %2524 = vrot.lane.b32.xlu1 %v4919_v41, %s3341_s10 }
 0x2ec   :  { %v2356_v13 = vsel %vm2324_vm9, %v2281_v17, %v2340_v52 }
 0x2ed   :  { %v2388_v38 = vrot.slane %v2356_v13, 7 }
 0x2ef   :  { %v4924_v37 = vsel %vm1519_vm0, 0.0, %v2388_v38  ;;  %v2283_v39 = vpop.f32.mrf.mxu0  ;;  %v4927_v43 = vsel %vm1519_vm0, %v2388_v38, 0.0 }
 0x2f0   :  { %v2284_v35 = vadd.f32 %v4892_v59, %v2283_v39  ;;  %v2484_v45 = vrot.slane %v4924_v37, 1  ;;  %v2485_v63 = vrot.slane %v4927_v43, 1 }
 0x2f2   :  { %vm2325_vm11 = vcmp.gt.f32.partialorder %v2284_v35, 0.0  ;;  %v2341_v62 = vmul.f32 0.01, %v2284_v35  ;;  %v4933_v19 = vsel %vm1584_vm1, %v2484_v45, %v2485_v63 }
 0x2f3   :  { %2526 = vrot.lane.b32.xlu2 %v4933_v19, %s3341_s10 }
 0x2f4   :  { %v2357_v54 = vsel %vm2325_vm11, %v2284_v35, %v2341_v62 }
 0x2f5   :  { %v2389_v61 = vrot.slane %v2357_v54, 7 }
 0x2f7   :  { %v4938_v14 = vsel %vm1519_vm0, 0.0, %v2389_v61  ;;  %v2286_v4 = vpop.f32.mrf.mxu0  ;;  %v4941_v12 = vsel %vm1519_vm0, %v2389_v61, 0.0 }
 0x2f8   :  { %v2287_v55 = vadd.f32 %v4892_v59, %v2286_v4  ;;  %v2487_v40 = vrot.slane %v4938_v14, 1  ;;  %v2488_v9 = vrot.slane %v4941_v12, 1 }
 0x2fa   :  { %vm2326_vm12 = vcmp.gt.f32.partialorder %v2287_v55, 0.0  ;;  %v2342_v27 = vmul.f32 0.01, %v2287_v55  ;;  %v4947_v33 = vsel %vm1584_vm1, %v2487_v40, %v2488_v9 }
 0x2fb   :  { %2528 = vrot.lane.b32.xlu0 %v4947_v33, %s3341_s10 }
 0x2fc   :  { %v2358_v18 = vsel %vm2326_vm12, %v2287_v55, %v2342_v27 }
 0x2fd   :  { %v2390_v22 = vrot.slane %v2358_v18, 7 }
 0x2ff   :  { %v4952_v32 = vsel %vm1519_vm0, 0.0, %v2390_v22  ;;  %v2289_v57 = vpop.f32.mrf.mxu0  ;;  %v4955_v10 = vsel %vm1519_vm0, %v2390_v22, 0.0 }
 0x300   :  { %v2290_v47 = vadd.f32 %v4892_v59, %v2289_v57  ;;  %v2490_v1 = vrot.slane %v4952_v32, 1  ;;  %v2491_v53 = vrot.slane %v4955_v10, 1  ;;  %v2301_v28 = vpop.f32.mrf.mxu3 }
 0x301   :  { %v2302_v23 = vadd.f32 %v4892_v59, %v2301_v28 }
 0x302   :  { %vm2327_vm14 = vcmp.gt.f32.partialorder %v2290_v47, 0.0  ;;  %v2343_v46 = vmul.f32 0.01, %v2290_v47  ;;  %v4962_v24 = vsel %vm1584_vm1, %v2490_v1, %v2491_v53 }
 0x303   :  { %2530 = vrot.lane.b32.xlu1 %v4962_v24, %s3341_s10  ;;  %vm2331_vm15 = vcmp.gt.f32.partialorder %v2302_v23, 0.0  ;;  %v2347_v42 = vmul.f32 0.01, %v2302_v23 }
 0x304   :  { %v2359_v60 = vsel %vm2327_vm14, %v2290_v47, %v2343_v46 }
 0x305   :  { %v2391_v31 = vrot.slane %v2359_v60, 7  ;;  %v2363_v5 = vsel %vm2331_vm15, %v2302_v23, %v2347_v42  ;;  %vm3026_vm15 = vcmask 392192  }
 0x306   :  { %v2395_v7 = vrot.slane %v2363_v5, 7 }
 0x307   :  { %v4967_v16 = vsel %vm1519_vm0, 0.0, %v2391_v31  ;;  %v2292_v48 = vpop.f32.mrf.mxu0  ;;  %v4970_v11 = vsel %vm1519_vm0, %v2391_v31, 0.0 }
 0x308   :  { %v2293_v15 = vadd.f32 %v4892_v59, %v2292_v48  ;;  %v2493_v44 = vrot.slane %v4967_v16, 1  ;;  %v2494_v36 = vrot.slane %v4970_v11, 1  ;;  %v4976_v0 = vsel %vm1519_vm0, 0.0, %v2395_v7 }
 0x309   :  { %v4979_v21 = vsel %vm1519_vm0, %v2395_v7, 0.0  ;;  %v2502_v51 = vrot.slane %v4976_v0, 1 }
 0x30a   :  { %vm2328_vm5 = vcmp.gt.f32.partialorder %v2293_v15, 0.0  ;;  %v2344_v30 = vmul.f32 0.01, %v2293_v15  ;;  %v4982_v58 = vsel %vm1584_vm1, %v2493_v44, %v2494_v36  ;;  %v2503_v50 = vrot.slane %v4979_v21, 1 }
 0x30b   :  { %2532 = vrot.lane.b32.xlu2 %v4982_v58, %s3341_s10 }
 0x30c   :  { %v2360_v20 = vsel %vm2328_vm5, %v2293_v15, %v2344_v30  ;;  %v4997_v6 = vsel %vm1584_vm1, %v2502_v51, %v2503_v50  ;;  %vm3043_vm5 = vcmask 457728  }
 0x30d   :  { %v2392_v8 = vrot.slane %v2360_v20, 7 }
 0x30f   :  { %v4989_v34 = vsel %vm1519_vm0, 0.0, %v2392_v8  ;;  %v4992_v3 = vsel %vm1519_vm0, %v2392_v8, 0.0  ;;  %v5006_v13 = vpop.f32.mrf.mxu0 }
 0x310   :  { %v2496_v17 = vrot.slane %v4989_v34, 1  ;;  %v2497_v49 = vrot.slane %v4992_v3, 1 }
 0x312   :  { %v5000_v52 = vsel %vm1584_vm1, %v2496_v17, %v2497_v49 }
 0x313   :  { %2534 = vrot.lane.b32.xlu0 %v5000_v52, %s3341_s10  ;;  %2538 = vrot.lane.b32.xlu2 %v4997_v6, %s3341_s10 }
 0x317   :  { %v2298_v35 = vpop.f32.mrf.mxu0 }
 0x318   :  { %v2299_v63 = vadd.f32 %v4892_v59, %v2298_v35 }
 0x31a   :  { %v2346_v40 = vmul.f32 0.01, %v2299_v63  ;;  %vm2330_vm7 = vcmp.gt.f32.partialorder %v2299_v63, 0.0 }
 0x31c   :  { %v2362_v47 = vsel %vm2330_vm7, %v2299_v63, %v2346_v40  ;;  %vm3090_vm7 = vcmask 588800  }
 0x31d   :  { %v2304_v38 = vpop.f32.mrf.mxu3  ;;  %v2394_v28 = vrot.slane %v2362_v47, 7 }
 0x31e   :  { %v2305_v39 = vadd.f32 %v4892_v59, %v2304_v38 }
 0x31f   :  { %v5037_v15 = vsel %vm1519_vm0, 0.0, %v2394_v28  ;;  %v5042_v44 = vsel %vm1519_vm0, %v2394_v28, 0.0 }
 0x320   :  { %vm2332_vm6 = vcmp.gt.f32.partialorder %v2305_v39, 0.0  ;;  %v2348_v45 = vmul.f32 0.01, %v2305_v39  ;;  %v2499_v20 = vrot.slane %v5037_v15, 1  ;;  %v2500_v51 = vrot.slane %v5042_v44, 1 }
 0x322   :  { %v2364_v62 = vsel %vm2332_vm6, %v2305_v39, %v2348_v45  ;;  %v5059_v63 = vsel %vm1584_vm1, %v2499_v20, %v2500_v51  ;;  %vm3060_vm6 = vcmask 523264  }
 0x323   :  { %v2396_v54 = vrot.slane %v2364_v62, 7 }
 0x325   :  { %v5011_v61 = vsel %vm1519_vm0, 0.0, %v2396_v54  ;;  %v2307_v4 = vpop.f32.mrf.mxu3  ;;  %v5014_v55 = vsel %vm1519_vm0, %v2396_v54, 0.0 }
 0x326   :  { %v2308_v9 = vadd.f32 %v4892_v59, %v2307_v4  ;;  %v2505_v27 = vrot.slane %v5011_v61, 1  ;;  %v2506_v18 = vrot.slane %v5014_v55, 1 }
 0x328   :  { %vm2333_vm8 = vcmp.gt.f32.partialorder %v2308_v9, 0.0  ;;  %v2349_v22 = vmul.f32 0.01, %v2308_v9  ;;  %v5020_v57 = vsel %vm1584_vm1, %v2505_v27, %v2506_v18 }
 0x329   :  { %2540 = vrot.lane.b32.xlu0 %v5020_v57, %s3341_s10 }
 0x32a   :  { %v2365_v1 = vsel %vm2333_vm8, %v2308_v9, %v2349_v22 }
 0x32b   :  { %v2397_v53 = vrot.slane %v2365_v1, 7 }
 0x32d   :  { %v5025_v23 = vsel %vm1519_vm0, 0.0, %v2397_v53  ;;  %v2310_v46 = vpop.f32.mrf.mxu3  ;;  %v5028_v42 = vsel %vm1519_vm0, %v2397_v53, 0.0  ;;  %v5913_v53 = vld [vmem:[#allocation20_spill] sm:$0xff] }
 0x32e   :  { %v2311_v60 = vadd.f32 %v4892_v59, %v2310_v46  ;;  %v2508_v31 = vrot.slane %v5025_v23, 1  ;;  %v2509_v5 = vrot.slane %v5028_v42, 1 }
 0x330   :  { %vm2334_vm9 = vcmp.gt.f32.partialorder %v2311_v60, 0.0  ;;  %v2350_v7 = vmul.f32 0.01, %v2311_v60  ;;  %v5034_v48 = vsel %vm1584_vm1, %v2508_v31, %v2509_v5  ;;  %v2572_v31 = vrot.slane %v4927_v43, 2 }
 0x331   :  { %2542 = vrot.lane.b32.xlu1 %v5034_v48, %s3341_s10 }
 0x332   :  { %v2366_v36 = vsel %vm2334_vm9, %v2311_v60, %v2350_v7  ;;  %v2571_v60 = vrot.slane %v4924_v37, 2 }
 0x333   :  { %v2398_v30 = vrot.slane %v2366_v36, 7  ;;  %v2565_v36 = vrot.slane %v4896_v26, 2 }
 0x335   :  { %v5047_v50 = vsel %vm1519_vm0, 0.0, %v2398_v30  ;;  %v2313_v8 = vpop.f32.mrf.mxu3  ;;  %v5050_v17 = vsel %vm1519_vm0, %v2398_v30, 0.0  ;;  %v2566_v30 = vrot.slane %v4899_v2, 2  ;;  %v2580_v2 = vrot.slane %v4967_v16, 2 }
 0x336   :  { %v2314_v49 = vadd.f32 %v4892_v59, %v2313_v8  ;;  %v2511_v38 = vrot.slane %v5047_v50, 1  ;;  %v2512_v39 = vrot.slane %v5050_v17, 1  ;;  %v5091_v8 = vsel %vm1675_vm10, %v2571_v60, %v2572_v31 }
 0x337   :  { %v5101_v43 = vsel %vm1675_vm10, %v2565_v36, %v2566_v30  ;;  %v2586_v31 = vrot.slane %v5037_v15, 2  ;;  %v2587_v36 = vrot.slane %v5042_v44, 2  ;;  %v2592_v30 = vrot.slane %v5011_v61, 2 }
 0x338   :  { %vm2335_vm11 = vcmp.gt.f32.partialorder %v2314_v49, 0.0  ;;  %v2351_v35 = vmul.f32 0.01, %v2314_v49  ;;  %v5056_v45 = vsel %vm1584_vm1, %v2511_v38, %v2512_v39  ;;  %v2581_v38 = vrot.slane %v4970_v11, 2 }
 0x339   :  { %2544 = vrot.lane.b32.xlu2 %v5056_v45, %s3341_s10  ;;  %2536 = vrot.lane.b32.xlu1 %v5059_v63, %s3341_s10  ;;  %v2568_v39 = vrot.slane %v4910_v25, 2  ;;  %v2595_v44 = vrot.slane %v5025_v23, 2 }
 0x33a   :  { %v2367_v62 = vsel %vm2335_vm11, %v2314_v49, %v2351_v35  ;;  %v2569_v35 = vrot.slane %v4913_v56, 2  ;;  %v2589_v56 = vrot.slane %v4976_v0, 2 }
 0x33b   :  { %v2399_v54 = vrot.slane %v2367_v62, 7  ;;  %v2574_v62 = vrot.slane %v4938_v14, 2 }
 0x33d   :  { %v5066_v4 = vsel %vm1519_vm0, 0.0, %v2399_v54  ;;  %v2316_v40 = vpop.f32.mrf.mxu3  ;;  %v5069_v9 = vsel %vm1519_vm0, %v2399_v54, 0.0  ;;  %v2575_v54 = vrot.slane %v4941_v12, 2  ;;  %v2590_v12 = vrot.slane %v4979_v21, 2 }
 0x33e   :  { %v2317_v27 = vadd.f32 %v4892_v59, %v2316_v40  ;;  %v2514_v18 = vrot.slane %v5066_v4, 1  ;;  %v2515_v22 = vrot.slane %v5069_v9, 1  ;;  %v5112_v40 = vsel %vm1675_vm10, %v2580_v2, %v2581_v38 }
 0x33f   :  { %v5122_v11 = vsel %vm1675_vm10, %v2574_v62, %v2575_v54  ;;  %v2588_v2 = vsel %vm1675_vm10, %v2586_v31, %v2587_v36  ;;  %v2601_v38 = vrot.slane %v5066_v4, 2 }
 0x340   :  { %vm2336_vm12 = vcmp.gt.f32.partialorder %v2317_v27, 0.0  ;;  %v2352_v47 = vmul.f32 0.01, %v2317_v27  ;;  %v5075_v1 = vsel %vm1584_vm1, %v2514_v18, %v2515_v22  ;;  %v2577_v18 = vrot.slane %v4952_v32, 2 }
 0x341   :  { %2607 = vrot.lane.b32.xlu2 %v5913_v53, %s3343_s0  ;;  %2546 = vrot.lane.b32.xlu0 %v5075_v1, %s3341_s10  ;;  %v2578_v22 = vrot.slane %v4955_v10, 2  ;;  %v2598_v10 = vrot.slane %v5047_v50, 2 }
 0x342   :  { %v2368_v28 = vsel %vm2336_vm12, %v2317_v27, %v2352_v47  ;;  %v5115_v27 = vsel %vm1675_vm10, %v2568_v39, %v2569_v35  ;;  %v2583_v47 = vrot.slane %v4989_v34, 2  ;;  %v2602_v39 = vrot.slane %v5069_v9, 2 }
 0x343   :  { %v2400_v46 = vrot.slane %v2368_v28, 7  ;;  %v2584_v28 = vrot.slane %v4992_v3, 2  ;;  %v5136_v60 = vsel %vm1675_vm10, %v2577_v18, %v2578_v22  ;;  %v2599_v3 = vrot.slane %v5050_v17, 2 }
 0x344   :  { %v5177_v62 = vsel %vm1675_vm10, %v2601_v38, %v2602_v39 }
 0x345   :  { %v5084_v5 = vsel %vm1519_vm0, 0.0, %v2400_v46  ;;  %v2448_v7 = vsel %vm1519_vm0, %v2400_v46, 0.0  ;;  %v5133_v46 = vsel %vm1675_vm10, %v2589_v56, %v2590_v12  ;;  %v5143_v21 = vsel %vm1675_vm10, %v2583_v47, %v2584_v28 }
 0x346   :  { %v2517_v20 = vrot.slane %v5084_v5, 1  ;;  %v2518_v51 = vrot.slane %v2448_v7, 1  ;;  %v2605_v54 = vrot.slane %v2448_v7, 2  ;;  %v2296_v56 = vadd.f32 %v4892_v59, %v5006_v13 }
 0x348   :  { %v5094_v49 = vsel %vm1584_vm1, %v2517_v20, %v2518_v51  ;;  %v2593_v20 = vrot.slane %v5014_v55, 2  ;;  %v5154_v51 = vsel %vm1675_vm10, %v2598_v10, %v2599_v3  ;;  %v2596_v55 = vrot.slane %v5028_v42, 2 }
 0x349   :  { %2613 = vrot.lane.b32.xlu2 %v5091_v8, %s3343_s0  ;;  %2548 = vrot.lane.b32.xlu1 %v5094_v49, %s3341_s10  ;;  %v2604_v42 = vrot.slane %v5084_v5, 2  ;;  %v2345_v12 = vmul.f32 0.01, %v2296_v56  ;;  %vm2329_vm14 = vcmp.gt.f32.partialorder %v2296_v56, 0.0  ;;  %s3349_s10 = smov 64  }
 0x34a   :  { %2609 = vrot.lane.b32.xlu0 %v5101_v43, %s3343_s0  ;;  %v5161_v17 = vsel %vm1675_vm10, %v2592_v30, %v2593_v20  ;;  %v5170_v35 = vsel %vm1675_vm10, %v2595_v44, %v2596_v55 }
 0x34b   :  { %v5183_v9 = vsel %vm1675_vm10, %v2604_v42, %v2605_v54  ;;  %v5197_v7 = vsel %vm2329_vm14, %v2296_v56, %v2345_v12 }
 0x34c   :  { %v2393_v22 = vrot.slane %v5197_v7, 7 }
 0x34d   :  { %v2527_v18 = vpop.permute.xlu2 %2526 }
 0x34e   :  { %v5209_v13 = vsel %vm1519_vm0, 0.0, %v2393_v22 }
 0x351   :  { %2619 = vrot.lane.b32.xlu2 %v5112_v40, %s3343_s0  ;;  %2611 = vrot.lane.b32.xlu1 %v5115_v27, %s3343_s0 }
 0x352   :  { %2615 = vrot.lane.b32.xlu0 %v5122_v11, %s3343_s0 }
 0x355   :  { %v2523_v10 = vpop.permute.xlu0 %2522 }
 0x359   :  { %2625 = vrot.lane.b32.xlu2 %v5133_v46, %s3343_s0  ;;  %2617 = vrot.lane.b32.xlu1 %v5136_v60, %s3343_s0 }
 0x35a   :  { %2621 = vrot.lane.b32.xlu0 %v5143_v21, %s3343_s0 }
 0x35d   :  { %v2525_v31 = vpop.permute.xlu1 %2524 }
 0x361   :  { %2631 = vrot.lane.b32.xlu2 %v5154_v51, %s3343_s0  ;;  %2623 = vrot.lane.b32.xlu1 %v2588_v2, %s3343_s0 }
 0x362   :  { %2627 = vrot.lane.b32.xlu0 %v5161_v17, %s3343_s0 }
 0x365   :  { %v2533_v47 = vpop.permute.xlu2 %2532 }
 0x369   :  { %2629 = vrot.lane.b32.xlu1 %v5170_v35, %s3343_s0  ;;  %2654 = vrot.lane.b32.xlu2 %v4896_v26, %s3345_s29 }
 0x36a   :  { %2633 = vrot.lane.b32.xlu0 %v5177_v62, %s3343_s0 }
 0x36d   :  { %v2539_v28 = vpop.permute.xlu2 %2538  ;;  %v2529_v36 = vpop.permute.xlu0 %2528 }
 0x371   :  { %2635 = vrot.lane.b32.xlu1 %v5183_v9, %s3343_s0  ;;  %2660 = vrot.lane.b32.xlu2 %v4938_v14, %s3345_s29 }
 0x372   :  { %2656 = vrot.lane.b32.xlu0 %v4910_v25, %s3345_s29 }
 0x375   :  { %v2531_v20 = vpop.permute.xlu1 %2530 }
 0x379   :  { %2658 = vrot.lane.b32.xlu1 %v4924_v37, %s3345_s29  ;;  %2666 = vrot.lane.b32.xlu2 %v4989_v34, %s3345_s29 }
 0x37a   :  { %2662 = vrot.lane.b32.xlu0 %v4952_v32, %s3345_s29 }
 0x381   :  { %2664 = vrot.lane.b32.xlu1 %v4967_v16, %s3345_s29  ;;  %2672 = vrot.lane.b32.xlu2 %v4976_v0, %s3345_s29 }
 0x382   :  { %2668 = vrot.lane.b32.xlu0 %v5209_v13, %s3345_s29 }
 0x389   :  { %2670 = vrot.lane.b32.xlu1 %v5037_v15, %s3345_s29  ;;  %2678 = vrot.lane.b32.xlu2 %v5047_v50, %s3345_s29 }
 0x38a   :  { %2674 = vrot.lane.b32.xlu0 %v5011_v61, %s3345_s29 }
 0x391   :  { %2676 = vrot.lane.b32.xlu1 %v5025_v23, %s3345_s29  ;;  %2780 = vrot.lane.b32.xlu2 %v2588_v2, %s3348_s2  ;;  %v2535_v2 = vpop.permute.xlu0 %2534 }
 0x392   :  { %2680 = vrot.lane.b32.xlu0 %v5066_v4, %s3345_s29 }
 0x393   :  { %v2545_v3 = vpop.permute.xlu2 %2544 }
 0x399   :  { %2726 = vrot.lane.b32.xlu1 %v5059_v63, %s3347_s6  ;;  %2918 = vrot.lane.b32.xlu2 %v5133_v46, %s3349_s10  ;;  %v2950_v63 = vsel %vm2077_vm13, %v4924_v37, %v2527_v18 }
 0x39a   :  { %2828 = vrot.lane.b32.xlu0 %v4976_v0, %s3350_s18 }
 0x39b   :  { %v2608_v30 = vpop.permute.xlu2 %2607 }
 0x3a1   :  { %2873 = vrot.lane.b32.xlu1 %v4997_v6, %s3351_s19  ;;  %2728 = vrot.lane.b32.xlu2 %v4997_v6, %s3347_s6  ;;  %v2541_v6 = vpop.permute.xlu0 %2540 }
 0x3a2   :  { %2710 = vrot.lane.b32.xlu0 %v4905_v29, %s3347_s6  ;;  %v2953_v29 = vsel %vm2077_vm13, %v4967_v16, %v2533_v47 }
 0x3a3   :  { %v2614_v44 = vpop.permute.xlu2 %2613  ;;  %v5239_v38 = vpop.permute.xlu1 %2542 }
 0x3a4   :  { %v2965_v55 = vsel %vm2110_vm2, %v2950_v63, %v2614_v44 }
 0x3a9   :  { %2857 = vrot.lane.b32.xlu2 %v4919_v41, %s3351_s19  ;;  %2764 = vrot.lane.b32.xlu1 %v5101_v43, %s3348_s2  ;;  %v2956_v43 = vsel %vm2077_vm13, %v4976_v0, %v2539_v28  ;;  %v2948_v0 = vsel %vm2077_vm13, %v4896_v26, %v2523_v10  ;;  %v2949_v26 = vsel %vm2077_vm13, %v4910_v25, %v2525_v31 }
 0x3aa   :  { %2812 = vrot.lane.b32.xlu0 %v4910_v25, %s3350_s18  ;;  %v2952_v25 = vsel %vm2077_vm13, %v4952_v32, %v2531_v20 }
 0x3ab   :  { %v2620_v39 = vpop.permute.xlu2 %2619  ;;  %v2537_v54 = vpop.permute.xlu1 %2536 }
 0x3ac   :  { %v2968_v42 = vsel %vm2110_vm2, %v2953_v29, %v2620_v39  ;;  %v5914_v39 = vld [vmem:[#allocation5_spill] sm:$0xff]  ;;  %v2955_v20 = vsel %vm2077_vm13, %v5037_v15, %v2537_v54 }
 0x3b1   :  { %2875 = vrot.lane.b32.xlu2 %v5020_v57, %s3351_s19  ;;  %2782 = vrot.lane.b32.xlu1 %v5133_v46, %s3348_s2  ;;  %v2959_v46 = vsel %vm2077_vm13, %v5047_v50, %v2545_v3 }
 0x3b2   :  { %2830 = vrot.lane.b32.xlu0 %v5011_v61, %s3350_s18 }
 0x3b3   :  { %v2626_v56 = vpop.permute.xlu2 %2625  ;;  %v2547_v12 = vpop.permute.xlu0 %2546 }
 0x3b4   :  { %v5259_v18 = vsel %vm2110_vm2, %v2956_v43, %v2626_v56  ;;  %v3336_v43 = vunpack.i.h.bf16 %v5914_v39 }
 0x3b9   :  { %2766 = vrot.lane.b32.xlu2 %v5115_v27, %s3348_s2  ;;  %2902 = vrot.lane.b32.xlu1 %v5115_v27, %s3349_s10  ;;  %v5915_v27 = vld [vmem:[#allocation2_spill] sm:$0xff] }
 0x3ba   :  { %2920 = vrot.lane.b32.xlu0 %v5161_v17, %s3349_s10  ;;  %v2947_v3 = vsel %vm2077_vm13, %v5915_v27, %v3336_v43 }
 0x3bb   :  { %v2632_v47 = vpop.permute.xlu2 %2631  ;;  %v2549_v63 = vpop.permute.xlu1 %2548  ;;  %v5287_v10 = vsel %vm2110_vm2, %v2947_v3, %v2608_v30  ;;  %v2954_v30 = vsel %vm2077_vm13, %v4989_v34, %v2535_v2 }
 0x3bc   :  { %v5272_v28 = vsel %vm2110_vm2, %v2959_v46, %v2632_v47  ;;  %v2610_v44 = vpop.permute.xlu0 %2609 }
 0x3bd   :  { %v2963_v29 = vsel %vm2110_vm2, %v2948_v0, %v2610_v44 }
 0x3c1   :  { %2784 = vrot.lane.b32.xlu2 %v5161_v17, %s3348_s2  ;;  %2712 = vrot.lane.b32.xlu1 %v4919_v41, %s3347_s6  ;;  %v2951_v17 = vsel %vm2077_vm13, %v4938_v14, %v2529_v36 }
 0x3c2   :  { %2730 = vrot.lane.b32.xlu0 %v5020_v57, %s3347_s6 }
 0x3c3   :  { %v2612_v56 = vpop.permute.xlu1 %2611  ;;  %v2655_v46 = vpop.permute.xlu2 %2654 }
 0x3c4   :  { %v5292_v47 = vsel %vm2110_vm2, %v2949_v26, %v2612_v56  ;;  %v5296_v41 = vsel %vm2144_vm3, %v5287_v10, %v2655_v46  ;;  %v2616_v0 = vpop.permute.xlu0 %2615 }
 0x3c5   :  { %v5299_v57 = vsel %vm2110_vm2, %v2951_v17, %v2616_v0 }
 0x3c9   :  { %2904 = vrot.lane.b32.xlu2 %v5091_v8, %s3349_s10  ;;  %2814 = vrot.lane.b32.xlu1 %v4924_v37, %s3350_s18 }
 0x3ca   :  { %2859 = vrot.lane.b32.xlu0 %v4933_v19, %s3351_s19 }
 0x3cb   :  { %v2618_v31 = vpop.permute.xlu1 %2617  ;;  %v2661_v36 = vpop.permute.xlu2 %2660 }
 0x3cc   :  { %v5312_v44 = vsel %vm2110_vm2, %v2952_v25, %v2618_v31  ;;  %v5315_v39 = vsel %vm2144_vm3, %v2965_v55, %v2661_v36  ;;  %v2622_v43 = vpop.permute.xlu0 %2621  ;;  %v2957_v55 = vsel %vm2077_vm13, %v5011_v61, %v2541_v6  ;;  %v2958_v61 = vsel %vm2077_vm13, %v5025_v23, %v5239_v38 }
 0x3cd   :  { %v5318_v37 = vsel %vm2110_vm2, %v2954_v30, %v2622_v43 }
 0x3d1   :  { %2714 = vrot.lane.b32.xlu2 %v4933_v19, %s3347_s6  ;;  %2832 = vrot.lane.b32.xlu1 %v5025_v23, %s3350_s18  ;;  %v2961_v23 = vsel %vm2077_vm13, %v5084_v5, %v2549_v63  ;;  %v3083_v63 = vld [vmem:[%s5737_s3 + $0x30] sm:$0xff] }
 0x3d2   :  { %2877 = vrot.lane.b32.xlu0 %v5034_v48, %s3351_s19 }
 0x3d3   :  { %v2624_v2 = vpop.permute.xlu1 %2623  ;;  %v2667_v3 = vpop.permute.xlu2 %2666 }
 0x3d4   :  { %v5331_v26 = vsel %vm2110_vm2, %v2955_v20, %v2624_v2  ;;  %v5334_v56 = vsel %vm2144_vm3, %v2968_v42, %v2667_v3  ;;  %v2628_v19 = vpop.permute.xlu0 %2627  ;;  %v2960_v42 = vsel %vm2077_vm13, %v5066_v4, %v2547_v12  ;;  %v3081_v2 = vld [vmem:[%s5737_s3 + $0x20] sm:$0xff]  ;;  %v3080_v3 = vld [vmem:[%s5737_s3 + $0x18] sm:$0xff] }
 0x3d5   :  { %v5337_v46 = vsel %vm2110_vm2, %v2957_v55, %v2628_v19 }
 0x3d9   :  { %2816 = vrot.lane.b32.xlu2 %v4938_v14, %s3350_s18  ;;  %2922 = vrot.lane.b32.xlu1 %v5170_v35, %s3349_s10 }
 0x3da   :  { %2768 = vrot.lane.b32.xlu0 %v5091_v8, %s3348_s2 }
 0x3db   :  { %v2630_v15 = vpop.permute.xlu1 %2629  ;;  %v5348_v6 = vpop.permute.xlu2 %2672 }
 0x3dc   :  { %v2973_v54 = vsel %vm2110_vm2, %v2958_v61, %v2630_v15  ;;  %v2634_v17 = vpop.permute.xlu0 %2633 }
 0x3dd   :  { %v5354_v14 = vsel %vm2110_vm2, %v2960_v42, %v2634_v17 }
 0x3e1   :  { %2834 = vrot.lane.b32.xlu2 %v5047_v50, %s3350_s18  ;;  %2732 = vrot.lane.b32.xlu1 %v5034_v48, %s3347_s6  ;;  %v3085_v48 = vld [vmem:[%s5737_s3 + $0x40] sm:$0xff] }
 0x3e2   :  { %2786 = vrot.lane.b32.xlu0 %v5170_v35, %s3348_s2  ;;  %v3084_v35 = vld [vmem:[%s5737_s3 + $0x38] sm:$0xff]  ;;  %3310 = vmatpush.msra.mxu2 %v3085_v48 }
 0x3e3   :  { %v2636_v8 = vpop.permute.xlu1 %2635  ;;  %v2679_v38 = vpop.permute.xlu2 %2678  ;;  %3146 = vmatpush.msra.mxu1 %v3085_v48 }
 0x3e4   :  { %v5365_v12 = vsel %vm2110_vm2, %v2961_v23, %v2636_v8  ;;  %v5368_v0 = vsel %vm2144_vm3, %v2973_v54, %v2679_v38  ;;  %v2657_v25 = vpop.permute.xlu0 %2656  ;;  %3311 = vmatpush.msra.mxu2 %v3084_v35  ;;  %vm3009_vm2 = vcmask 326656  }
 0x3e5   :  { %v5371_v50 = vsel %vm2144_vm3, %v2963_v29, %v2657_v25  ;;  %3147 = vmatpush.msra.mxu1 %v3084_v35  ;;  %v3082_v29 = vld [vmem:[%s5737_s3 + $0x28] sm:$0xff] }
 0x3e6   :  { %3312 = vmatpush.msra.mxu2 %v3083_v63 }
 0x3e7   :  { %3148 = vmatpush.msra.mxu1 %v3083_v63 }
 0x3e8   :  { %3313 = vmatpush.msra.mxu2 %v3082_v29 }
 0x3e9   :  { %2924 = vrot.lane.b32.xlu2 %v5154_v51, %s3349_s10  ;;  %2861 = vrot.lane.b32.xlu1 %v4947_v33, %s3351_s19 }
 0x3ea   :  { %2906 = vrot.lane.b32.xlu0 %v5122_v11, %s3349_s10  ;;  %3149 = vmatpush.msra.mxu1 %v3082_v29  ;;  %v2319_v29 = vpop.f32.mrf.mxu3 }
 0x3eb   :  { %v2659_v31 = vpop.permute.xlu1 %2658  ;;  %v2781_v36 = vpop.permute.xlu2 %2780  ;;  %3314 = vmatpush.msra.mxu2 %v3081_v2 }
 0x3ec   :  { %v5393_v30 = vsel %vm2144_vm3, %v5292_v47, %v2659_v31  ;;  %v2663_v43 = vpop.permute.xlu0 %2662  ;;  %v3079_v47 = vld [vmem:[%s5737_s3 + $0x10] sm:$0xff]  ;;  %3150 = vmatpush.msra.mxu1 %v3081_v2  ;;  %v2320_v31 = vadd.f32 %v4892_v59, %v2319_v29 }
 0x3ed   :  { %v5397_v20 = vsel %vm2144_vm3, %v5299_v57, %v2663_v43  ;;  %3315 = vmatpush.msra.mxu2 %v3080_v3  ;;  %v3078_v57 = vld [vmem:[%s5737_s3 + $0x8] sm:$0xff]  ;;  %v2986_v43 = vsel %vm2144_vm3, %v5331_v26, %v5348_v6 }
 0x3ee   :  { %3151 = vmatpush.msra.mxu1 %v3080_v3  ;;  %vm2337_vm8 = vcmp.gt.f32.partialorder %v2320_v31, 0.0 }
 0x3ef   :  { %3316 = vmatpush.msra.mxu2 %v3079_v47 }
 0x3f0   :  { %3152 = vmatpush.msra.mxu1 %v3079_v47 }
 0x3f1   :  { %2734 = vrot.lane.b32.xlu2 %v5056_v45, %s3347_s6  ;;  %2879 = vrot.lane.b32.xlu1 %v5056_v45, %s3351_s19 }
 0x3f2   :  { %2716 = vrot.lane.b32.xlu0 %v4947_v33, %s3347_s6  ;;  %3317 = vmatpush.msra.mxu2 %v3078_v57  ;;  %v3077_v33 = vld [vmem:[%s5737_s3] sm:$0xff] }
 0x3f3   :  { %v2665_v55 = vpop.permute.xlu1 %2664  ;;  %v2919_v19 = vpop.permute.xlu2 %2918  ;;  %3153 = vmatpush.msra.mxu1 %v3078_v57  ;;  %v2353_v57 = vmul.f32 0.01, %v2320_v31 }
 0x3f4   :  { %v5419_v61 = vsel %vm2144_vm3, %v5312_v44, %v2665_v55  ;;  %v2669_v15 = vpop.permute.xlu0 %2668  ;;  %3318 = vmatpush.msra.mxu2 %v3077_v33 }
 0x3f5   :  { %v5423_v45 = vsel %vm2144_vm3, %v5318_v37, %v2669_v15  ;;  %3154 = vmatpush.msra.mxu1 %v3077_v33 }
 0x3f9   :  { %2863 = vrot.lane.b32.xlu2 %v4962_v24, %s3351_s19  ;;  %2770 = vrot.lane.b32.xlu1 %v5122_v11, %s3348_s2 }
 0x3fa   :  { %2818 = vrot.lane.b32.xlu0 %v4952_v32, %s3350_s18 }
 0x3fb   :  { %v2671_v44 = vpop.permute.xlu1 %2670  ;;  %v2729_v37 = vpop.permute.xlu2 %2728 }
 0x3fc   :  { %v2675_v42 = vpop.permute.xlu0 %2674 }
 0x3fd   :  { %v5436_v54 = vsel %vm2144_vm3, %v5259_v18, %v2675_v42 }
 0x401   :  { %2881 = vrot.lane.b32.xlu2 %v5075_v1, %s3351_s19  ;;  %2788 = vrot.lane.b32.xlu1 %v5154_v51, %s3348_s2 }
 0x402   :  { %2836 = vrot.lane.b32.xlu0 %v5066_v4, %s3350_s18 }
 0x403   :  { %v2677_v11 = vpop.permute.xlu1 %2676  ;;  %v2858_v17 = vpop.permute.xlu2 %2857 }
 0x404   :  { %v5446_v32 = vsel %vm2144_vm3, %v5337_v46, %v2677_v11  ;;  %v2681_v23 = vpop.permute.xlu0 %2680  ;;  %v2985_v46 = vsel %vm2144_vm3, %v5287_v10, %v2671_v44 }
 0x405   :  { %v5450_v18 = vsel %vm2144_vm3, %v5272_v28, %v2681_v23 }
 0x409   :  { %2772 = vrot.lane.b32.xlu2 %v5136_v60, %s3348_s2  ;;  %2908 = vrot.lane.b32.xlu1 %v5136_v60, %s3349_s10 }
 0x40a   :  { %2926 = vrot.lane.b32.xlu0 %v5177_v62, %s3349_s10 }
 0x40b   :  { %v2727_v4 = vpop.permute.xlu1 %2726  ;;  %v2876_v51 = vpop.permute.xlu2 %2875 }
 0x40c   :  { %v2829_v8 = vpop.permute.xlu0 %2828  ;;  %v3001_v38 = vsel %vm2178_vm4, %v2985_v46, %v2727_v4 }
 0x40d   :  { %v3018_v28 = vsel %vm3009_vm2, %v3001_v38, %v2781_v36 }
 0x40e   :  { %v3035_v60 = vsel %vm3026_vm15, %v3018_v28, %v2829_v8 }
 0x411   :  { %2790 = vrot.lane.b32.xlu2 %v5177_v62, %s3348_s2  ;;  %2718 = vrot.lane.b32.xlu1 %v4962_v24, %s3347_s6 }
 0x412   :  { %2736 = vrot.lane.b32.xlu0 %v5075_v1, %s3347_s6 }
 0x413   :  { %v2874_v10 = vpop.permute.xlu1 %2873  ;;  %v2767_v25 = vpop.permute.xlu2 %2766 }
 0x414   :  { %v3052_v48 = vsel %vm3043_vm5, %v3035_v60, %v2874_v10  ;;  %v2711_v35 = vpop.permute.xlu0 %2710 }
 0x415   :  { %v3069_v63 = vsel %vm3060_vm6, %v3052_v48, %v2919_v19  ;;  %v2993_v2 = vsel %vm2178_vm4, %v5296_v41, %v2711_v35  ;;  %v2369_v41 = vsel %vm2337_vm8, %v2320_v31, %v2353_v57  ;;  %v2758_v57 = vrot.slane %v5209_v13, 2 }
 0x416   :  { %3297 = vmatmul.msk.f32.vlgmr.msra.gmra.mxu2 %vm3090_vm7, %v3069_v63  ;;  %v2401_v42 = vrot.slane %v2369_v41, 7 }
 0x418   :  { %v2433_v11 = vsel %vm1519_vm0, 0.0, %v2401_v42 }
 0x419   :  { %2910 = vrot.lane.b32.xlu2 %v5112_v40, %s3349_s10  ;;  %2820 = vrot.lane.b32.xlu1 %v4967_v16, %s3350_s18  ;;  %v2707_v4 = vrot.slane %v2433_v11, 1  ;;  %v2761_v48 = vrot.slane %v2433_v11, 2 }
 0x41a   :  { %2865 = vrot.lane.b32.xlu0 %v4982_v58, %s3351_s19 }
 0x41b   :  { %v5478_v24 = vpop.permute.xlu2 %2784  ;;  %v2765_v1 = vpop.permute.xlu1 %2764 }
 0x41c   :  { %v2813_v62 = vpop.permute.xlu0 %2812  ;;  %v3010_v47 = vsel %vm3009_vm2, %v2993_v2, %v2765_v1 }
 0x41d   :  { %v3027_v55 = vsel %vm3026_vm15, %v3010_v47, %v2813_v62 }
 0x41e   :  { %v3044_v6 = vsel %vm3043_vm5, %v3027_v55, %v2858_v17 }
 0x421   :  { %2720 = vrot.lane.b32.xlu2 %v4982_v58, %s3347_s6  ;;  %2838 = vrot.lane.b32.xlu1 %v5084_v5, %s3350_s18  ;;  %v3002_v58 = vsel %vm2178_vm4, %v2986_v43, %v2729_v37 }
 0x422   :  { %2883 = vrot.lane.b32.xlu0 %v5094_v49, %s3351_s19 }
 0x423   :  { %v2905_v16 = vpop.permute.xlu2 %2904  ;;  %v2783_v36 = vpop.permute.xlu1 %2782 }
 0x424   :  { %v2831_v3 = vpop.permute.xlu0 %2830  ;;  %v3019_v59 = vsel %vm3009_vm2, %v3002_v58, %v2783_v36 }
 0x425   :  { %v3036_v19 = vsel %vm3026_vm15, %v3019_v59, %v2831_v3 }
 0x426   :  { %v3053_v37 = vsel %vm3043_vm5, %v3036_v19, %v2876_v51 }
 0x429   :  { %2738 = vrot.lane.b32.xlu2 %v5094_v49, %s3347_s6  ;;  %2928 = vrot.lane.b32.xlu1 %v5183_v9, %s3349_s10 }
 0x42a   :  { %2682 = vrot.lane.b32.xlu0 %v5084_v5, %s3345_s29  ;;  %v2449_v5 = vsel %vm1519_vm0, %v2401_v42, 0.0 }
 0x42b   :  { %v2903_v26 = vpop.permute.xlu1 %2902  ;;  %v5504_v15 = vpop.permute.xlu2 %2714  ;;  %v2708_v51 = vrot.slane %v2449_v5, 1  ;;  %v2762_v35 = vrot.slane %v2449_v5, 2 }
 0x42c   :  { %v2921_v33 = vpop.permute.xlu0 %2920  ;;  %v3061_v44 = vsel %vm3060_vm6, %v3044_v6, %v2903_v26  ;;  %v2995_v7 = vsel %vm2178_vm4, %v5393_v30, %v5504_v15 }
 0x42d   :  { %3289 = vmatmul.msk.f32.vlgmr.msra.gmra.mxu1 %vm3090_vm7, %v3061_v44  ;;  %v3070_v49 = vsel %vm3060_vm6, %v3053_v37, %v2921_v33  ;;  %v2709_v38 = vsel %vm1584_vm1, %v2707_v4, %v2708_v51 }
 0x42e   :  { %3298 = vmatmul.msk.f32.gmra.mxu2 %vm3090_vm7, %v3070_v49 }
 0x431   :  { %2867 = vrot.lane.b32.xlu2 %v5000_v52, %s3351_s19  ;;  %2774 = vrot.lane.b32.xlu1 %v5112_v40, %s3348_s2 }
 0x432   :  { %2822 = vrot.lane.b32.xlu0 %v4989_v34, %s3350_s18 }
 0x433   :  { %v2713_v17 = vpop.permute.xlu1 %2712  ;;  %v2817_v46 = vpop.permute.xlu2 %2816 }
 0x434   :  { %v2731_v23 = vpop.permute.xlu0 %2730  ;;  %v2994_v8 = vsel %vm2178_vm4, %v5371_v50, %v2713_v17 }
 0x435   :  { %v3011_v34 = vsel %vm3009_vm2, %v2994_v8, %v2767_v25  ;;  %v3003_v1 = vsel %vm2178_vm4, %v5436_v54, %v2731_v23 }
 0x436   :  { %v3020_v29 = vsel %vm3009_vm2, %v3003_v1, %v5478_v24  ;;  %v2441_v24 = vsel %vm1519_vm0, %v2393_v22, 0.0 }
 0x437   :  { %v2705_v47 = vrot.slane %v2441_v24, 1  ;;  %v2759_v59 = vrot.slane %v2441_v24, 2 }
 0x439   :  { %2885 = vrot.lane.b32.xlu2 %v2709_v38, %s3351_s19  ;;  %2792 = vrot.lane.b32.xlu1 %v5183_v9, %s3348_s2  ;;  %v2763_v9 = vsel %vm1675_vm10, %v2761_v48, %v2762_v35 }
 0x43a   :  { %2840 = vrot.lane.b32.xlu0 %v2433_v11, %s3350_s18 }
 0x43b   :  { %v2815_v40 = vpop.permute.xlu1 %2814  ;;  %v2835_v63 = vpop.permute.xlu2 %2834 }
 0x43c   :  { %v3028_v28 = vsel %vm3026_vm15, %v3011_v34, %v2815_v40  ;;  %v2860_v60 = vpop.permute.xlu0 %2859 }
 0x43d   :  { %v3045_v10 = vsel %vm3043_vm5, %v3028_v28, %v2860_v60 }
 0x43e   :  { %v3062_v50 = vsel %vm3060_vm6, %v3045_v10, %v2905_v16 }
 0x43f   :  { %3290 = vmatmul.msk.f32.gmra.mxu1 %vm3090_vm7, %v3062_v50 }
 0x441   :  { %2684 = vrot.lane.b32.xlu2 %v2433_v11, %s3345_s29  ;;  %2912 = vrot.lane.b32.xlu1 %v5143_v21, %s3349_s10 }
 0x442   :  { %2930 = vrot.lane.b32.xlu0 %v2763_v9, %s3349_s10 }
 0x443   :  { %v2833_v25 = vpop.permute.xlu1 %2832  ;;  %v2925_v16 = vpop.permute.xlu2 %2924 }
 0x444   :  { %v2878_v62 = vpop.permute.xlu0 %2877  ;;  %v3037_v31 = vsel %vm3026_vm15, %v3020_v29, %v2833_v25 }
 0x445   :  { %v3054_v36 = vsel %vm3043_vm5, %v3037_v31, %v2878_v62 }
 0x449   :  { %2824 = vrot.lane.b32.xlu2 %v5209_v13, %s3350_s18  ;;  %2722 = vrot.lane.b32.xlu1 %v5000_v52, %s3347_s6 }
 0x44a   :  { %2776 = vrot.lane.b32.xlu0 %v5143_v21, %s3348_s2  ;;  %v2704_v21 = vrot.slane %v5209_v13, 1 }
 0x44b   :  { %v2923_v43 = vpop.permute.xlu1 %2922  ;;  %v2735_v3 = vpop.permute.xlu2 %2734 }
 0x44c   :  { %v2769_v54 = vpop.permute.xlu0 %2768  ;;  %v3071_v2 = vsel %vm3060_vm6, %v3054_v36, %v2923_v43  ;;  %v2706_v55 = vsel %vm1584_vm1, %v2704_v21, %v2705_v47  ;;  %v3005_v8 = vsel %vm2178_vm4, %v5368_v0, %v2735_v3 }
 0x44d   :  { %3299 = vmatmul.msk.f32.gmra.mxu2 %vm3090_vm7, %v3071_v2  ;;  %v3012_v22 = vsel %vm3009_vm2, %v2995_v7, %v2769_v54 }
 0x44e   :  { %v3029_v13 = vsel %vm3026_vm15, %v3012_v22, %v2817_v46 }
 0x451   :  { %2740 = vrot.lane.b32.xlu1 %v2709_v38, %s3347_s6  ;;  %2826 = vrot.lane.b32.xlu2 %v5915_v27, %s3350_s18  ;;  %v2760_v27 = vsel %vm1675_vm10, %v2758_v57, %v2759_v59 }
 0x452   :  { %2794 = vrot.lane.b32.xlu0 %v2763_v9, %s3348_s2 }
 0x453   :  { %v2733_v52 = vpop.permute.xlu1 %2732  ;;  %v2864_v15 = vpop.permute.xlu2 %2863 }
 0x454   :  { %v2787_v58 = vpop.permute.xlu0 %2786  ;;  %v3004_v30 = vsel %vm2178_vm4, %v5446_v32, %v2733_v52 }
 0x455   :  { %v3021_v33 = vsel %vm3009_vm2, %v3004_v30, %v2787_v58 }
 0x456   :  { %v3038_v37 = vsel %vm3026_vm15, %v3021_v33, %v2835_v63 }
 0x459   :  { %2869 = vrot.lane.b32.xlu1 %v2706_v55, %s3351_s19  ;;  %2916 = vrot.lane.b32.xlu2 %v5913_v53, %s3349_s10  ;;  %v5916_v53 = vld [vmem:[#allocation3_spill] sm:$0xff] }
 0x45a   :  { %2914 = vrot.lane.b32.xlu0 %v2760_v27, %s3349_s10 }
 0x45b   :  { %v2862_v19 = vpop.permute.xlu1 %2861  ;;  %v2882_v11 = vpop.permute.xlu2 %2881 }
 0x45c   :  { %v3046_v41 = vsel %vm3043_vm5, %v3029_v13, %v2862_v19  ;;  %v2907_v26 = vpop.permute.xlu0 %2906 }
 0x45d   :  { %v3063_v6 = vsel %vm3060_vm6, %v3046_v41, %v2907_v26 }
 0x45e   :  { %3291 = vmatmul.msk.f32.gmra.mxu1 %vm3090_vm7, %v3063_v6 }
 0x461   :  { %2871 = vrot.lane.b32.xlu1 %v5916_v53, %s3351_s19 }
 0x462   :  { %2724 = vrot.lane.b32.xlu0 %v2706_v55, %s3347_s6 }
 0x463   :  { %v2880_v44 = vpop.permute.xlu1 %2879  ;;  %v2773_v23 = vpop.permute.xlu2 %2772 }
 0x464   :  { %v3055_v42 = vsel %vm3043_vm5, %v3038_v37, %v2880_v44  ;;  %v2717_v49 = vpop.permute.xlu0 %2716 }
 0x465   :  { %v3072_v32 = vsel %vm3060_vm6, %v3055_v42, %v2925_v16  ;;  %v2996_v51 = vsel %vm2178_vm4, %v5315_v39, %v2717_v49 }
 0x466   :  { %3300 = vmatmul.msk.f32.gmra.mxu2 %vm3090_vm7, %v3072_v32 }
 0x469   :  { %2778 = vrot.lane.b32.xlu1 %v2760_v27, %s3348_s2 }
 0x46b   :  { %v2771_v5 = vpop.permute.xlu1 %2770  ;;  %v2791_v48 = vpop.permute.xlu2 %2790 }
 0x46c   :  { %v2819_v17 = vpop.permute.xlu0 %2818  ;;  %v3013_v38 = vsel %vm3009_vm2, %v2996_v51, %v2771_v5 }
 0x46d   :  { %v3030_v34 = vsel %vm3026_vm15, %v3013_v38, %v2819_v17 }
 0x46e   :  { %v3047_v10 = vsel %vm3043_vm5, %v3030_v34, %v2864_v15 }
 0x473   :  { %v2789_v4 = vpop.permute.xlu1 %2788  ;;  %v2911_v25 = vpop.permute.xlu2 %2910 }
 0x474   :  { %v2837_v46 = vpop.permute.xlu0 %2836  ;;  %v3022_v40 = vsel %vm3009_vm2, %v3005_v8, %v2789_v4 }
 0x475   :  { %v3039_v28 = vsel %vm3026_vm15, %v3022_v40, %v2837_v46 }
 0x476   :  { %v3056_v39 = vsel %vm3043_vm5, %v3039_v28, %v2882_v11 }
 0x47b   :  { %v2909_v60 = vpop.permute.xlu1 %2908  ;;  %v2721_v54 = vpop.permute.xlu2 %2720 }
 0x47c   :  { %v2927_v35 = vpop.permute.xlu0 %2926  ;;  %v3064_v50 = vsel %vm3060_vm6, %v3047_v10, %v2909_v60  ;;  %v2998_v33 = vsel %vm2178_vm4, %v5419_v61, %v2721_v54 }
 0x47d   :  { %3292 = vmatmul.msk.f32.gmra.mxu1 %vm3090_vm7, %v3064_v50  ;;  %v3073_v0 = vsel %vm3060_vm6, %v3056_v39, %v2927_v35 }
 0x47e   :  { %3301 = vmatmul.msk.f32.gmra.mxu2 %vm3090_vm7, %v3073_v0 }
 0x483   :  { %v2719_v63 = vpop.permute.xlu1 %2718  ;;  %v2739_v47 = vpop.permute.xlu2 %2738 }
 0x484   :  { %v2737_v9 = vpop.permute.xlu0 %2736  ;;  %v2997_v1 = vsel %vm2178_vm4, %v5397_v20, %v2719_v63  ;;  %v5610_v20 = vld [vmem:[%s5738_s4] ss:$0 sm:$0xff] }
 0x485   :  { %v3014_v29 = vsel %vm3009_vm2, %v2997_v1, %v2773_v23  ;;  %v3006_v24 = vsel %vm2178_vm4, %v5450_v18, %v2737_v9 }
 0x486   :  { %v3023_v21 = vsel %vm3009_vm2, %v3006_v24, %v2791_v48 }
 0x48b   :  { %v2821_v62 = vpop.permute.xlu1 %2820  ;;  %v2868_v13 = vpop.permute.xlu2 %2867 }
 0x48c   :  { %v3031_v31 = vsel %vm3026_vm15, %v3014_v29, %v2821_v62  ;;  %v2866_v16 = vpop.permute.xlu0 %2865 }
 0x48d   :  { %v3048_v36 = vsel %vm3043_vm5, %v3031_v31, %v2866_v16 }
 0x48e   :  { %v3065_v43 = vsel %vm3060_vm6, %v3048_v36, %v2911_v25 }
 0x48f   :  { %3293 = vmatmul.msk.f32.gmra.mxu1 %vm3090_vm7, %v3065_v43 }
 0x493   :  { %v2839_v2 = vpop.permute.xlu1 %2838  ;;  %v2886_v49 = vpop.permute.xlu2 %2885 }
 0x494   :  { %v2884_v52 = vpop.permute.xlu0 %2883  ;;  %v3040_v3 = vsel %vm3026_vm15, %v3023_v21, %v2839_v2 }
 0x495   :  { %v3057_v59 = vsel %vm3043_vm5, %v3040_v3, %v2884_v52 }
 0x499   :  { %v3180_v58 = vpop.f32.mrf.mxu2 }
 0x49a   :  { %v3181_v57 = vadd.f32 %v5610_v20, %v3180_v58 }
 0x49b   :  { %v2929_v7 = vpop.permute.xlu1 %2928  ;;  %v2685_v28 = vpop.permute.xlu2 %2684 }
 0x49c   :  { %vm3212_vm0 = vcmp.gt.f32.partialorder %v3181_v57, 0.0  ;;  %v3228_v22 = vmul.f32 0.01, %v3181_v57  ;;  %v2683_v18 = vpop.permute.xlu0 %2682  ;;  %v3074_v55 = vsel %vm3060_vm6, %v3057_v59, %v2929_v7  ;;  %v2992_v16 = vsel %vm2144_vm3, %v5365_v12, %v2685_v28 }
 0x49d   :  { %3302 = vmatmul.msk.f32.gmra.mxu2 %vm3090_vm7, %v3074_v55  ;;  %v2991_v26 = vsel %vm2144_vm3, %v5354_v14, %v2683_v18 }
 0x49e   :  { %v3244_v27 = vsel %vm3212_vm0, %v3181_v57, %v3228_v22  ;;  %v3007_v42 = vsel %vm2178_vm4, %v2991_v26, %v2739_v47 }
 0x49f   :  { %3260 = vst.msk [vmem:[%s5739_s5 + $0x40] sm:$0xff] %vm2077_vm13, %v3244_v27 }
 0x4a3   :  { %v2775_v19 = vpop.permute.xlu1 %2774  ;;  %v2825_v0 = vpop.permute.xlu2 %2824 }
 0x4a4   :  { %v2823_v41 = vpop.permute.xlu0 %2822  ;;  %v3015_v44 = vsel %vm3009_vm2, %v2998_v33, %v2775_v19 }
 0x4a5   :  { %v3032_v14 = vsel %vm3026_vm15, %v3015_v44, %v2823_v41 }
 0x4a6   :  { %v3049_v4 = vsel %vm3043_vm5, %v3032_v14, %v2868_v13 }
 0x4aa   :  { %v3156_v30 = vpop.f32.mrf.mxu1 }
 0x4ab   :  { %v3157_v6 = vadd.f32 %v5610_v20, %v3156_v30  ;;  %v2793_v15 = vpop.permute.xlu1 %2792  ;;  %v2827_v62 = vpop.permute.xlu2 %2826 }
 0x4ac   :  { %v2841_v53 = vpop.permute.xlu0 %2840  ;;  %v3024_v32 = vsel %vm3009_vm2, %v3007_v42, %v2793_v15 }
 0x4ad   :  { %vm3204_vm1 = vcmp.gt.f32.partialorder %v3157_v6, 0.0  ;;  %v3220_v37 = vmul.f32 0.01, %v3157_v6  ;;  %v3041_v61 = vsel %vm3026_vm15, %v3024_v32, %v2841_v53 }
 0x4ae   :  { %v3058_v38 = vsel %vm3043_vm5, %v3041_v61, %v2886_v49 }
 0x4af   :  { %v3236_v11 = vsel %vm3204_vm1, %v3157_v6, %v3220_v37 }
 0x4b0   :  { %3252 = vst.msk [vmem:[%s5739_s5] sm:$0xff] %vm2077_vm13, %v3236_v11 }
 0x4b1   :  { %v3183_v5 = vpop.f32.mrf.mxu2 }
 0x4b2   :  { %v3184_v17 = vadd.f32 %v5610_v20, %v3183_v5 }
 0x4b3   :  { %v2913_v23 = vpop.permute.xlu1 %2912  ;;  %v2917_v21 = vpop.permute.xlu2 %2916 }
 0x4b4   :  { %vm3213_vm10 = vcmp.gt.f32.partialorder %v3184_v17, 0.0  ;;  %v3229_v51 = vmul.f32 0.01, %v3184_v17  ;;  %v2931_v46 = vpop.permute.xlu0 %2930  ;;  %v3066_v8 = vsel %vm3060_vm6, %v3049_v4, %v2913_v23 }
 0x4b5   :  { %3294 = vmatmul.msk.f32.gmra.mxu1 %vm3090_vm7, %v3066_v8  ;;  %v3075_v40 = vsel %vm3060_vm6, %v3058_v38, %v2931_v46 }
 0x4b6   :  { %v3245_v34 = vsel %vm3213_vm10, %v3184_v17, %v3229_v51  ;;  %3303 = vmatmul.msk.f32.gmra.mxu2 %vm3090_vm7, %v3075_v40 }
 0x4b7   :  { %3261 = vst.msk [vmem:[%s5739_s5 + $0x48] sm:$0xff] %vm2077_vm13, %v3245_v34 }
 0x4bb   :  { %v2723_v60 = vpop.permute.xlu1 %2722 }
 0x4bc   :  { %v2777_v10 = vpop.permute.xlu0 %2776  ;;  %v3159_v48 = vpop.f32.mrf.mxu1  ;;  %v2999_v25 = vsel %vm2178_vm4, %v5334_v56, %v2723_v60 }
 0x4bd   :  { %v3160_v35 = vadd.f32 %v5610_v20, %v3159_v48  ;;  %v3016_v1 = vsel %vm3009_vm2, %v2999_v25, %v2777_v10 }
 0x4be   :  { %v3033_v31 = vsel %vm3026_vm15, %v3016_v1, %v2825_v0 }
 0x4bf   :  { %vm3205_vm9 = vcmp.gt.f32.partialorder %v3160_v35, 0.0  ;;  %v3221_v50 = vmul.f32 0.01, %v3160_v35 }
 0x4c1   :  { %v3237_v39 = vsel %vm3205_vm9, %v3160_v35, %v3221_v50 }
 0x4c2   :  { %3253 = vst.msk [vmem:[%s5739_s5 + $0x8] sm:$0xff] %vm2077_vm13, %v3237_v39 }
 0x4c3   :  { %v2741_v63 = vpop.permute.xlu1 %2740 }
 0x4c4   :  { %v2795_v9 = vpop.permute.xlu0 %2794  ;;  %v3008_v54 = vsel %vm2178_vm4, %v2992_v16, %v2741_v63 }
 0x4c5   :  { %v3025_v56 = vsel %vm3009_vm2, %v3008_v54, %v2795_v9 }
 0x4c6   :  { %v3042_v3 = vsel %vm3026_vm15, %v3025_v56, %v2827_v62 }
 0x4cb   :  { %v2870_v29 = vpop.permute.xlu1 %2869 }
 0x4cc   :  { %v3050_v36 = vsel %vm3043_vm5, %v3033_v31, %v2870_v29  ;;  %v2915_v43 = vpop.permute.xlu0 %2914 }
 0x4cd   :  { %v3067_v2 = vsel %vm3060_vm6, %v3050_v36, %v2915_v43 }
 0x4ce   :  { %3295 = vmatmul.msk.f32.gmra.mxu1 %vm3090_vm7, %v3067_v2 }
 0x4d0   :  { %v3186_v24 = vpop.f32.mrf.mxu2 }
 0x4d1   :  { %v3187_v52 = vadd.f32 %v5610_v20, %v3186_v24 }
 0x4d3   :  { %vm3214_vm11 = vcmp.gt.f32.partialorder %v3187_v52, 0.0  ;;  %v3230_v58 = vmul.f32 0.01, %v3187_v52  ;;  %v2872_v12 = vpop.permute.xlu1 %2871 }
 0x4d4   :  { %v3059_v47 = vsel %vm3043_vm5, %v3042_v3, %v2872_v12  ;;  %v2725_v7 = vpop.permute.xlu0 %2724 }
 0x4d5   :  { %v3246_v57 = vsel %vm3214_vm11, %v3187_v52, %v3230_v58  ;;  %v3076_v59 = vsel %vm3060_vm6, %v3059_v47, %v2917_v21  ;;  %v3000_v22 = vsel %vm2178_vm4, %v5423_v45, %v2725_v7 }
 0x4d6   :  { %3262 = vst.msk [vmem:[%s5739_s5 + $0x50] sm:$0xff] %vm2077_vm13, %v3246_v57  ;;  %3304 = vmatmul.msk.f32.gmra.mxu2 %vm3090_vm7, %v3076_v59 }
 0x4db   :  { %v2779_v18 = vpop.permute.xlu1 %2778  ;;  %v3162_v55 = vpop.f32.mrf.mxu1 }
 0x4dc   :  { %v3017_v27 = vsel %vm3009_vm2, %v3000_v22, %v2779_v18  ;;  %v3163_v19 = vadd.f32 %v5610_v20, %v3162_v55 }
 0x4dd   :  { %v3034_v13 = vsel %vm3026_vm15, %v3017_v27, %v2827_v62 }
 0x4de   :  { %vm3206_vm3 = vcmp.gt.f32.partialorder %v3163_v19, 0.0  ;;  %v3222_v41 = vmul.f32 0.01, %v3163_v19  ;;  %v3051_v26 = vsel %vm3043_vm5, %v3034_v13, %v2872_v12 }
 0x4df   :  { %v3068_v30 = vsel %vm3060_vm6, %v3051_v26, %v2917_v21 }
 0x4e0   :  { %v3238_v6 = vsel %vm3206_vm3, %v3163_v19, %v3222_v41  ;;  %3296 = vmatmul.msk.f32.gmra.mxu1 %vm3090_vm7, %v3068_v30 }
 0x4e1   :  { %3254 = vst.msk [vmem:[%s5739_s5 + $0x10] sm:$0xff] %vm2077_vm13, %v3238_v6 }
 0x4e9   :  { %v3189_v45 = vpop.f32.mrf.mxu2 }
 0x4ea   :  { %v3190_v15 = vadd.f32 %v5610_v20, %v3189_v45 }
 0x4ec   :  { %vm3215_vm4 = vcmp.gt.f32.partialorder %v3190_v15, 0.0  ;;  %v3231_v33 = vmul.f32 0.01, %v3190_v15 }
 0x4ee   :  { %v3247_v53 = vsel %vm3215_vm4, %v3190_v15, %v3231_v33 }
 0x4ef   :  { %3263 = vst.msk [vmem:[%s5739_s5 + $0x58] sm:$0xff] %vm2077_vm13, %v3247_v53 }
 0x4fa   :  { %v3165_v44 = vpop.f32.mrf.mxu1 }
 0x4fb   :  { %v3166_v37 = vadd.f32 %v5610_v20, %v3165_v44 }
 0x4fd   :  { %vm3207_vm12 = vcmp.gt.f32.partialorder %v3166_v37, 0.0  ;;  %v3223_v42 = vmul.f32 0.01, %v3166_v37 }
 0x4ff   :  { %v3239_v49 = vsel %vm3207_vm12, %v3166_v37, %v3223_v42 }
 0x500   :  { %3255 = vst.msk [vmem:[%s5739_s5 + $0x18] sm:$0xff] %vm2077_vm13, %v3239_v49 }
 0x501   :  { %v3192_v32 = vpop.f32.mrf.mxu2 }
 0x502   :  { %v3193_v11 = vadd.f32 %v5610_v20, %v3192_v32 }
 0x504   :  { %vm3216_vm14 = vcmp.gt.f32.partialorder %v3193_v11, 0.0  ;;  %v3232_v14 = vmul.f32 0.01, %v3193_v11 }
 0x506   :  { %v3248_v61 = vsel %vm3216_vm14, %v3193_v11, %v3232_v14 }
 0x507   :  { %3264 = vst.msk [vmem:[%s5739_s5 + $0x60] sm:$0xff] %vm2077_vm13, %v3248_v61 }
 0x50c   :  { %v3168_v5 = vpop.f32.mrf.mxu1 }
 0x50d   :  { %v3169_v17 = vadd.f32 %v5610_v20, %v3168_v5 }
 0x50f   :  { %vm3208_vm2 = vcmp.gt.f32.partialorder %v3169_v17, 0.0  ;;  %v3224_v23 = vmul.f32 0.01, %v3169_v17 }
 0x511   :  { %v3240_v4 = vsel %vm3208_vm2, %v3169_v17, %v3224_v23 }
 0x512   :  { %3256 = vst.msk [vmem:[%s5739_s5 + $0x20] sm:$0xff] %vm2077_vm13, %v3240_v4 }
 0x520   :  { %v3195_v51 = vpop.f32.mrf.mxu2 }
 0x521   :  { %v3196_v46 = vadd.f32 %v5610_v20, %v3195_v51 }
 0x523   :  { %vm3217_vm15 = vcmp.gt.f32.partialorder %v3196_v46, 0.0  ;;  %v3233_v8 = vmul.f32 0.01, %v3196_v46 }
 0x525   :  { %v3249_v38 = vsel %vm3217_vm15, %v3196_v46, %v3233_v8 }
 0x526   :  { %3265 = vst.msk [vmem:[%s5739_s5 + $0x68] sm:$0xff] %vm2077_vm13, %v3249_v38 }
 0x532   :  { %v3171_v40 = vpop.f32.mrf.mxu1 }
 0x533   :  { %v3172_v34 = vadd.f32 %v5610_v20, %v3171_v40 }
 0x535   :  { %vm3209_vm5 = vcmp.gt.f32.partialorder %v3172_v34, 0.0  ;;  %v3225_v28 = vmul.f32 0.01, %v3172_v34 }
 0x537   :  { %v3241_v60 = vsel %vm3209_vm5, %v3172_v34, %v3225_v28 }
 0x538   :  { %3257 = vst.msk [vmem:[%s5739_s5 + $0x28] sm:$0xff] %vm2077_vm13, %v3241_v60 }
 0x539   :  { %v3198_v10 = vpop.f32.mrf.mxu2 }
 0x53a   :  { %v3199_v48 = vadd.f32 %v5610_v20, %v3198_v10 }
 0x53c   :  { %vm3218_vm6 = vcmp.gt.f32.partialorder %v3199_v48, 0.0  ;;  %v3234_v35 = vmul.f32 0.01, %v3199_v48 }
 0x53e   :  { %v3250_v50 = vsel %vm3218_vm6, %v3199_v48, %v3234_v35 }
 0x53f   :  { %3266 = vst.msk [vmem:[%s5739_s5 + $0x70] sm:$0xff] %vm2077_vm13, %v3250_v50 }
 0x54b   :  { %v3174_v39 = vpop.f32.mrf.mxu1 }
 0x54c   :  { %v3175_v0 = vadd.f32 %v5610_v20, %v3174_v39 }
 0x54e   :  { %vm3210_vm7 = vcmp.gt.f32.partialorder %v3175_v0, 0.0  ;;  %v3226_v63 = vmul.f32 0.01, %v3175_v0 }
 0x550   :  { %v3242_v9 = vsel %vm3210_vm7, %v3175_v0, %v3226_v63 }
 0x551   :  { %3258 = vst.msk [vmem:[%s5739_s5 + $0x30] sm:$0xff] %vm2077_vm13, %v3242_v9 }
 0x559   :  { %v3201_v25 = vpop.f32.mrf.mxu2 }
 0x55a   :  { %v3202_v1 = vadd.f32 %v5610_v20, %v3201_v25 }
 0x55c   :  { %vm3219_vm8 = vcmp.gt.f32.partialorder %v3202_v1, 0.0  ;;  %v3235_v62 = vmul.f32 0.01, %v3202_v1 }
 0x55d   :  { %v3177_v29 = vpop.f32.mrf.mxu1 }
 0x55e   :  { %v3251_v31 = vsel %vm3219_vm8, %v3202_v1, %v3235_v62  ;;  %v3178_v16 = vadd.f32 %v5610_v20, %v3177_v29 }
 0x55f   :  { %3267 = vst.msk [vmem:[%s5739_s5 + $0x78] sm:$0xff] %vm2077_vm13, %v3251_v31 }
 0x560   :  { %vm3211_vm0 = vcmp.gt.f32.partialorder %v3178_v16, 0.0  ;;  %v3227_v36 = vmul.f32 0.01, %v3178_v16 }
 0x562   :  { %v3243_v43 = vsel %vm3211_vm0, %v3178_v16, %v3227_v36 }
 0x563   :  { %3259 = vst.msk [vmem:[%s5739_s5 + $0x38] sm:$0xff] %vm2077_vm13, %v3243_v43 }

</bundles_post_ra>
